<compile_context>
chip_gen: v7x
topology: tpu7x:2x2x1
jax: 0.10.0
libtpu: 0.0.40
codegen_flags: <defaults>
</compile_context>

<pallas_src>
import jax
import jax.numpy as jnp
from jax import lax
from jax.experimental import pallas as pl
from jax.experimental.pallas import tpu as pltpu

DIM = 3                  # node / edge feature dim (matches `dim = 3` in the PyTorch script)
HID = 32                 # hidden channels of both NNConv layers
KR = (DIM + 1) * HID     # 128 : Khatri-Rao width  [ea0*x | ea1*x | ea2*x | x]
LANE = 128               # padded output width (lane-dense store)
TILE_E = 512             # edge tile (multiple of 128)


def _round_up(x, m):
    return ((x + m - 1) // m) * m


# --------------------------------------------------------------------------------------
# Kernel.  Grid = (layer, edge_tile).  Node-side state lives in VMEM scratch:
#   h_ref  [N, 32] : input node features of the current layer
#   agg_ref[N, 32] : scatter-add accumulator over edge tiles
# --------------------------------------------------------------------------------------
def net_mp_kernel(x_ref, ea_ref, src_ref, dst_ref,
                  wstack_ref, wroot_ref, b_ref,
                  wfc1_ref, bfc1_ref, wfc2_ref, bfc2_ref,
                  out_ref, h_ref, agg_ref):
    layer = pl.program_id(0)
    et = pl.program_id(1)
    n_et = pl.num_programs(1)

    @pl.when(jnp.logical_and(layer == 0, et == 0))
    def _init():
        h_ref[...] = x_ref[...]
        agg_ref[...] = jnp.zeros_like(agg_ref)

    n_pad = h_ref.shape[0]
    te = ea_ref.shape[0]

    # ---- one-hot gather / scatter masks rebuilt in VMEM from O(E) index streams ----
    src = src_ref[...]                                            # [TE, 1] int32 (pad = -1)
    dst = dst_ref[...]                                            # [1, TE] int32 (pad = -1)
    lane_nodes = lax.broadcasted_iota(jnp.int32, (te, n_pad), 1)
    sub_nodes = lax.broadcasted_iota(jnp.int32, (n_pad, te), 0)
    g = (src == lane_nodes).astype(jnp.float32)                   # [TE, N]  gather one-hot
    s = (dst == sub_nodes).astype(jnp.float32)                    # [N, TE]  scatter one-hot^T

    # ---- message passing for one edge tile (shared by both layers) ----
    x_src = jnp.dot(g, h_ref[...], preferred_element_type=jnp.float32)       # [TE, 32]

    # Khatri-Rao message with K = 128:
    #   msg = [ea0*x | ea1*x | ea2*x | x] @ [W0 ; W1 ; W2 ; B]
    a = ea_ref[...] * jnp.concatenate([x_src, x_src, x_src, x_src], axis=1)  # [TE, 128]
    msg = jnp.dot(a, wstack_ref[...], preferred_element_type=jnp.float32)    # [TE, 32]

    agg_ref[...] += jnp.dot(s, msg, preferred_element_type=jnp.float32)      # [N, 32]

    # ---- finalize the layer after its last edge tile ----
    @pl.when(et == n_et - 1)
    def _finalize():
        node = jnp.maximum(
            agg_ref[...]
            + jnp.dot(h_ref[...], wroot_ref[...], preferred_element_type=jnp.float32)
            + b_ref[...],
            0.0)

        @pl.when(layer == 0)
        def _prep_next_layer():
            h_ref[...] = node
            agg_ref[...] = jnp.zeros_like(agg_ref)

        @pl.when(layer == 1)
        def _head():
            h3 = jnp.maximum(
                jnp.dot(node, wfc1_ref[...], preferred_element_type=jnp.float32)
                + bfc1_ref[...], 0.0)
            out_ref[...] = (jnp.dot(h3, wfc2_ref[...], preferred_element_type=jnp.float32)
                            + bfc2_ref[...])


# --------------------------------------------------------------------------------------
# Parameter packing (wrapper side).
#   NNConv message: msg_e = sum_d ea[e,d] * (x_src @ W_d) + x_src @ B
#   where W_d[c,o] = wnn[d, c*cout + o], B[c,o] = bnn[c*cout + o].
#   Stack vertically: Wstack = [W_0 ; W_1 ; W_2 ; B]  -> [4*cout_in_rows, cout]
#   (cin padded to 32 for conv1 with zero rows).
# --------------------------------------------------------------------------------------
def _pack_conv_params(p):
    # conv1 (cin = 3, padded to 32)
    w1 = p["wnn1"].reshape(DIM, DIM, HID)                 # [d, c, o]
    b1 = p["bnn1"].reshape(DIM, HID)                      # [c, o]
    wstack1 = jnp.zeros((KR, HID), jnp.float32)
    for d in range(DIM):
        wstack1 = wstack1.at[d * HID:d * HID + DIM, :].set(w1[d])
    wstack1 = wstack1.at[DIM * HID:DIM * HID + DIM, :].set(b1)

    # conv2 (cin = 32)
    w2 = p["wnn2"].reshape(DIM, HID, HID)                 # [d, c, o]
    b2 = p["bnn2"].reshape(HID, HID)                      # [c, o]
    wstack2 = jnp.concatenate([w2[0], w2[1], w2[2], b2], axis=0)   # [128, 32]

    wstack = jnp.stack([wstack1, wstack2])                # [2, 128, 32]

    wroot1 = jnp.zeros((HID, HID), jnp.float32).at[:DIM].set(p["wroot1"])
    wroot = jnp.stack([wroot1, p["wroot2"]])              # [2, 32, 32]
    bias = jnp.stack([p["b1"], p["b2"]])                  # [2, 1, 32]
    return wstack, wroot, bias


@jax.jit
def net_mp_forward(x, edge_index, edge_attr, params):
    N = x.shape[0]
    E = edge_index.shape[1]
    N_pad = _round_up(max(N, 8), 8)
    E_pad = _round_up(max(E, TILE_E), TILE_E)
    n_et = E_pad // TILE_E

    pad_idx = -jnp.ones((E_pad - E,), jnp.int32)          # -1 -> all-zero one-hot row/col
    src_col = jnp.concatenate([edge_index[0].astype(jnp.int32), pad_idx]).reshape(E_pad, 1)
    dst_row = jnp.concatenate([edge_index[1].astype(jnp.int32), pad_idx]).reshape(1, E_pad)

    # Lane-dense edge-attr replication: [ea0 x32 | ea1 x32 | ea2 x32 | ones x32]
    ea_pad = jnp.zeros((E_pad, DIM), jnp.float32).at[:E].set(edge_attr)
    ea_rep = jnp.concatenate(
        [jnp.repeat(ea_pad[:, d:d + 1], HID, axis=1) for d in range(DIM)]
        + [jnp.ones((E_pad, HID), jnp.float32)], axis=1)  # [E_pad, 128]

    x_pad = jnp.zeros((N_pad, HID), jnp.float32).at[:N, :DIM].set(x)

    wstack, wroot, bias = _pack_conv_params(params)
    wfc2p = jnp.zeros((HID, LANE), jnp.float32).at[:, :1].set(params["wfc2"])
    bfc2p = jnp.zeros((1, LANE), jnp.float32).at[:, :1].set(params["bfc2"])

    out = pl.pallas_call(
        net_mp_kernel,
        out_shape=jax.ShapeDtypeStruct((N_pad, LANE), jnp.float32),
        grid_spec=pltpu.PrefetchScalarGridSpec(
            num_scalar_prefetch=0,
            grid=(2, n_et),
            in_specs=[
                pl.BlockSpec((N_pad, HID), lambda l, e: (0, 0)),          # x_pad (resident)
                pl.BlockSpec((TILE_E, KR), lambda l, e: (e, 0)),          # ea_rep
                pl.BlockSpec((TILE_E, 1), lambda l, e: (e, 0)),           # src indices
                pl.BlockSpec((1, TILE_E), lambda l, e: (0, e)),           # dst indices
                pl.BlockSpec((None, KR, HID), lambda l, e: (l, 0, 0)),    # Wstack (per layer)
                pl.BlockSpec((None, HID, HID), lambda l, e: (l, 0, 0)),   # wroot  (per layer)
                pl.BlockSpec((None, 1, HID), lambda l, e: (l, 0, 0)),     # bias   (per layer)
                pl.BlockSpec((HID, HID), lambda l, e: (0, 0)),            # wfc1
                pl.BlockSpec((1, HID), lambda l, e: (0, 0)),              # bfc1
                pl.BlockSpec((HID, LANE), lambda l, e: (0, 0)),           # wfc2 (padded)
                pl.BlockSpec((1, LANE), lambda l, e: (0, 0)),             # bfc2 (padded)
            ],
            out_specs=pl.BlockSpec((N_pad, LANE), lambda l, e: (0, 0)),
            scratch_shapes=[
                pltpu.VMEM((N_pad, HID), jnp.float32),   # current layer node features
                pltpu.VMEM((N_pad, HID), jnp.float32),   # scatter-add accumulator
            ],
        ),
        compiler_params=pltpu.CompilerParams(
            dimension_semantics=("arbitrary", "arbitrary"),
            vmem_limit_bytes=32 * 1024 * 1024,
        ),
    )(x_pad, ea_rep, src_col, dst_row, wstack, wroot, bias,
      params["wfc1"], params["bfc1"], wfc2p, bfc2p)

    return out[:N, :1]


# --------------------------------------------------------------------------------------
# Parameters + pure-JAX reference (mirrors PyG NNConv with aggr='add', root + bias)
# --------------------------------------------------------------------------------------
def init_params(key):
    ks = jax.random.split(key, 12)
    s = 0.1
    return {
        "wnn1":   s * jax.random.normal(ks[0], (DIM, DIM * HID), jnp.float32),
        "bnn1":   s * jax.random.normal(ks[1], (1, DIM * HID), jnp.float32),
        "wroot1": s * jax.random.normal(ks[2], (DIM, HID), jnp.float32),
        "b1":     s * jax.random.normal(ks[3], (1, HID), jnp.float32),
        "wnn2":   s * jax.random.normal(ks[4], (DIM, HID * HID), jnp.float32),
        "bnn2":   s * jax.random.normal(ks[5], (1, HID * HID), jnp.float32),
        "wroot2": s * jax.random.normal(ks[6], (HID, HID), jnp.float32),
        "b2":     s * jax.random.normal(ks[7], (1, HID), jnp.float32),
        "wfc1":   s * jax.random.normal(ks[8], (HID, HID), jnp.float32),
        "bfc1":   s * jax.random.normal(ks[9], (1, HID), jnp.float32),
        "wfc2":   s * jax.random.normal(ks[10], (HID, 1), jnp.float32),
        "bfc2":   s * jax.random.normal(ks[11], (1, 1), jnp.float32),
    }


def ref_forward(x, edge_index, edge_attr, p):
    src, dst = edge_index[0], edge_index[1]

    def nnconv(xin, cin, cout, wnn, bnn, wroot, b):
        W = (edge_attr @ wnn + bnn).reshape(-1, cin, cout)      # [E, cin, cout]
        xj = xin[src]                                           # [E, cin]
        msg = jnp.einsum("ec,eco->eo", xj, W)                   # [E, cout]
        agg = jnp.zeros((xin.shape[0], cout), jnp.float32).at[dst].add(msg)
        return agg + xin @ wroot + b

    h = jax.nn.relu(nnconv(x, DIM, HID, p["wnn1"], p["bnn1"], p["wroot1"], p["b1"]))
    h = jax.nn.relu(nnconv(h, HID, HID, p["wnn2"], p["bnn2"], p["wroot2"], p["b2"]))
    h = jax.nn.relu(h @ p["wfc1"] + p["bfc1"])
    return h @ p["wfc2"] + p["bfc2"]


if __name__ == "__main__":
    key = jax.random.PRNGKey(0)
    k_x, k_src, k_dst, k_ea, k_p = jax.random.split(key, 5)

    # Small graph, enough edges to exercise multiple edge tiles (600 -> 2 tiles of 512).
    N, E = 64, 600
    x = jax.random.normal(k_x, (N, DIM), jnp.float32)
    src = jax.random.randint(k_src, (E,), 0, N, dtype=jnp.int32)
    dst = jax.random.randint(k_dst, (E,), 0, N, dtype=jnp.int32)
    edge_index = jnp.stack([src, dst], axis=0)                   # [2, E]
    edge_attr = jax.random.normal(k_ea, (E, DIM), jnp.float32)   # [E, 3]
    params = init_params(k_p)

    out = net_mp_forward(x, edge_index, edge_attr, params)
    out = jax.block_until_ready(out)

    ref = ref_forward(x, edge_index, edge_attr, params)
    if out.shape != (N, 1) or not jnp.allclose(out, ref, atol=2e-4, rtol=2e-4):
        raise AssertionError("Pallas kernel does not match reference")
    print("KERNEL_OK")
</pallas_src>

<mosaic_0001>
module attributes {stable_mosaic.version = 11 : i64} {
  func.func @net_mp_kernel(%arg0: i32, %arg1: i32, %arg2: memref<64x32xf32, #tpu.memory_space<vmem>>, %arg3: memref<512x128xf32, #tpu.memory_space<vmem>>, %arg4: memref<512x1xi32, #tpu.memory_space<vmem>>, %arg5: memref<1x512xi32, #tpu.memory_space<vmem>>, %arg6: memref<1x128x32xf32, #tpu.memory_space<vmem>>, %arg7: memref<1x32x32xf32, #tpu.memory_space<vmem>>, %arg8: memref<1x1x32xf32, #tpu.memory_space<vmem>>, %arg9: memref<32x32xf32, #tpu.memory_space<vmem>>, %arg10: memref<1x32xf32, #tpu.memory_space<vmem>>, %arg11: memref<32x128xf32, #tpu.memory_space<vmem>>, %arg12: memref<1x128xf32, #tpu.memory_space<vmem>>, %arg13: memref<64x128xf32, #tpu.memory_space<vmem>>, %arg14: memref<64x32xf32, #tpu.memory_space<vmem>>, %arg15: memref<64x32xf32, #tpu.memory_space<vmem>>) attributes {dimension_semantics = [#tpu.dimension_semantics<arbitrary>, #tpu.dimension_semantics<arbitrary>], iteration_bounds = array<i64: 2, 2>, scalar_prefetch = 0 : i64, scratch_operands = 2 : i64, tpu.core_type = #tpu.core_type<tc>, window_params = [{pipeline_mode = #tpu.pipeline_mode<synchronous>, transform_indices = @transform_0, window_bounds = array<i64: 64, 32>}, {transform_indices = @transform_1, window_bounds = array<i64: 512, 128>}, {transform_indices = @transform_2, window_bounds = array<i64: 512, 1>}, {transform_indices = @transform_3, window_bounds = array<i64: 1, 512>}, {transform_indices = @transform_4, window_bounds = array<i64: 1, 128, 32>}, {transform_indices = @transform_5, window_bounds = array<i64: 1, 32, 32>}, {transform_indices = @transform_6, window_bounds = array<i64: 1, 1, 32>}, {pipeline_mode = #tpu.pipeline_mode<synchronous>, transform_indices = @transform_7, window_bounds = array<i64: 32, 32>}, {pipeline_mode = #tpu.pipeline_mode<synchronous>, transform_indices = @transform_8, window_bounds = array<i64: 1, 32>}, {pipeline_mode = #tpu.pipeline_mode<synchronous>, transform_indices = @transform_9, window_bounds = array<i64: 32, 128>}, {pipeline_mode = #tpu.pipeline_mode<synchronous>, transform_indices = @transform_10, window_bounds = array<i64: 1, 128>}, {pipeline_mode = #tpu.pipeline_mode<synchronous>, transform_indices = @transform_11, window_bounds = array<i64: 64, 128>}]} {
    %c0_i32 = arith.constant 0 : i32
    %0 = arith.cmpi eq, %arg0, %c0_i32 : i32
    %c0_i32_0 = arith.constant 0 : i32
    %1 = arith.cmpi eq, %arg1, %c0_i32_0 : i32
    %2 = arith.andi %0, %1 : i1
    %3 = arith.extui %2 : i1 to i32
    %c0_i32_1 = arith.constant 0 : i32
    %4 = arith.cmpi ne, %3, %c0_i32_1 : i32
    scf.if %4 {
      %c0_19 = arith.constant 0 : index
      %c0_20 = arith.constant 0 : index
      %32 = vector.load %arg2[%c0_19, %c0_20] : memref<64x32xf32, #tpu.memory_space<vmem>>, vector<64x32xf32>
      %c0_21 = arith.constant 0 : index
      %c0_22 = arith.constant 0 : index
      %33 = vector.load %arg14[%c0_21, %c0_22] : memref<64x32xf32, #tpu.memory_space<vmem>>, vector<64x32xf32>
      tpu.vector_store %arg14[%c0_21, %c0_22], %32 {strides = array<i32>} : memref<64x32xf32, #tpu.memory_space<vmem>>, vector<64x32xf32>,
      %cst_23 = arith.constant 0.000000e+00 : f32
      %34 = vector.broadcast %cst_23 : f32 to vector<64x32xf32>
      %c0_24 = arith.constant 0 : index
      %c0_25 = arith.constant 0 : index
      %35 = vector.load %arg15[%c0_24, %c0_25] : memref<64x32xf32, #tpu.memory_space<vmem>>, vector<64x32xf32>
      tpu.vector_store %arg15[%c0_24, %c0_25], %34 {strides = array<i32>} : memref<64x32xf32, #tpu.memory_space<vmem>>, vector<64x32xf32>,
    } else {
    }
    %c0 = arith.constant 0 : index
    %c0_2 = arith.constant 0 : index
    %5 = vector.load %arg4[%c0, %c0_2] : memref<512x1xi32, #tpu.memory_space<vmem>>, vector<512x1xi32>
    %c0_3 = arith.constant 0 : index
    %c0_4 = arith.constant 0 : index
    %6 = vector.load %arg5[%c0_3, %c0_4] : memref<1x512xi32, #tpu.memory_space<vmem>>, vector<1x512xi32>
    %7 = tpu.iota {dimensions = array<i32: 1>} : vector<512x64xi32>
    %8 = tpu.iota {dimensions = array<i32: 0>} : vector<64x512xi32>
    %9 = vector.broadcast %5 : vector<512x1xi32> to vector<512x64xi32>
    %10 = arith.cmpi eq, %9, %7 : vector<512x64xi32>
    %11 = arith.extui %10 : vector<512x64xi1> to vector<512x64xi32>
    %12 = arith.sitofp %11 : vector<512x64xi32> to vector<512x64xf32>
    %13 = vector.broadcast %6 : vector<1x512xi32> to vector<64x512xi32>
    %14 = arith.cmpi eq, %13, %8 : vector<64x512xi32>
    %15 = arith.extui %14 : vector<64x512xi1> to vector<64x512xi32>
    %16 = arith.sitofp %15 : vector<64x512xi32> to vector<64x512xf32>
    %c0_5 = arith.constant 0 : index
    %c0_6 = arith.constant 0 : index
    %17 = vector.load %arg14[%c0_5, %c0_6] : memref<64x32xf32, #tpu.memory_space<vmem>>, vector<64x32xf32>
    %cst = arith.constant dense<0.000000e+00> : vector<512x32xf32>
    %18 = tpu.matmul %12, %17, %cst {dimension_numbers = #tpu.dot_dimension_numbers<[1], [0], [0], [1], [0, 0, 1, 1], [], []>} : vector<512x64xf32>, vector<64x32xf32>, vector<512x32xf32> -> vector<512x32xf32>
    %c0_7 = arith.constant 0 : index
    %c0_8 = arith.constant 0 : index
    %19 = vector.load %arg3[%c0_7, %c0_8] : memref<512x128xf32, #tpu.memory_space<vmem>>, vector<512x128xf32>
    %20 = tpu.concatenate %18, %18, %18, %18 in 1 : vector<512x32xf32>, vector<512x32xf32>, vector<512x32xf32>, vector<512x32xf32> -> vector<512x128xf32>
    %21 = arith.mulf %19, %20 : vector<512x128xf32>
    %c0_9 = arith.constant 0 : index
    %c0_10 = arith.constant 0 : index
    %c0_11 = arith.constant 0 : index
    %22 = vector.load %arg6[%c0_9, %c0_10, %c0_11] : memref<1x128x32xf32, #tpu.memory_space<vmem>>, vector<1x128x32xf32>
    %23 = vector.shape_cast %22 : vector<1x128x32xf32> to vector<128x32xf32>
    %cst_12 = arith.constant dense<0.000000e+00> : vector<512x32xf32>
    %24 = tpu.matmul %21, %23, %cst_12 {dimension_numbers = #tpu.dot_dimension_numbers<[1], [0], [0], [1], [0, 0, 1, 1], [], []>} : vector<512x128xf32>, vector<128x32xf32>, vector<512x32xf32> -> vector<512x32xf32>
    %c0_13 = arith.constant 0 : index
    %c0_14 = arith.constant 0 : index
    %25 = vector.load %arg15[%c0_13, %c0_14] : memref<64x32xf32, #tpu.memory_space<vmem>>, vector<64x32xf32>
    %cst_15 = arith.constant dense<0.000000e+00> : vector<64x32xf32>
    %26 = tpu.matmul %16, %24, %cst_15 {dimension_numbers = #tpu.dot_dimension_numbers<[1], [0], [0], [1], [0, 0, 1, 1], [], []>} : vector<64x512xf32>, vector<512x32xf32>, vector<64x32xf32> -> vector<64x32xf32>
    %27 = arith.addf %25, %26 : vector<64x32xf32>
    %c0_16 = arith.constant 0 : index
    %c0_17 = arith.constant 0 : index
    %28 = vector.load %arg15[%c0_16, %c0_17] : memref<64x32xf32, #tpu.memory_space<vmem>>, vector<64x32xf32>
    tpu.vector_store %arg15[%c0_16, %c0_17], %27 {strides = array<i32>} : memref<64x32xf32, #tpu.memory_space<vmem>>, vector<64x32xf32>,
    %c1_i32 = arith.constant 1 : i32
    %29 = arith.cmpi eq, %arg1, %c1_i32 : i32
    %30 = arith.extui %29 : i1 to i32
    %c0_i32_18 = arith.constant 0 : i32
    %31 = arith.cmpi ne, %30, %c0_i32_18 : i32
    scf.if %31 {
      %c0_19 = arith.constant 0 : index
      %c0_20 = arith.constant 0 : index
      %32 = vector.load %arg15[%c0_19, %c0_20] : memref<64x32xf32, #tpu.memory_space<vmem>>, vector<64x32xf32>
      %c0_21 = arith.constant 0 : index
      %c0_22 = arith.constant 0 : index
      %33 = vector.load %arg14[%c0_21, %c0_22] : memref<64x32xf32, #tpu.memory_space<vmem>>, vector<64x32xf32>
      %c0_23 = arith.constant 0 : index
      %c0_24 = arith.constant 0 : index
      %c0_25 = arith.constant 0 : index
      %34 = vector.load %arg7[%c0_23, %c0_24, %c0_25] : memref<1x32x32xf32, #tpu.memory_space<vmem>>, vector<1x32x32xf32>
      %35 = vector.shape_cast %34 : vector<1x32x32xf32> to vector<32x32xf32>
      %cst_26 = arith.constant dense<0.000000e+00> : vector<64x32xf32>
      %36 = tpu.matmul %33, %35, %cst_26 {dimension_numbers = #tpu.dot_dimension_numbers<[1], [0], [0], [1], [0, 0, 1, 1], [], []>} : vector<64x32xf32>, vector<32x32xf32>, vector<64x32xf32> -> vector<64x32xf32>
      %37 = arith.addf %32, %36 : vector<64x32xf32>
      %c0_27 = arith.constant 0 : index
      %c0_28 = arith.constant 0 : index
      %c0_29 = arith.constant 0 : index
      %38 = vector.load %arg8[%c0_27, %c0_28, %c0_29] : memref<1x1x32xf32, #tpu.memory_space<vmem>>, vector<1x1x32xf32>
      %39 = vector.shape_cast %38 : vector<1x1x32xf32> to vector<1x32xf32>
      %40 = vector.broadcast %39 : vector<1x32xf32> to vector<64x32xf32>
      %41 = arith.addf %37, %40 : vector<64x32xf32>
      %cst_30 = arith.constant 0.000000e+00 : f32
      %42 = vector.broadcast %cst_30 : f32 to vector<64x32xf32>
      %43 = arith.maximumf %41, %42 : vector<64x32xf32>
      %c0_i32_31 = arith.constant 0 : i32
      %44 = arith.cmpi eq, %arg0, %c0_i32_31 : i32
      %45 = arith.extui %44 : i1 to i32
      %c0_i32_32 = arith.constant 0 : i32
      %46 = arith.cmpi ne, %45, %c0_i32_32 : i32
      scf.if %46 {
        %c0_35 = arith.constant 0 : index
        %c0_36 = arith.constant 0 : index
        %50 = vector.load %arg14[%c0_35, %c0_36] : memref<64x32xf32, #tpu.memory_space<vmem>>, vector<64x32xf32>
        tpu.vector_store %arg14[%c0_35, %c0_36], %43 {strides = array<i32>} : memref<64x32xf32, #tpu.memory_space<vmem>>, vector<64x32xf32>,
        %cst_37 = arith.constant 0.000000e+00 : f32
        %51 = vector.broadcast %cst_37 : f32 to vector<64x32xf32>
        %c0_38 = arith.constant 0 : index
        %c0_39 = arith.constant 0 : index
        %52 = vector.load %arg15[%c0_38, %c0_39] : memref<64x32xf32, #tpu.memory_space<vmem>>, vector<64x32xf32>
        tpu.vector_store %arg15[%c0_38, %c0_39], %51 {strides = array<i32>} : memref<64x32xf32, #tpu.memory_space<vmem>>, vector<64x32xf32>,
      } else {
      }
      %c1_i32_33 = arith.constant 1 : i32
      %47 = arith.cmpi eq, %arg0, %c1_i32_33 : i32
      %48 = arith.extui %47 : i1 to i32
      %c0_i32_34 = arith.constant 0 : i32
      %49 = arith.cmpi ne, %48, %c0_i32_34 : i32
      scf.if %49 {
        %c0_35 = arith.constant 0 : index
        %c0_36 = arith.constant 0 : index
        %50 = vector.load %arg9[%c0_35, %c0_36] : memref<32x32xf32, #tpu.memory_space<vmem>>, vector<32x32xf32>
        %cst_37 = arith.constant dense<0.000000e+00> : vector<64x32xf32>
        %51 = tpu.matmul %43, %50, %cst_37 {dimension_numbers = #tpu.dot_dimension_numbers<[1], [0], [0], [1], [0, 0, 1, 1], [], []>} : vector<64x32xf32>, vector<32x32xf32>, vector<64x32xf32> -> vector<64x32xf32>
        %c0_38 = arith.constant 0 : index
        %c0_39 = arith.constant 0 : index
        %52 = vector.load %arg10[%c0_38, %c0_39] : memref<1x32xf32, #tpu.memory_space<vmem>>, vector<1x32xf32>
        %53 = vector.broadcast %52 : vector<1x32xf32> to vector<64x32xf32>
        %54 = arith.addf %51, %53 : vector<64x32xf32>
        %cst_40 = arith.constant 0.000000e+00 : f32
        %55 = vector.broadcast %cst_40 : f32 to vector<64x32xf32>
        %56 = arith.maximumf %54, %55 : vector<64x32xf32>
        %c0_41 = arith.constant 0 : index
        %c0_42 = arith.constant 0 : index
        %57 = vector.load %arg11[%c0_41, %c0_42] : memref<32x128xf32, #tpu.memory_space<vmem>>, vector<32x128xf32>
        %cst_43 = arith.constant dense<0.000000e+00> : vector<64x128xf32>
        %58 = tpu.matmul %56, %57, %cst_43 {dimension_numbers = #tpu.dot_dimension_numbers<[1], [0], [0], [1], [0, 0, 1, 1], [], []>} : vector<64x32xf32>, vector<32x128xf32>, vector<64x128xf32> -> vector<64x128xf32>
        %c0_44 = arith.constant 0 : index
        %c0_45 = arith.constant 0 : index
        %59 = vector.load %arg12[%c0_44, %c0_45] : memref<1x128xf32, #tpu.memory_space<vmem>>, vector<1x128xf32>
        %60 = vector.broadcast %59 : vector<1x128xf32> to vector<64x128xf32>
        %61 = arith.addf %58, %60 : vector<64x128xf32>
        %c0_46 = arith.constant 0 : index
        %c0_47 = arith.constant 0 : index
        %62 = vector.load %arg13[%c0_46, %c0_47] : memref<64x128xf32, #tpu.memory_space<vmem>>, vector<64x128xf32>
        tpu.vector_store %arg13[%c0_46, %c0_47], %61 {strides = array<i32>} : memref<64x128xf32, #tpu.memory_space<vmem>>, vector<64x128xf32>,
      } else {
      }
    } else {
    }
    return
  }
  func.func @transform_0(%arg0: i32, %arg1: i32) -> (i32, i32) {
    %c0_i32 = arith.constant 0 : i32
    %c0_i32_0 = arith.constant 0 : i32
    %c0_i32_1 = arith.constant 0 : i32
    return %c0_i32, %c0_i32_0 : i32, i32
  }
  func.func @transform_1(%arg0: i32, %arg1: i32) -> (i32, i32) {
    %c0_i32 = arith.constant 0 : i32
    %c0_i32_0 = arith.constant 0 : i32
    return %arg1, %c0_i32 : i32, i32
  }
  func.func @transform_2(%arg0: i32, %arg1: i32) -> (i32, i32) {
    %c0_i32 = arith.constant 0 : i32
    %c0_i32_0 = arith.constant 0 : i32
    return %arg1, %c0_i32 : i32, i32
  }
  func.func @transform_3(%arg0: i32, %arg1: i32) -> (i32, i32) {
    %c0_i32 = arith.constant 0 : i32
    %c0_i32_0 = arith.constant 0 : i32
    return %c0_i32, %arg1 : i32, i32
  }
  func.func @transform_4(%arg0: i32, %arg1: i32) -> (i32, i32, i32) {
    %c0_i32 = arith.constant 0 : i32
    %c0_i32_0 = arith.constant 0 : i32
    %c0_i32_1 = arith.constant 0 : i32
    return %arg0, %c0_i32, %c0_i32_0 : i32, i32, i32
  }
  func.func @transform_5(%arg0: i32, %arg1: i32) -> (i32, i32, i32) {
    %c0_i32 = arith.constant 0 : i32
    %c0_i32_0 = arith.constant 0 : i32
    %c0_i32_1 = arith.constant 0 : i32
    return %arg0, %c0_i32, %c0_i32_0 : i32, i32, i32
  }
  func.func @transform_6(%arg0: i32, %arg1: i32) -> (i32, i32, i32) {
    %c0_i32 = arith.constant 0 : i32
    %c0_i32_0 = arith.constant 0 : i32
    %c0_i32_1 = arith.constant 0 : i32
    return %arg0, %c0_i32, %c0_i32_0 : i32, i32, i32
  }
  func.func @transform_7(%arg0: i32, %arg1: i32) -> (i32, i32) {
    %c0_i32 = arith.constant 0 : i32
    %c0_i32_0 = arith.constant 0 : i32
    %c0_i32_1 = arith.constant 0 : i32
    return %c0_i32, %c0_i32_0 : i32, i32
  }
  func.func @transform_8(%arg0: i32, %arg1: i32) -> (i32, i32) {
    %c0_i32 = arith.constant 0 : i32
    %c0_i32_0 = arith.constant 0 : i32
    %c0_i32_1 = arith.constant 0 : i32
    return %c0_i32, %c0_i32_0 : i32, i32
  }
  func.func @transform_9(%arg0: i32, %arg1: i32) -> (i32, i32) {
    %c0_i32 = arith.constant 0 : i32
    %c0_i32_0 = arith.constant 0 : i32
    %c0_i32_1 = arith.constant 0 : i32
    return %c0_i32, %c0_i32_0 : i32, i32
  }
  func.func @transform_10(%arg0: i32, %arg1: i32) -> (i32, i32) {
    %c0_i32 = arith.constant 0 : i32
    %c0_i32_0 = arith.constant 0 : i32
    %c0_i32_1 = arith.constant 0 : i32
    return %c0_i32, %c0_i32_0 : i32, i32
  }
  func.func @transform_11(%arg0: i32, %arg1: i32) -> (i32, i32) {
    %c0_i32 = arith.constant 0 : i32
    %c0_i32_0 = arith.constant 0 : i32
    %c0_i32_1 = arith.constant 0 : i32
    return %c0_i32, %c0_i32_0 : i32, i32
  }
}

</mosaic_0001>

<bundles_post_ra>
// kernel: net_mp_forward.1
= control target key start
LH: loop header
LB: loop body
LE: loop exit
PB: predicated region body
PF: predicated region fallthrough
CT: control target
= control target key end

     0   :  { %s5016_s17 = smov 0   ;;  %s5018_s18 = smov 0   ;;  %s6608_s0 = inlined_call_operand.vmem [shape: f32[64,32], index: 0, kind: input, shape index: {}]   ;;  %s6609_s1 = inlined_call_operand.vmem [shape: f32[1024,128], index: 1, kind: input, shape index: {}]   ;;  %s6610_s2 = inlined_call_operand.vmem [shape: s32[1024,1], index: 2, kind: input, shape index: {}]   ;;  %s6611_s3 = inlined_call_operand.vmem [shape: s32[1,1024], index: 3, kind: input, shape index: {}]   ;;  %s6612_s4 = inlined_call_operand.vmem [shape: f32[2,128,32], index: 4, kind: input, shape index: {}]   ;;  %s6613_s5 = inlined_call_operand.vmem [shape: f32[2,32,32], index: 5, kind: input, shape index: {}]   ;;  %s6614_s6 = inlined_call_operand.vmem [shape: f32[2,1,32], index: 6, kind: input, shape index: {}]   ;;  %s6615_s7 = inlined_call_operand.vmem [shape: f32[32,32], index: 7, kind: input, shape index: {}]   ;;  %s6616_s8 = inlined_call_operand.vmem [shape: f32[1,32], index: 8, kind: input, shape index: {}]   ;;  %s6617_s9 = inlined_call_operand.vmem [shape: f32[32,128], index: 9, kind: input, shape index: {}]   ;;  %s6618_s10 = inlined_call_operand.vmem [shape: f32[1,128], index: 10, kind: input, shape index: {}]   ;;  %s6619_s11 = inlined_call_operand.vmem [shape: f32[64,128], index: 11, kind: output, shape index: {}]  }
   0x1   :  { %6636 = sst [smem:[#allocation21_spill]] %s6609_s1  ;;  %s5020_s19 = smov 0  }
   0x2   :  { %6637 = sst [smem:[#allocation22_spill]] %s6610_s2  ;;  %s5022_s20 = smov 0  }
   0x3   :  { %s5024_s21 = smov 0  }
   0x4 LB: > { %6638 = sst [smem:[#allocation4_spill]] %s4938_s19  ;;  %s30_s22 = sadd.s32 1, %s4938_s19  ;;  %s4946_s21 = sphi %s5024_s21, %s21_s21   ;;  %s4942_s20 = sphi %s5022_s20, %s6675_s20   ;;  %s4938_s19 = sphi %s5020_s19, %s6674_s19   ;;  %s4934_s18 = sphi %s5018_s18, %s6673_s18   ;;  %s4930_s17 = sphi %s5016_s17, %s6672_s17  }
   0x5   : > { %6639 = sst [smem:[#allocation5_spill]] %s4942_s20  ;;  %s33_s23 = sadd.s32 1, %s4942_s20 }
   0x6   : > { %6640 = sst [smem:[#allocation6_spill]] %s4946_s21  ;;  %p31_p0 = scmp.ge.s32.totalorder %s30_s22, 2 }
   0x7   : > { %p3866_p1 = scmp.ge.s32.totalorder %s4946_s21, 1  ;;  %p394_p2 = scmp.lt.s32.totalorder %s4946_s21, 5 }
   0x8   : > { %s6677_s22 = smov (%p31_p0, %s30_s22), 0  ;;  %s6679_s23 = smov (!%p31_p0, %s33_s23), %s4942_s20 }
   0x9   : > { %6641 = sst [smem:[#allocation7_spill]] %s6677_s22  ;;  %p395_p3 = pnand %p3866_p1, %p394_p2 }
   0xa   : > { %p35_p4 = scmp.ge.s32.totalorder %s6679_s23, 2 }
   0xb   : > { %398 = sbr.rel (%p395_p3) target bundleno = 2013 (0x7dd), region = 64 }
   0xc   : > { %s6681_s23 = smov (%p35_p4, %s6679_s23), 0 }
   0xd   : > { %6642 = sst [smem:[#allocation8_spill]] %s6681_s23 }
  0x12   : > { %s3867_s24 = sshll.u32 %s4930_s17, 6  ;;  %s3871_s25 = sshll.u32 %s4930_s17, 2 }
  0x13   : > { %p452_p5 = scmp.lt.s32.totalorder %s3867_s24, 127  ;;  %p464_p6 = scmp.lt.s32.totalorder %s3871_s25, 7 }
  0x14   : > { %p468_p7 = scmp.lt.s32.totalorder %s4934_s18, 1  ;;  %p481_p8 = scmp.eq.s32.totalorder %s4934_s18, 0 }
  0x15   : > { %s6683_s24 = smov (!%p452_p5, %s3867_s24), 127  ;;  %s6685_s25 = smov (!%p464_p6, %s3871_s25), 7 }
  0x16   : > { %s3868_s26 = sshll.u32 %s6683_s24, 3  ;;  %p482_p9 = scmp.eq.s32.totalorder %s4930_s17, 0 }
  0x17   : > { %s6643_s1 = sld [smem:[#allocation21_spill]]  ;;  %s6644_s2 = sld [smem:[#allocation22_spill]] }
  0x18   : > { %p483_p10 = pnand %p482_p9, %p481_p8 }
  0x19   : > { %s5072_s23 = scalar_select %p468_p7, %s4934_s18, 1 }
  0x1a   : > { %486 = sbr.rel (%p483_p10) target bundleno = 35 (0x23), region = 68  ;;  %v487_v0 = vld [vmem:[%s6608_s0] sm:$0xff] (!%p483_p10)  ;;  %vm495_vm0 = vcmask (!%p483_p10), 261120   ;;  %v488_v1 = vld [vmem:[%s6608_s0 + $0x8] sm:$0xff] (!%p483_p10)  ;;  %v489_v2 = vld [vmem:[%s6608_s0 + $0x10] sm:$0xff] (!%p483_p10)  ;;  %v4948_v6 = vmov (!%p483_p10), 0.0  }
  0x1b   : > { %s4100_s24 = sshll.u32 %s5072_s23, 7  ;;  %s4101_s22 = sshll.u32 %s5072_s23, 5  ;;  %496 = vst.msk [vmem:[#allocation2] sm:$0xff] (!%p483_p10), %vm495_vm0, %v487_v0  ;;  %497 = vst.msk [vmem:[#allocation2 + $0x8] sm:$0xff] (!%p483_p10), %vm495_vm0, %v488_v1  ;;  %v490_v3 = vld [vmem:[%s6608_s0 + $0x18] sm:$0xff] (!%p483_p10)  ;;  %v491_v4 = vld [vmem:[%s6608_s0 + $0x20] sm:$0xff] (!%p483_p10) }
  0x1c   : > { %s5084_s12 = scalar_lea.vmem %s6613_s5, %s4101_s22  ;;  %s480_s16 = scalar_lea.vmem %s6614_s6, %s5072_s23  ;;  %498 = vst.msk [vmem:[#allocation2 + $0x10] sm:$0xff] (!%p483_p10), %vm495_vm0, %v489_v2  ;;  %v492_v5 = vld [vmem:[%s6608_s0 + $0x28] sm:$0xff] (!%p483_p10)  ;;  %504 = vst.msk [vmem:[#allocation3] sm:$0xff] (!%p483_p10), %vm495_vm0, %v4948_v6  ;;  %v493_v7 = vld [vmem:[%s6608_s0 + $0x30] sm:$0xff] (!%p483_p10) }
  0x1d   : > { %s5060_s29 = scalar_lea.vmem %s6643_s1, %s3868_s26  ;;  %s5065_s13 = scalar_lea.vmem %s6644_s2, %s3868_s26  ;;  %505 = vst.msk [vmem:[#allocation3 + $0x8] sm:$0xff] (!%p483_p10), %vm495_vm0, %v4948_v6  ;;  %506 = vst.msk [vmem:[#allocation3 + $0x10] sm:$0xff] (!%p483_p10), %vm495_vm0, %v4948_v6  ;;  %v494_v8 = vld [vmem:[%s6608_s0 + $0x38] sm:$0xff] (!%p483_p10) }
  0x1e   : > { %s5079_s1 = scalar_lea.vmem %s6612_s4, %s4100_s24  ;;  %507 = vst.msk [vmem:[#allocation3 + $0x18] sm:$0xff] (!%p483_p10), %vm495_vm0, %v4948_v6  ;;  %508 = vst.msk [vmem:[#allocation3 + $0x20] sm:$0xff] (!%p483_p10), %vm495_vm0, %v4948_v6 }
  0x1f   : > { %509 = vst.msk [vmem:[#allocation3 + $0x28] sm:$0xff] (!%p483_p10), %vm495_vm0, %v4948_v6  ;;  %510 = vst.msk [vmem:[#allocation3 + $0x30] sm:$0xff] (!%p483_p10), %vm495_vm0, %v4948_v6 }
  0x20   : > { %511 = vst.msk [vmem:[#allocation3 + $0x38] sm:$0xff] (!%p483_p10), %vm495_vm0, %v4948_v6  ;;  %499 = vst.msk [vmem:[#allocation2 + $0x18] sm:$0xff] (!%p483_p10), %vm495_vm0, %v490_v3 }
  0x21   : > { %500 = vst.msk [vmem:[#allocation2 + $0x20] sm:$0xff] %vm495_vm0, %v491_v4  ;;  %501 = vst.msk [vmem:[#allocation2 + $0x28] sm:$0xff] %vm495_vm0, %v492_v5 }
  0x22   : > { %502 = vst.msk [vmem:[#allocation2 + $0x30] sm:$0xff] %vm495_vm0, %v493_v7  ;;  %503 = vst.msk [vmem:[#allocation2 + $0x38] sm:$0xff] %vm495_vm0, %v494_v8 }
  0x23 PF: > { %v514_v9 = vld [vmem:[%s5065_s13 + $0x10] sm:$0xff]  ;;  %v512_v10 = vld [vmem:[%s5065_s13] sm:$0xff]  ;;  %v4949_v11 = vmov 0   ;;  %v515_v12 = vld [vmem:[%s5065_s13 + $0x18] sm:$0xff]  ;;  %vm1092_vm1 = vcmask 523264   ;;  %s4952_s24 = smov 64  }
  0x24   : > { %4907 = vset.pattern.permute.xlu1 %v4949_v11  ;;  %4906 = vset.pattern.permute.xlu0 %v4949_v11  ;;  %v513_v13 = vld [vmem:[%s5065_s13 + $0x8] sm:$0xff]  ;;  %v516_v15 = vld [vmem:[%s5065_s13 + $0x20] sm:$0xff]  ;;  %v519_v16 = vld [vmem:[%s5065_s13 + $0x38] sm:$0xff]  ;;  %p4068_p11 = scmp.ne.s32.totalorder %s4930_s17, 1 }
  0x25   : > { %595 = vperm.xlu1 %4907, %v514_v9   ;;  %589 = vperm.xlu0 %4906, %v512_v10   ;;  %v517_v14 = vld [vmem:[%s5065_s13 + $0x28] sm:$0xff]  ;;  %v518_v17 = vld [vmem:[%s5065_s13 + $0x30] sm:$0xff]  ;;  %v520_v19 = vld [vmem:[%s5065_s13 + $0x40] sm:$0xff]  ;;  %p4078_p12 = scmp.ne.s32.totalorder (!%p4068_p11), %s4934_s18, 0 }
  0x26   : > { %v521_v18 = vld [vmem:[%s5065_s13 + $0x48] sm:$0xff]  ;;  %v523_v20 = vld [vmem:[%s5065_s13 + $0x58] sm:$0xff]  ;;  %v522_v21 = vld [vmem:[%s5065_s13 + $0x50] sm:$0xff] }
  0x27   : > { %v1084_v22 = vld [vmem:[#allocation2] sm:$0xff]  ;;  %v1085_v23 = vld [vmem:[#allocation2 + $0x8] sm:$0xff]  ;;  %v1086_v25 = vld [vmem:[#allocation2 + $0x10] sm:$0xff] }
  0x28   : > { %v4702_v24 = vpack.c.bf16 %v1085_v23, %v1084_v22  ;;  %v525_v29 = vld [vmem:[%s5065_s13 + $0x68] sm:$0xff]  ;;  %v524_v30 = vld [vmem:[%s5065_s13 + $0x60] sm:$0xff]  ;;  %v527_v35 = vld [vmem:[%s5065_s13 + $0x78] sm:$0xff] }
  0x29   : > { %598 = vperm.xlu1 %4907, %v515_v12   ;;  %592 = vperm.xlu0 %4906, %v513_v13   ;;  %v1087_v26 = vld [vmem:[#allocation2 + $0x18] sm:$0xff]  ;;  %v1089_v31 = vld [vmem:[#allocation2 + $0x28] sm:$0xff]  ;;  %v1090_v33 = vld [vmem:[#allocation2 + $0x30] sm:$0xff] }
  0x2a   : > { %v4706_v27 = vpack.c.bf16 %v1087_v26, %v1086_v25  ;;  %v1088_v28 = vld [vmem:[#allocation2 + $0x20] sm:$0xff]  ;;  %4703 = vmatprep.subr.bf16.mxu0 %v4702_v24  ;;  %v1091_v34 = vld [vmem:[#allocation2 + $0x38] sm:$0xff]  ;;  %v526_v36 = vld [vmem:[%s5065_s13 + $0x70] sm:$0xff]  ;;  %v4950_v26 = vmov 0.0  }
  0x2b   : > { %4705 = vmatpush3.bf16.msra.mxu0 %v4702_v24  ;;  %v4710_v32 = vpack.c.bf16 %v1089_v31, %v1088_v28  ;;  %v4714_v37 = vpack.c.bf16 %v1091_v34, %v1090_v33  ;;  %v529_v38 = vld [vmem:[%s5065_s13 + $0x88] sm:$0xff]  ;;  %v528_v39 = vld [vmem:[%s5065_s13 + $0x80] sm:$0xff]  ;;  %v531_v40 = vld [vmem:[%s5065_s13 + $0x98] sm:$0xff] }
  0x2c   : > { %4707 = vmatprep.subr.bf16.mxu0 %v4706_v27  ;;  %v530_v41 = vld [vmem:[%s5065_s13 + $0x90] sm:$0xff]  ;;  %v533_v42 = vld [vmem:[%s5065_s13 + $0xa8] sm:$0xff]  ;;  %v532_v43 = vld [vmem:[%s5065_s13 + $0xa0] sm:$0xff] }
  0x2d   : > { %604 = vperm.xlu1 %4907, %v517_v14   ;;  %601 = vperm.xlu0 %4906, %v516_v15   ;;  %v535_v44 = vld [vmem:[%s5065_s13 + $0xb8] sm:$0xff]  ;;  %v534_v45 = vld [vmem:[%s5065_s13 + $0xb0] sm:$0xff]  ;;  %v537_v46 = vld [vmem:[%s5065_s13 + $0xc8] sm:$0xff] }
  0x2e   : > { %v536_v47 = vld [vmem:[%s5065_s13 + $0xc0] sm:$0xff]  ;;  %v539_v48 = vld [vmem:[%s5065_s13 + $0xd8] sm:$0xff]  ;;  %v538_v49 = vld [vmem:[%s5065_s13 + $0xd0] sm:$0xff] }
  0x2f   : > { %4709 = vmatpush3.bf16.msra.mxu0 %v4706_v27  ;;  %v541_v50 = vld [vmem:[%s5065_s13 + $0xe8] sm:$0xff]  ;;  %v540_v51 = vld [vmem:[%s5065_s13 + $0xe0] sm:$0xff]  ;;  %v543_v52 = vld [vmem:[%s5065_s13 + $0xf8] sm:$0xff] }
  0x30   : > { %4711 = vmatprep.subr.bf16.mxu0 %v4710_v32  ;;  %v542_v53 = vld [vmem:[%s5065_s13 + $0xf0] sm:$0xff]  ;;  %v545_v54 = vld [vmem:[%s5065_s13 + $0x108] sm:$0xff]  ;;  %v544_v55 = vld [vmem:[%s5065_s13 + $0x100] sm:$0xff] }
  0x31   : > { %610 = vperm.xlu1 %4907, %v519_v16   ;;  %607 = vperm.xlu0 %4906, %v518_v17   ;;  %v547_v56 = vld [vmem:[%s5065_s13 + $0x118] sm:$0xff]  ;;  %v546_v57 = vld [vmem:[%s5065_s13 + $0x110] sm:$0xff]  ;;  %v549_v58 = vld [vmem:[%s5065_s13 + $0x128] sm:$0xff] }
  0x32   : > { %v548_v59 = vld [vmem:[%s5065_s13 + $0x120] sm:$0xff]  ;;  %v551_v60 = vld [vmem:[%s5065_s13 + $0x138] sm:$0xff]  ;;  %v550_v61 = vld [vmem:[%s5065_s13 + $0x130] sm:$0xff] }
  0x33   : > { %4713 = vmatpush3.bf16.msra.mxu0 %v4710_v32  ;;  %v553_v62 = vld [vmem:[%s5065_s13 + $0x148] sm:$0xff]  ;;  %v552_v63 = vld [vmem:[%s5065_s13 + $0x140] sm:$0xff]  ;;  %v555_v0 = vld [vmem:[%s5065_s13 + $0x158] sm:$0xff] }
  0x34   : > { %4715 = vmatprep.subr.bf16.mxu0 %v4714_v37  ;;  %v554_v1 = vld [vmem:[%s5065_s13 + $0x150] sm:$0xff]  ;;  %v557_v2 = vld [vmem:[%s5065_s13 + $0x168] sm:$0xff]  ;;  %v556_v3 = vld [vmem:[%s5065_s13 + $0x160] sm:$0xff] }
  0x35   : > { %616 = vperm.xlu1 %4907, %v521_v18   ;;  %613 = vperm.xlu0 %4906, %v520_v19   ;;  %v559_v4 = vld [vmem:[%s5065_s13 + $0x178] sm:$0xff]  ;;  %v558_v5 = vld [vmem:[%s5065_s13 + $0x170] sm:$0xff]  ;;  %v561_v6 = vld [vmem:[%s5065_s13 + $0x188] sm:$0xff] }
  0x36   : > { %v560_v7 = vld [vmem:[%s5065_s13 + $0x180] sm:$0xff]  ;;  %v563_v8 = vld [vmem:[%s5065_s13 + $0x198] sm:$0xff]  ;;  %v562_v9 = vld [vmem:[%s5065_s13 + $0x190] sm:$0xff] }
  0x37   : > { %4717 = vmatpush3.bf16.msra.mxu0 %v4714_v37  ;;  %v565_v10 = vld [vmem:[%s5065_s13 + $0x1a8] sm:$0xff]  ;;  %v564_v11 = vld [vmem:[%s5065_s13 + $0x1a0] sm:$0xff]  ;;  %v567_v12 = vld [vmem:[%s5065_s13 + $0x1b8] sm:$0xff] }
  0x38   : > { %v566_v13 = vld [vmem:[%s5065_s13 + $0x1b0] sm:$0xff]  ;;  %v569_v14 = vld [vmem:[%s5065_s13 + $0x1c8] sm:$0xff]  ;;  %v568_v15 = vld [vmem:[%s5065_s13 + $0x1c0] sm:$0xff] }
  0x39   : > { %622 = vperm.xlu1 %4907, %v523_v20   ;;  %619 = vperm.xlu0 %4906, %v522_v21   ;;  %v571_v16 = vld [vmem:[%s5065_s13 + $0x1d8] sm:$0xff]  ;;  %v570_v17 = vld [vmem:[%s5065_s13 + $0x1d0] sm:$0xff]  ;;  %v573_v18 = vld [vmem:[%s5065_s13 + $0x1e8] sm:$0xff]  ;;  %v6623_v20 = vlaneseq }
  0x3a   : > { %v572_v19 = vld [vmem:[%s5065_s13 + $0x1e0] sm:$0xff]  ;;  %v575_v21 = vld [vmem:[%s5065_s13 + $0x1f8] sm:$0xff]  ;;  %v574_v22 = vld [vmem:[%s5065_s13 + $0x1f0] sm:$0xff]  ;;  %s4951_s13 = smov 32  }
  0x3b   : > { %v5195_v23 = vand.u32 127, %v6623_v20 }
  0x3d   : > { %628 = vperm.xlu1 %4907, %v525_v29   ;;  %625 = vperm.xlu0 %4906, %v524_v30  }
  0x41   : > { %634 = vperm.xlu1 %4907, %v527_v35   ;;  %631 = vperm.xlu0 %4906, %v526_v36  }
  0x45   : > { %640 = vperm.xlu1 %4907, %v529_v38   ;;  %637 = vperm.xlu0 %4906, %v528_v39  }
  0x49   : > { %646 = vperm.xlu1 %4907, %v531_v40   ;;  %643 = vperm.xlu0 %4906, %v530_v41  }
  0x4d   : > { %652 = vperm.xlu1 %4907, %v533_v42   ;;  %649 = vperm.xlu0 %4906, %v532_v43  }
  0x51   : > { %658 = vperm.xlu1 %4907, %v535_v44   ;;  %655 = vperm.xlu0 %4906, %v534_v45  }
  0x55   : > { %664 = vperm.xlu1 %4907, %v537_v46   ;;  %661 = vperm.xlu0 %4906, %v536_v47  }
  0x59   : > { %670 = vperm.xlu1 %4907, %v539_v48   ;;  %667 = vperm.xlu0 %4906, %v538_v49  }
  0x5d   : > { %676 = vperm.xlu1 %4907, %v541_v50   ;;  %673 = vperm.xlu0 %4906, %v540_v51  }
  0x61   : > { %682 = vperm.xlu1 %4907, %v543_v52   ;;  %679 = vperm.xlu0 %4906, %v542_v53  }
  0x65   : > { %688 = vperm.xlu1 %4907, %v545_v54   ;;  %685 = vperm.xlu0 %4906, %v544_v55  }
  0x69   : > { %694 = vperm.xlu1 %4907, %v547_v56   ;;  %691 = vperm.xlu0 %4906, %v546_v57  }
  0x6d   : > { %700 = vperm.xlu1 %4907, %v549_v58   ;;  %697 = vperm.xlu0 %4906, %v548_v59  }
  0x71   : > { %706 = vperm.xlu1 %4907, %v551_v60   ;;  %703 = vperm.xlu0 %4906, %v550_v61  }
  0x75   : > { %712 = vperm.xlu1 %4907, %v553_v62   ;;  %709 = vperm.xlu0 %4906, %v552_v63  }
  0x79   : > { %718 = vperm.xlu1 %4907, %v555_v0   ;;  %715 = vperm.xlu0 %4906, %v554_v1  }
  0x7d   : > { %724 = vperm.xlu1 %4907, %v557_v2   ;;  %721 = vperm.xlu0 %4906, %v556_v3  }
  0x81   : > { %730 = vperm.xlu1 %4907, %v559_v4   ;;  %727 = vperm.xlu0 %4906, %v558_v5  }
  0x85   : > { %736 = vperm.xlu1 %4907, %v561_v6   ;;  %733 = vperm.xlu0 %4906, %v560_v7  }
  0x89   : > { %742 = vperm.xlu1 %4907, %v563_v8   ;;  %739 = vperm.xlu0 %4906, %v562_v9  }
  0x8d   : > { %748 = vperm.xlu1 %4907, %v565_v10   ;;  %745 = vperm.xlu0 %4906, %v564_v11  }
  0x91   : > { %754 = vperm.xlu1 %4907, %v567_v12   ;;  %751 = vperm.xlu0 %4906, %v566_v13  }
  0x95   : > { %760 = vperm.xlu1 %4907, %v569_v14   ;;  %757 = vperm.xlu0 %4906, %v568_v15  }
  0x99   : > { %766 = vperm.xlu1 %4907, %v571_v16   ;;  %763 = vperm.xlu0 %4906, %v570_v17  }
  0x9d   : > { %772 = vperm.xlu1 %4907, %v573_v18   ;;  %769 = vperm.xlu0 %4906, %v572_v19  }
  0xa1   : > { %778 = vperm.xlu1 %4907, %v575_v21   ;;  %775 = vperm.xlu0 %4906, %v574_v22  }
  0xa4   : > { %v596_v24 = vpop.permute.xlu1 %595  ;;  %v590_v25 = vpop.permute.xlu0 %589 }
  0xa5   : > { %vm780_vm2 = vcmp.eq.s32.totalorder %v590_v25, %v5195_v23  ;;  %vm782_vm3 = vcmp.eq.s32.totalorder %v596_v24, %v5195_v23 }
  0xa6   : > { %v3876_v27 = vsel %vm780_vm2, 1.0, %v4950_v26  ;;  %v3878_v30 = vsel %vm782_vm3, 1.0, %v4950_v26 }
  0xa7   : > { %4418 = vmatprep.mubr.msk.f32.mxu0 %vm1092_vm1, %v3876_v27 }
  0xa8   : > { %v599_v28 = vpop.permute.xlu1 %598  ;;  %v593_v29 = vpop.permute.xlu0 %592 }
  0xa9   : > { %vm783_vm4 = vcmp.eq.s32.totalorder %v599_v28, %v5195_v23  ;;  %vm781_vm5 = vcmp.eq.s32.totalorder %v593_v29, %v5195_v23 }
  0xaa   : > { %v3877_v31 = vsel %vm781_vm5, 1.0, %v4950_v26  ;;  %v3879_v32 = vsel %vm783_vm4, 1.0, %v4950_v26 }
  0xab   : > { %4419 = vmatmul.mubr.msk.f32.vlgmr.msra.gmra.mrb[0].mxu0 %vm1092_vm1, %v3877_v31 }
  0xac   : > { %v605_v33 = vpop.permute.xlu1 %604  ;;  %v602_v34 = vpop.permute.xlu0 %601  ;;  %4421 = vmatprep.mubr.msk.f32.mxu0 %vm1092_vm1, %v3878_v30 }
  0xad   : > { %vm785_vm6 = vcmp.eq.s32.totalorder %v605_v33, %v5195_v23  ;;  %vm784_vm7 = vcmp.eq.s32.totalorder %v602_v34, %v5195_v23 }
  0xae   : > { %v3880_v35 = vsel %vm784_vm7, 1.0, %v4950_v26  ;;  %v3881_v36 = vsel %vm785_vm6, 1.0, %v4950_v26 }
  0xaf   : > { %4422 = vmatmul.mubr.msk.f32.gmra.mrb[2].mxu0 %vm1092_vm1, %v3879_v32 }
  0xb0   : > { %v611_v37 = vpop.permute.xlu1 %610  ;;  %4424 = vmatprep.mubr.msk.f32.mxu0 %vm1092_vm1, %v3880_v35  ;;  %v608_v38 = vpop.permute.xlu0 %607 }
  0xb1   : > { %vm786_vm8 = vcmp.eq.s32.totalorder %v608_v38, %v5195_v23  ;;  %vm787_vm9 = vcmp.eq.s32.totalorder %v611_v37, %v5195_v23 }
  0xb2   : > { %v3882_v39 = vsel %vm786_vm8, 1.0, %v4950_v26  ;;  %v3883_v42 = vsel %vm787_vm9, 1.0, %v4950_v26 }
  0xb3   : > { %4425 = vmatmul.mubr.msk.f32.gmra.mrb[4].mxu0 %vm1092_vm1, %v3881_v36 }
  0xb4   : > { %v617_v40 = vpop.permute.xlu1 %616  ;;  %4427 = vmatprep.mubr.msk.f32.mxu0 %vm1092_vm1, %v3882_v39  ;;  %v614_v41 = vpop.permute.xlu0 %613 }
  0xb5   : > { %vm788_vm10 = vcmp.eq.s32.totalorder %v614_v41, %v5195_v23  ;;  %vm789_vm11 = vcmp.eq.s32.totalorder %v617_v40, %v5195_v23 }
  0xb6   : > { %v3884_v43 = vsel %vm788_vm10, 1.0, %v4950_v26  ;;  %v3885_v46 = vsel %vm789_vm11, 1.0, %v4950_v26 }
  0xb7   : > { %4428 = vmatmul.mubr.msk.f32.gmra.mrb[6].mxu0 %vm1092_vm1, %v3883_v42 }
  0xb8   : > { %v623_v44 = vpop.permute.xlu1 %622  ;;  %4430 = vmatprep.mubr.msk.f32.mxu0 %vm1092_vm1, %v3884_v43  ;;  %v620_v45 = vpop.permute.xlu0 %619 }
  0xb9   : > { %vm790_vm12 = vcmp.eq.s32.totalorder %v620_v45, %v5195_v23  ;;  %vm791_vm13 = vcmp.eq.s32.totalorder %v623_v44, %v5195_v23 }
  0xba   : > { %v3886_v47 = vsel %vm790_vm12, 1.0, %v4950_v26  ;;  %v3887_v50 = vsel %vm791_vm13, 1.0, %v4950_v26 }
  0xbb   : > { %4431 = vmatmul.mubr.msk.f32.gmra.mrb[8].mxu0 %vm1092_vm1, %v3885_v46 }
  0xbc   : > { %v629_v48 = vpop.permute.xlu1 %628  ;;  %4433 = vmatprep.mubr.msk.f32.mxu0 %vm1092_vm1, %v3886_v47  ;;  %v626_v49 = vpop.permute.xlu0 %625 }
  0xbd   : > { %vm792_vm14 = vcmp.eq.s32.totalorder %v626_v49, %v5195_v23  ;;  %vm793_vm15 = vcmp.eq.s32.totalorder %v629_v48, %v5195_v23 }
  0xbe   : > { %v3888_v51 = vsel %vm792_vm14, 1.0, %v4950_v26  ;;  %v3889_v54 = vsel %vm793_vm15, 1.0, %v4950_v26 }
  0xbf   : > { %4434 = vmatmul.mubr.msk.f32.gmra.mrb[10].mxu0 %vm1092_vm1, %v3887_v50 }
  0xc0   : > { %v635_v52 = vpop.permute.xlu1 %634  ;;  %4436 = vmatprep.mubr.msk.f32.mxu0 %vm1092_vm1, %v3888_v51  ;;  %v632_v53 = vpop.permute.xlu0 %631 }
  0xc1   : > { %vm794_vm0 = vcmp.eq.s32.totalorder %v632_v53, %v5195_v23  ;;  %vm795_vm2 = vcmp.eq.s32.totalorder %v635_v52, %v5195_v23 }
  0xc2   : > { %v3890_v55 = vsel %vm794_vm0, 1.0, %v4950_v26  ;;  %v3891_v58 = vsel %vm795_vm2, 1.0, %v4950_v26 }
  0xc3   : > { %4437 = vmatmul.mubr.msk.f32.gmra.mrb[12].mxu0 %vm1092_vm1, %v3889_v54 }
  0xc4   : > { %v641_v56 = vpop.permute.xlu1 %640  ;;  %4439 = vmatprep.mubr.msk.f32.mxu0 %vm1092_vm1, %v3890_v55  ;;  %v638_v57 = vpop.permute.xlu0 %637 }
  0xc5   : > { %vm796_vm3 = vcmp.eq.s32.totalorder %v638_v57, %v5195_v23  ;;  %vm797_vm4 = vcmp.eq.s32.totalorder %v641_v56, %v5195_v23 }
  0xc6   : > { %v3892_v59 = vsel %vm796_vm3, 1.0, %v4950_v26  ;;  %v3893_v62 = vsel %vm797_vm4, 1.0, %v4950_v26 }
  0xc7   : > { %4440 = vmatmul.mubr.msk.f32.gmra.mrb[14].mxu0 %vm1092_vm1, %v3891_v58 }
  0xc8   : > { %v647_v60 = vpop.permute.xlu1 %646  ;;  %4442 = vmatprep.mubr.msk.f32.mxu0 %vm1092_vm1, %v3892_v59  ;;  %v644_v61 = vpop.permute.xlu0 %643 }
  0xc9   : > { %vm798_vm5 = vcmp.eq.s32.totalorder %v644_v61, %v5195_v23  ;;  %vm799_vm6 = vcmp.eq.s32.totalorder %v647_v60, %v5195_v23 }
  0xca   : > { %v3894_v63 = vsel %vm798_vm5, 1.0, %v4950_v26  ;;  %v3895_v2 = vsel %vm799_vm6, 1.0, %v4950_v26 }
  0xcb   : > { %4443 = vmatmul.mubr.msk.f32.gmra.mrb[16].mxu0 %vm1092_vm1, %v3893_v62 }
  0xcc   : > { %v653_v0 = vpop.permute.xlu1 %652  ;;  %4445 = vmatprep.mubr.msk.f32.mxu0 %vm1092_vm1, %v3894_v63  ;;  %v650_v1 = vpop.permute.xlu0 %649 }
  0xcd   : > { %vm800_vm7 = vcmp.eq.s32.totalorder %v650_v1, %v5195_v23  ;;  %vm801_vm8 = vcmp.eq.s32.totalorder %v653_v0, %v5195_v23 }
  0xce   : > { %v3896_v3 = vsel %vm800_vm7, 1.0, %v4950_v26  ;;  %v3897_v6 = vsel %vm801_vm8, 1.0, %v4950_v26 }
  0xcf   : > { %4446 = vmatmul.mubr.msk.f32.gmra.mrb[18].mxu0 %vm1092_vm1, %v3895_v2 }
  0xd0   : > { %v659_v4 = vpop.permute.xlu1 %658  ;;  %4448 = vmatprep.mubr.msk.f32.mxu0 %vm1092_vm1, %v3896_v3  ;;  %v656_v5 = vpop.permute.xlu0 %655 }
  0xd1   : > { %vm802_vm9 = vcmp.eq.s32.totalorder %v656_v5, %v5195_v23  ;;  %vm803_vm10 = vcmp.eq.s32.totalorder %v659_v4, %v5195_v23 }
  0xd2   : > { %v3898_v7 = vsel %vm802_vm9, 1.0, %v4950_v26  ;;  %v3899_v10 = vsel %vm803_vm10, 1.0, %v4950_v26 }
  0xd3   : > { %4449 = vmatmul.mubr.msk.f32.gmra.mrb[20].mxu0 %vm1092_vm1, %v3897_v6 }
  0xd4   : > { %v665_v8 = vpop.permute.xlu1 %664  ;;  %4451 = vmatprep.mubr.msk.f32.mxu0 %vm1092_vm1, %v3898_v7  ;;  %v662_v9 = vpop.permute.xlu0 %661 }
  0xd5   : > { %vm804_vm11 = vcmp.eq.s32.totalorder %v662_v9, %v5195_v23  ;;  %vm805_vm12 = vcmp.eq.s32.totalorder %v665_v8, %v5195_v23 }
  0xd6   : > { %v3900_v11 = vsel %vm804_vm11, 1.0, %v4950_v26  ;;  %v3901_v14 = vsel %vm805_vm12, 1.0, %v4950_v26 }
  0xd7   : > { %4452 = vmatmul.mubr.msk.f32.gmra.mrb[22].mxu0 %vm1092_vm1, %v3899_v10 }
  0xd8   : > { %v671_v12 = vpop.permute.xlu1 %670  ;;  %4454 = vmatprep.mubr.msk.f32.mxu0 %vm1092_vm1, %v3900_v11  ;;  %v668_v13 = vpop.permute.xlu0 %667 }
  0xd9   : > { %vm806_vm13 = vcmp.eq.s32.totalorder %v668_v13, %v5195_v23  ;;  %vm807_vm14 = vcmp.eq.s32.totalorder %v671_v12, %v5195_v23 }
  0xda   : > { %v3902_v15 = vsel %vm806_vm13, 1.0, %v4950_v26  ;;  %v3903_v18 = vsel %vm807_vm14, 1.0, %v4950_v26 }
  0xdb   : > { %4455 = vmatmul.mubr.msk.f32.gmra.mrb[24].mxu0 %vm1092_vm1, %v3901_v14 }
  0xdc   : > { %v677_v16 = vpop.permute.xlu1 %676  ;;  %4457 = vmatprep.mubr.msk.f32.mxu0 %vm1092_vm1, %v3902_v15  ;;  %v674_v17 = vpop.permute.xlu0 %673 }
  0xdd   : > { %vm808_vm15 = vcmp.eq.s32.totalorder %v674_v17, %v5195_v23  ;;  %vm809_vm0 = vcmp.eq.s32.totalorder %v677_v16, %v5195_v23 }
  0xde   : > { %v3904_v19 = vsel %vm808_vm15, 1.0, %v4950_v26  ;;  %v3905_v24 = vsel %vm809_vm0, 1.0, %v4950_v26 }
  0xdf   : > { %4458 = vmatmul.mubr.msk.f32.gmra.mrb[26].mxu0 %vm1092_vm1, %v3903_v18 }
  0xe0   : > { %v683_v21 = vpop.permute.xlu1 %682  ;;  %4460 = vmatprep.mubr.msk.f32.mxu0 %vm1092_vm1, %v3904_v19  ;;  %v680_v22 = vpop.permute.xlu0 %679 }
  0xe1   : > { %vm810_vm2 = vcmp.eq.s32.totalorder %v680_v22, %v5195_v23  ;;  %vm811_vm3 = vcmp.eq.s32.totalorder %v683_v21, %v5195_v23 }
  0xe2   : > { %v3906_v25 = vsel %vm810_vm2, 1.0, %v4950_v26  ;;  %v3907_v29 = vsel %vm811_vm3, 1.0, %v4950_v26 }
  0xe3   : > { %4461 = vmatmul.mubr.msk.f32.gmra.mrb[28].mxu0 %vm1092_vm1, %v3905_v24 }
  0xe4   : > { %v689_v27 = vpop.permute.xlu1 %688  ;;  %4463 = vmatprep.mubr.msk.f32.mxu0 %vm1092_vm1, %v3906_v25  ;;  %v686_v28 = vpop.permute.xlu0 %685 }
  0xe5   : > { %vm812_vm4 = vcmp.eq.s32.totalorder %v686_v28, %v5195_v23  ;;  %vm813_vm5 = vcmp.eq.s32.totalorder %v689_v27, %v5195_v23 }
  0xe6   : > { %v3908_v30 = vsel %vm812_vm4, 1.0, %v4950_v26  ;;  %v3909_v33 = vsel %vm813_vm5, 1.0, %v4950_v26 }
  0xe7   : > { %4464 = vmatmul.mubr.msk.f32.gmra.mrb[30].mxu0 %vm1092_vm1, %v3907_v29 }
  0xe8   : > { %v695_v31 = vpop.permute.xlu1 %694  ;;  %4466 = vmatprep.mubr.msk.f32.mxu0 %vm1092_vm1, %v3908_v30  ;;  %v692_v32 = vpop.permute.xlu0 %691 }
  0xe9   : > { %vm814_vm6 = vcmp.eq.s32.totalorder %v692_v32, %v5195_v23  ;;  %vm815_vm7 = vcmp.eq.s32.totalorder %v695_v31, %v5195_v23  ;;  %v2632_v31 = vld [vmem:[%s5079_s1] sm:$0xff]  ;;  %v2633_v32 = vld [vmem:[%s5079_s1 + $0x8] sm:$0xff] }
  0xea   : > { %v3910_v34 = vsel %vm814_vm6, 1.0, %v4950_v26  ;;  %v3911_v37 = vsel %vm815_vm7, 1.0, %v4950_v26 }
  0xeb   : > { %4467 = vmatmul.mubr.msk.f32.gmra.mrb[32].mxu0 %vm1092_vm1, %v3909_v33  ;;  %v4718_v33 = vpack.c.bf16 %v2633_v32, %v2632_v31 }
  0xec   : > { %v701_v35 = vpop.permute.xlu1 %700  ;;  %4469 = vmatprep.mubr.msk.f32.mxu0 %vm1092_vm1, %v3910_v34  ;;  %v698_v36 = vpop.permute.xlu0 %697  ;;  %v2634_v34 = vld [vmem:[%s5079_s1 + $0x10] sm:$0xff] }
  0xed   : > { %vm816_vm8 = vcmp.eq.s32.totalorder %v698_v36, %v5195_v23  ;;  %vm817_vm9 = vcmp.eq.s32.totalorder %v701_v35, %v5195_v23  ;;  %4719 = vmatprep.subr.bf16.mxu1 %v4718_v33  ;;  %v2636_v36 = vld [vmem:[%s5079_s1 + $0x20] sm:$0xff] }
  0xee   : > { %v3912_v38 = vsel %vm816_vm8, 1.0, %v4950_v26  ;;  %v3913_v41 = vsel %vm817_vm9, 1.0, %v4950_v26  ;;  %4721 = vmatpush3.bf16.msra.mxu1 %v4718_v33 }
  0xef   : > { %4470 = vmatmul.mubr.msk.f32.gmra.mrb[34].mxu0 %vm1092_vm1, %v3911_v37 }
  0xf0   : > { %v707_v39 = vpop.permute.xlu1 %706  ;;  %4472 = vmatprep.mubr.msk.f32.mxu0 %vm1092_vm1, %v3912_v38  ;;  %v704_v40 = vpop.permute.xlu0 %703  ;;  %v2638_v38 = vld [vmem:[%s5079_s1 + $0x30] sm:$0xff] }
  0xf1   : > { %vm818_vm10 = vcmp.eq.s32.totalorder %v704_v40, %v5195_v23  ;;  %vm819_vm11 = vcmp.eq.s32.totalorder %v707_v39, %v5195_v23  ;;  %v2639_v39 = vld [vmem:[%s5079_s1 + $0x38] sm:$0xff] }
  0xf2   : > { %v3914_v42 = vsel %vm818_vm10, 1.0, %v4950_v26  ;;  %v3915_v45 = vsel %vm819_vm11, 1.0, %v4950_v26  ;;  %v4730_v40 = vpack.c.bf16 %v2639_v39, %v2638_v38 }
  0xf3   : > { %4473 = vmatmul.mubr.msk.f32.gmra.mrb[36].mxu0 %vm1092_vm1, %v3913_v41  ;;  %v2640_v41 = vld [vmem:[%s5079_s1 + $0x40] sm:$0xff] }
  0xf4   : > { %v713_v43 = vpop.permute.xlu1 %712  ;;  %4475 = vmatprep.mubr.msk.f32.mxu0 %vm1092_vm1, %v3914_v42  ;;  %v710_v44 = vpop.permute.xlu0 %709  ;;  %v2641_v42 = vld [vmem:[%s5079_s1 + $0x48] sm:$0xff] }
  0xf5   : > { %vm820_vm12 = vcmp.eq.s32.totalorder %v710_v44, %v5195_v23  ;;  %vm821_vm13 = vcmp.eq.s32.totalorder %v713_v43, %v5195_v23  ;;  %v4734_v43 = vpack.c.bf16 %v2641_v42, %v2640_v41  ;;  %v2642_v44 = vld [vmem:[%s5079_s1 + $0x50] sm:$0xff] }
  0xf6   : > { %v3916_v46 = vsel %vm820_vm12, 1.0, %v4950_v26  ;;  %v3917_v49 = vsel %vm821_vm13, 1.0, %v4950_v26 }
  0xf7   : > { %4476 = vmatmul.mubr.msk.f32.gmra.mrb[38].mxu0 %vm1092_vm1, %v3915_v45  ;;  %v2643_v45 = vld [vmem:[%s5079_s1 + $0x58] sm:$0xff] }
  0xf8   : > { %v719_v47 = vpop.permute.xlu1 %718  ;;  %4478 = vmatprep.mubr.msk.f32.mxu0 %vm1092_vm1, %v3916_v46  ;;  %v716_v48 = vpop.permute.xlu0 %715  ;;  %v4738_v46 = vpack.c.bf16 %v2643_v45, %v2642_v44 }
  0xf9   : > { %vm822_vm14 = vcmp.eq.s32.totalorder %v716_v48, %v5195_v23  ;;  %vm823_vm15 = vcmp.eq.s32.totalorder %v719_v47, %v5195_v23  ;;  %v2644_v47 = vld [vmem:[%s5079_s1 + $0x60] sm:$0xff]  ;;  %v2645_v48 = vld [vmem:[%s5079_s1 + $0x68] sm:$0xff] }
  0xfa   : > { %v3918_v50 = vsel %vm822_vm14, 1.0, %v4950_v26  ;;  %v3919_v53 = vsel %vm823_vm15, 1.0, %v4950_v26 }
  0xfb   : > { %4479 = vmatmul.mubr.msk.f32.gmra.mrb[40].mxu0 %vm1092_vm1, %v3917_v49  ;;  %v4742_v49 = vpack.c.bf16 %v2645_v48, %v2644_v47 }
  0xfc   : > { %v725_v51 = vpop.permute.xlu1 %724  ;;  %4481 = vmatprep.mubr.msk.f32.mxu0 %vm1092_vm1, %v3918_v50  ;;  %v722_v52 = vpop.permute.xlu0 %721  ;;  %v2646_v50 = vld [vmem:[%s5079_s1 + $0x70] sm:$0xff] }
  0xfd   : > { %vm824_vm0 = vcmp.eq.s32.totalorder %v722_v52, %v5195_v23  ;;  %vm825_vm2 = vcmp.eq.s32.totalorder %v725_v51, %v5195_v23  ;;  %v2647_v51 = vld [vmem:[%s5079_s1 + $0x78] sm:$0xff] }
  0xfe   : > { %v3920_v54 = vsel %vm824_vm0, 1.0, %v4950_v26  ;;  %v3921_v57 = vsel %vm825_vm2, 1.0, %v4950_v26  ;;  %v4746_v52 = vpack.c.bf16 %v2647_v51, %v2646_v50 }
  0xff   : > { %4482 = vmatmul.mubr.msk.f32.gmra.mrb[42].mxu0 %vm1092_vm1, %v3919_v53 }
 0x100   : > { %v731_v55 = vpop.permute.xlu1 %730  ;;  %4484 = vmatprep.mubr.msk.f32.mxu0 %vm1092_vm1, %v3920_v54  ;;  %v728_v56 = vpop.permute.xlu0 %727 }
 0x101   : > { %vm826_vm3 = vcmp.eq.s32.totalorder %v728_v56, %v5195_v23  ;;  %vm827_vm4 = vcmp.eq.s32.totalorder %v731_v55, %v5195_v23 }
 0x102   : > { %v3922_v58 = vsel %vm826_vm3, 1.0, %v4950_v26  ;;  %v3923_v61 = vsel %vm827_vm4, 1.0, %v4950_v26 }
 0x103   : > { %4485 = vmatmul.mubr.msk.f32.gmra.mrb[44].mxu0 %vm1092_vm1, %v3921_v57 }
 0x104   : > { %v737_v59 = vpop.permute.xlu1 %736  ;;  %4487 = vmatprep.mubr.msk.f32.mxu0 %vm1092_vm1, %v3922_v58  ;;  %v734_v60 = vpop.permute.xlu0 %733 }
 0x105   : > { %vm828_vm5 = vcmp.eq.s32.totalorder %v734_v60, %v5195_v23  ;;  %vm829_vm6 = vcmp.eq.s32.totalorder %v737_v59, %v5195_v23 }
 0x106   : > { %v3924_v62 = vsel %vm828_vm5, 1.0, %v4950_v26  ;;  %v3925_v1 = vsel %vm829_vm6, 1.0, %v4950_v26  ;;  %vm2374_vm6 = vcmask 261120  }
 0x107   : > { %4488 = vmatmul.mubr.msk.f32.gmra.mrb[46].mxu0 %vm1092_vm1, %v3923_v61 }
 0x108   : > { %v743_v63 = vpop.permute.xlu1 %742  ;;  %4490 = vmatprep.mubr.msk.f32.mxu0 %vm1092_vm1, %v3924_v62  ;;  %v740_v0 = vpop.permute.xlu0 %739 }
 0x109   : > { %vm830_vm7 = vcmp.eq.s32.totalorder %v740_v0, %v5195_v23  ;;  %vm831_vm8 = vcmp.eq.s32.totalorder %v743_v63, %v5195_v23 }
 0x10a   : > { %v3926_v2 = vsel %vm830_vm7, 1.0, %v4950_v26  ;;  %v3927_v5 = vsel %vm831_vm8, 1.0, %v4950_v26  ;;  %vm2503_vm7 = vcmask 785408  }
 0x10b   : > { %4491 = vmatmul.mubr.msk.f32.gmra.mrb[48].mxu0 %vm1092_vm1, %v3925_v1 }
 0x10c   : > { %v749_v3 = vpop.permute.xlu1 %748  ;;  %4493 = vmatprep.mubr.msk.f32.mxu0 %vm1092_vm1, %v3926_v2  ;;  %v746_v4 = vpop.permute.xlu0 %745 }
 0x10d   : > { %vm832_vm9 = vcmp.eq.s32.totalorder %v746_v4, %v5195_v23  ;;  %vm833_vm10 = vcmp.eq.s32.totalorder %v749_v3, %v5195_v23 }
 0x10e   : > { %v3928_v6 = vsel %vm832_vm9, 1.0, %v4950_v26  ;;  %v3929_v9 = vsel %vm833_vm10, 1.0, %v4950_v26 }
 0x10f   : > { %4494 = vmatmul.mubr.msk.f32.gmra.mrb[50].mxu0 %vm1092_vm1, %v3927_v5 }
 0x110   : > { %v755_v7 = vpop.permute.xlu1 %754  ;;  %4496 = vmatprep.mubr.msk.f32.mxu0 %vm1092_vm1, %v3928_v6  ;;  %v752_v8 = vpop.permute.xlu0 %751 }
 0x111   : > { %vm834_vm11 = vcmp.eq.s32.totalorder %v752_v8, %v5195_v23  ;;  %vm835_vm12 = vcmp.eq.s32.totalorder %v755_v7, %v5195_v23 }
 0x112   : > { %v3930_v10 = vsel %vm834_vm11, 1.0, %v4950_v26  ;;  %v3931_v13 = vsel %vm835_vm12, 1.0, %v4950_v26 }
 0x113   : > { %4497 = vmatmul.mubr.msk.f32.gmra.mrb[52].mxu0 %vm1092_vm1, %v3929_v9 }
 0x114   : > { %v761_v11 = vpop.permute.xlu1 %760  ;;  %4499 = vmatprep.mubr.msk.f32.mxu0 %vm1092_vm1, %v3930_v10  ;;  %v758_v12 = vpop.permute.xlu0 %757 }
 0x115   : > { %vm836_vm13 = vcmp.eq.s32.totalorder %v758_v12, %v5195_v23  ;;  %vm837_vm14 = vcmp.eq.s32.totalorder %v761_v11, %v5195_v23 }
 0x116   : > { %v3932_v14 = vsel %vm836_vm13, 1.0, %v4950_v26  ;;  %v3933_v17 = vsel %vm837_vm14, 1.0, %v4950_v26 }
 0x117   : > { %4500 = vmatmul.mubr.msk.f32.gmra.mrb[54].mxu0 %vm1092_vm1, %v3931_v13 }
 0x118   : > { %v767_v15 = vpop.permute.xlu1 %766  ;;  %4502 = vmatprep.mubr.msk.f32.mxu0 %vm1092_vm1, %v3932_v14  ;;  %v764_v16 = vpop.permute.xlu0 %763 }
 0x119   : > { %vm838_vm15 = vcmp.eq.s32.totalorder %v764_v16, %v5195_v23  ;;  %vm839_vm0 = vcmp.eq.s32.totalorder %v767_v15, %v5195_v23 }
 0x11a   : > { %v3934_v18 = vsel %vm838_vm15, 1.0, %v4950_v26  ;;  %v3935_v22 = vsel %vm839_vm0, 1.0, %v4950_v26 }
 0x11b   : > { %4503 = vmatmul.mubr.msk.f32.gmra.mrb[56].mxu0 %vm1092_vm1, %v3933_v17 }
 0x11c   : > { %v773_v19 = vpop.permute.xlu1 %772  ;;  %4505 = vmatprep.mubr.msk.f32.mxu0 %vm1092_vm1, %v3934_v18  ;;  %v770_v21 = vpop.permute.xlu0 %769 }
 0x11d   : > { %vm840_vm2 = vcmp.eq.s32.totalorder %v770_v21, %v5195_v23  ;;  %vm841_vm3 = vcmp.eq.s32.totalorder %v773_v19, %v5195_v23 }
 0x11e   : > { %v3936_v24 = vsel %vm840_vm2, 1.0, %v4950_v26  ;;  %v3937_v28 = vsel %vm841_vm3, 1.0, %v4950_v26 }
 0x11f   : > { %4506 = vmatmul.mubr.msk.f32.gmra.mrb[58].mxu0 %vm1092_vm1, %v3935_v22 }
 0x120   : > { %v779_v25 = vpop.permute.xlu1 %778  ;;  %4508 = vmatprep.mubr.msk.f32.mxu0 %vm1092_vm1, %v3936_v24  ;;  %v776_v27 = vpop.permute.xlu0 %775 }
 0x121   : > { %vm842_vm4 = vcmp.eq.s32.totalorder %v776_v27, %v5195_v23  ;;  %vm843_vm5 = vcmp.eq.s32.totalorder %v779_v25, %v5195_v23  ;;  %v2635_v23 = vld [vmem:[%s5079_s1 + $0x18] sm:$0xff] }
 0x122   : > { %v3938_v29 = vsel %vm842_vm4, 1.0, %v4950_v26  ;;  %v3939_v30 = vsel %vm843_vm5, 1.0, %v4950_v26  ;;  %v4722_v35 = vpack.c.bf16 %v2635_v23, %v2634_v34  ;;  %v2637_v26 = vld [vmem:[%s5079_s1 + $0x28] sm:$0xff]  ;;  %s4953_s1 = smov 96  }
 0x123   : > { %4509 = vmatmul.mubr.msk.f32.gmra.mrb[60].mxu0 %vm1092_vm1, %v3937_v28  ;;  %v4726_v37 = vpack.c.bf16 %v2637_v26, %v2636_v36 }
 0x124   : > { %4511 = vmatprep.mubr.msk.f32.mxu0 %vm1092_vm1, %v3938_v29  ;;  %4723 = vmatprep.subr.bf16.mxu1 %v4722_v35 }
 0x125   : > { %4725 = vmatpush3.bf16.msra.mxu1 %v4722_v35 }
 0x126   : > { %4727 = vmatprep.subr.bf16.mxu1 %v4726_v37 }
 0x127   : > { %4512 = vmatmul.mubr.msk.f32.gmra.mrb[62].mxu0 %vm1092_vm1, %v3939_v30 }
 0x129   : > { %4729 = vmatpush3.bf16.msra.mxu1 %v4726_v37 }
 0x12a   : > { %4731 = vmatprep.subr.bf16.mxu1 %v4730_v40 }
 0x12d   : > { %4733 = vmatpush3.bf16.msra.mxu1 %v4730_v40 }
 0x12e   : > { %4735 = vmatprep.subr.bf16.mxu1 %v4734_v43 }
 0x131   : > { %4737 = vmatpush3.bf16.msra.mxu1 %v4734_v43 }
 0x132   : > { %4739 = vmatprep.subr.bf16.mxu1 %v4738_v46 }
 0x135   : > { %4741 = vmatpush3.bf16.msra.mxu1 %v4738_v46 }
 0x136   : > { %4743 = vmatprep.subr.bf16.mxu1 %v4742_v49 }
 0x139   : > { %4745 = vmatpush3.bf16.msra.mxu1 %v4742_v49 }
 0x13a   : > { %4747 = vmatprep.subr.bf16.mxu1 %v4746_v52 }
 0x13d   : > { %4749 = vmatpush3.bf16.msra.mxu1 %v4746_v52 }
 0x17e   : > { %v5405_v53 = vpop.f32.mrb[0].mxu0 }
 0x17f   : > { %1800 = vrot.lane.b32.xlu1 %v5405_v53, %s4951_s13  ;;  %v5409_v54 = vpop.f32.mrb[1].mxu0 }
 0x180   : > { %1798 = vrot.lane.b32.xlu0 %v5409_v54, %s4951_s13 }
 0x182   : > { %v5413_v55 = vpop.f32.mrb[2].mxu0 }
 0x183   : > { %1992 = vrot.lane.b32.xlu1 %v5405_v53, %s4952_s24  ;;  %v5417_v56 = vpop.f32.mrb[3].mxu0 }
 0x184   : > { %1990 = vrot.lane.b32.xlu0 %v5409_v54, %s4952_s24 }
 0x186   : > { %v5421_v57 = vpop.f32.mrb[4].mxu0 }
 0x187   : > { %2184 = vrot.lane.b32.xlu1 %v5405_v53, %s4953_s1  ;;  %v5425_v58 = vpop.f32.mrb[5].mxu0 }
 0x188   : > { %2182 = vrot.lane.b32.xlu0 %v5409_v54, %s4953_s1 }
 0x18a   : > { %v5429_v59 = vpop.f32.mrb[6].mxu0 }
 0x18b   : > { %1804 = vrot.lane.b32.xlu1 %v5413_v55, %s4951_s13  ;;  %v5433_v60 = vpop.f32.mrb[7].mxu0 }
 0x18c   : > { %1802 = vrot.lane.b32.xlu0 %v5417_v56, %s4951_s13 }
 0x18e   : > { %v5437_v61 = vpop.f32.mrb[8].mxu0 }
 0x18f   : > { %1996 = vrot.lane.b32.xlu1 %v5413_v55, %s4952_s24  ;;  %v5441_v62 = vpop.f32.mrb[9].mxu0 }
 0x190   : > { %1994 = vrot.lane.b32.xlu0 %v5417_v56, %s4952_s24 }
 0x192   : > { %v5445_v63 = vpop.f32.mrb[10].mxu0 }
 0x193   : > { %2188 = vrot.lane.b32.xlu1 %v5413_v55, %s4953_s1  ;;  %v5449_v0 = vpop.f32.mrb[11].mxu0 }
 0x194   : > { %2186 = vrot.lane.b32.xlu0 %v5417_v56, %s4953_s1 }
 0x196   : > { %v5453_v1 = vpop.f32.mrb[12].mxu0 }
 0x197   : > { %1808 = vrot.lane.b32.xlu1 %v5421_v57, %s4951_s13  ;;  %v5457_v2 = vpop.f32.mrb[13].mxu0 }
 0x198   : > { %1806 = vrot.lane.b32.xlu0 %v5425_v58, %s4951_s13 }
 0x19a   : > { %v5461_v3 = vpop.f32.mrb[14].mxu0 }
 0x19b   : > { %2000 = vrot.lane.b32.xlu1 %v5421_v57, %s4952_s24  ;;  %v5465_v4 = vpop.f32.mrb[15].mxu0 }
 0x19c   : > { %1998 = vrot.lane.b32.xlu0 %v5425_v58, %s4952_s24 }
 0x19e   : > { %v5469_v5 = vpop.f32.mrb[16].mxu0 }
 0x19f   : > { %2192 = vrot.lane.b32.xlu1 %v5421_v57, %s4953_s1  ;;  %v5473_v6 = vpop.f32.mrb[17].mxu0 }
 0x1a0   : > { %2190 = vrot.lane.b32.xlu0 %v5425_v58, %s4953_s1 }
 0x1a2   : > { %v5477_v7 = vpop.f32.mrb[18].mxu0 }
 0x1a3   : > { %1812 = vrot.lane.b32.xlu1 %v5429_v59, %s4951_s13  ;;  %v5481_v8 = vpop.f32.mrb[19].mxu0 }
 0x1a4   : > { %1810 = vrot.lane.b32.xlu0 %v5433_v60, %s4951_s13 }
 0x1a6   : > { %v5485_v9 = vpop.f32.mrb[20].mxu0 }
 0x1a7   : > { %2004 = vrot.lane.b32.xlu1 %v5429_v59, %s4952_s24  ;;  %v5489_v10 = vpop.f32.mrb[21].mxu0 }
 0x1a8   : > { %2002 = vrot.lane.b32.xlu0 %v5433_v60, %s4952_s24 }
 0x1aa   : > { %v5493_v11 = vpop.f32.mrb[22].mxu0 }
 0x1ab   : > { %2196 = vrot.lane.b32.xlu1 %v5429_v59, %s4953_s1  ;;  %v5497_v12 = vpop.f32.mrb[23].mxu0 }
 0x1ac   : > { %2194 = vrot.lane.b32.xlu0 %v5433_v60, %s4953_s1 }
 0x1ae   : > { %v5501_v13 = vpop.f32.mrb[24].mxu0 }
 0x1af   : > { %1816 = vrot.lane.b32.xlu1 %v5437_v61, %s4951_s13  ;;  %v5505_v14 = vpop.f32.mrb[25].mxu0 }
 0x1b0   : > { %1814 = vrot.lane.b32.xlu0 %v5441_v62, %s4951_s13 }
 0x1b2   : > { %v5509_v15 = vpop.f32.mrb[26].mxu0 }
 0x1b3   : > { %2008 = vrot.lane.b32.xlu1 %v5437_v61, %s4952_s24  ;;  %v5513_v16 = vpop.f32.mrb[27].mxu0 }
 0x1b4   : > { %2006 = vrot.lane.b32.xlu0 %v5441_v62, %s4952_s24 }
 0x1b6   : > { %v5517_v17 = vpop.f32.mrb[28].mxu0 }
 0x1b7   : > { %2200 = vrot.lane.b32.xlu1 %v5437_v61, %s4953_s1  ;;  %v5521_v18 = vpop.f32.mrb[29].mxu0 }
 0x1b8   : > { %2198 = vrot.lane.b32.xlu0 %v5441_v62, %s4953_s1 }
 0x1ba   : > { %v5525_v19 = vpop.f32.mrb[30].mxu0 }
 0x1bb   : > { %1820 = vrot.lane.b32.xlu1 %v5445_v63, %s4951_s13  ;;  %v5529_v21 = vpop.f32.mrb[31].mxu0 }
 0x1bc   : > { %1818 = vrot.lane.b32.xlu0 %v5449_v0, %s4951_s13 }
 0x1be   : > { %v5533_v22 = vpop.f32.mrb[32].mxu0 }
 0x1bf   : > { %2012 = vrot.lane.b32.xlu1 %v5445_v63, %s4952_s24  ;;  %v5537_v24 = vpop.f32.mrb[33].mxu0 }
 0x1c0   : > { %2010 = vrot.lane.b32.xlu0 %v5449_v0, %s4952_s24 }
 0x1c2   : > { %v5541_v25 = vpop.f32.mrb[34].mxu0 }
 0x1c3   : > { %2204 = vrot.lane.b32.xlu1 %v5445_v63, %s4953_s1  ;;  %v5545_v27 = vpop.f32.mrb[35].mxu0 }
 0x1c4   : > { %2202 = vrot.lane.b32.xlu0 %v5449_v0, %s4953_s1 }
 0x1c6   : > { %v5549_v28 = vpop.f32.mrb[36].mxu0 }
 0x1c7   : > { %1824 = vrot.lane.b32.xlu1 %v5453_v1, %s4951_s13  ;;  %v5553_v29 = vpop.f32.mrb[37].mxu0 }
 0x1c8   : > { %1822 = vrot.lane.b32.xlu0 %v5457_v2, %s4951_s13 }
 0x1ca   : > { %v5557_v30 = vpop.f32.mrb[38].mxu0 }
 0x1cb   : > { %2016 = vrot.lane.b32.xlu1 %v5453_v1, %s4952_s24  ;;  %v5561_v31 = vpop.f32.mrb[39].mxu0 }
 0x1cc   : > { %2014 = vrot.lane.b32.xlu0 %v5457_v2, %s4952_s24 }
 0x1ce   : > { %v5565_v32 = vpop.f32.mrb[40].mxu0 }
 0x1cf   : > { %2208 = vrot.lane.b32.xlu1 %v5453_v1, %s4953_s1  ;;  %v5569_v33 = vpop.f32.mrb[41].mxu0 }
 0x1d0   : > { %2206 = vrot.lane.b32.xlu0 %v5457_v2, %s4953_s1 }
 0x1d2   : > { %v5573_v34 = vpop.f32.mrb[42].mxu0 }
 0x1d3   : > { %1828 = vrot.lane.b32.xlu1 %v5461_v3, %s4951_s13  ;;  %v5577_v23 = vpop.f32.mrb[43].mxu0 }
 0x1d4   : > { %1826 = vrot.lane.b32.xlu0 %v5465_v4, %s4951_s13 }
 0x1d6   : > { %v5581_v35 = vpop.f32.mrb[44].mxu0 }
 0x1d7   : > { %2020 = vrot.lane.b32.xlu1 %v5461_v3, %s4952_s24  ;;  %v5585_v36 = vpop.f32.mrb[45].mxu0 }
 0x1d8   : > { %2018 = vrot.lane.b32.xlu0 %v5465_v4, %s4952_s24 }
 0x1da   : > { %v5589_v26 = vpop.f32.mrb[46].mxu0 }
 0x1db   : > { %2212 = vrot.lane.b32.xlu1 %v5461_v3, %s4953_s1  ;;  %v5593_v37 = vpop.f32.mrb[47].mxu0 }
 0x1dc   : > { %2210 = vrot.lane.b32.xlu0 %v5465_v4, %s4953_s1 }
 0x1de   : > { %v5597_v38 = vpop.f32.mrb[48].mxu0 }
 0x1df   : > { %1832 = vrot.lane.b32.xlu1 %v5469_v5, %s4951_s13  ;;  %v5601_v39 = vpop.f32.mrb[49].mxu0 }
 0x1e0   : > { %1830 = vrot.lane.b32.xlu0 %v5473_v6, %s4951_s13 }
 0x1e2   : > { %v5605_v40 = vpop.f32.mrb[50].mxu0 }
 0x1e3   : > { %6645 = vst [vmem:[#allocation9_spill] sm:$0xff] %v5605_v40  ;;  %2024 = vrot.lane.b32.xlu1 %v5469_v5, %s4952_s24  ;;  %v5609_v41 = vpop.f32.mrb[51].mxu0 }
 0x1e4   : > { %6646 = vst [vmem:[#allocation10_spill] sm:$0xff] %v5609_v41  ;;  %2022 = vrot.lane.b32.xlu0 %v5473_v6, %s4952_s24 }
 0x1e6   : > { %v5613_v42 = vpop.f32.mrb[52].mxu0 }
 0x1e7   : > { %6647 = vst [vmem:[#allocation11_spill] sm:$0xff] %v5613_v42  ;;  %2216 = vrot.lane.b32.xlu1 %v5469_v5, %s4953_s1  ;;  %v5617_v43 = vpop.f32.mrb[53].mxu0  ;;  %v1671_v42 = vld [vmem:[%s5060_s29 + $0x8] sm:$0xff] }
 0x1e8   : > { %6648 = vst [vmem:[#allocation12_spill] sm:$0xff] %v5617_v43  ;;  %2214 = vrot.lane.b32.xlu0 %v5473_v6, %s4953_s1 }
 0x1ea   : > { %v5621_v44 = vpop.f32.mrb[54].mxu0 }
 0x1eb   : > { %6649 = vst [vmem:[#allocation13_spill] sm:$0xff] %v5621_v44  ;;  %1836 = vrot.lane.b32.xlu1 %v5477_v7, %s4951_s13  ;;  %v5625_v45 = vpop.f32.mrb[55].mxu0 }
 0x1ec   : > { %6650 = vst [vmem:[#allocation14_spill] sm:$0xff] %v5625_v45  ;;  %1834 = vrot.lane.b32.xlu0 %v5481_v8, %s4951_s13 }
 0x1ee   : > { %v5629_v46 = vpop.f32.mrb[56].mxu0 }
 0x1ef   : > { %6651 = vst [vmem:[#allocation15_spill] sm:$0xff] %v5629_v46  ;;  %2028 = vrot.lane.b32.xlu1 %v5477_v7, %s4952_s24  ;;  %v5633_v47 = vpop.f32.mrb[57].mxu0 }
 0x1f0   : > { %6652 = vst [vmem:[#allocation16_spill] sm:$0xff] %v5633_v47  ;;  %2026 = vrot.lane.b32.xlu0 %v5481_v8, %s4952_s24 }
 0x1f1   : > { %v1801_v48 = vpop.permute.xlu1 %1800 }
 0x1f2   : > { %v5637_v49 = vpop.f32.mrb[58].mxu0  ;;  %v1799_v50 = vpop.permute.xlu0 %1798  ;;  %v2376_v46 = vsel %vm2374_vm6, %v5405_v53, %v1801_v48 }
 0x1f3   : > { %6653 = vst [vmem:[#allocation17_spill] sm:$0xff] %v5637_v49  ;;  %2220 = vrot.lane.b32.xlu1 %v5477_v7, %s4953_s1  ;;  %v5641_v51 = vpop.f32.mrb[59].mxu0 }
 0x1f4   : > { %6654 = vst [vmem:[#allocation18_spill] sm:$0xff] %v5641_v51  ;;  %2218 = vrot.lane.b32.xlu0 %v5481_v8, %s4953_s1  ;;  %v2375_v51 = vsel %vm2374_vm6, %v5409_v54, %v1799_v50 }
 0x1f5   : > { %v1993_v52 = vpop.permute.xlu1 %1992 }
 0x1f6   : > { %v5645_v20 = vpop.f32.mrb[60].mxu0  ;;  %v1991_v47 = vpop.permute.xlu0 %1990  ;;  %v2440_v45 = vsel %vm1092_vm1, %v2376_v46, %v1993_v52  ;;  %v1673_v52 = vld [vmem:[%s5060_s29 + $0x18] sm:$0xff] }
 0x1f7   : > { %6655 = vst [vmem:[#allocation19_spill] sm:$0xff] %v5645_v20  ;;  %1840 = vrot.lane.b32.xlu1 %v5485_v9, %s4951_s13  ;;  %v5649_v49 = vpop.f32.mrb[61].mxu0  ;;  %v1670_v20 = vld [vmem:[%s5060_s29] sm:$0xff]  ;;  %v2439_v43 = vsel %vm1092_vm1, %v2375_v51, %v1991_v47 }
 0x1f8   : > { %6656 = vst [vmem:[#allocation20_spill] sm:$0xff] %v5649_v49  ;;  %1838 = vrot.lane.b32.xlu0 %v5489_v10, %s4951_s13 }
 0x1f9   : > { %v2185_v44 = vpop.permute.xlu1 %2184 }
 0x1fa   : > { %v2505_v41 = vsel %vm2503_vm7, %v2440_v45, %v2185_v44  ;;  %v5662_v49 = vpop.f32.mrb[62].mxu0  ;;  %v2183_v40 = vpop.permute.xlu0 %2182 }
 0x1fb   : > { %2032 = vrot.lane.b32.xlu1 %v5485_v9, %s4952_s24  ;;  %v5666_v53 = vpop.f32.mrb[63].mxu0  ;;  %v2504_v48 = vsel %vm2503_vm7, %v2439_v43, %v2183_v40  ;;  %v2569_v46 = vmul.f32 %v2505_v41, %v1671_v42  ;;  %v1672_v43 = vld [vmem:[%s5060_s29 + $0x10] sm:$0xff] }
 0x1fc   : > { %2030 = vrot.lane.b32.xlu0 %v5489_v10, %s4952_s24  ;;  %v2568_v54 = vmul.f32 %v2504_v48, %v1670_v20 }
 0x1fd   : > { %v1805_v47 = vpop.permute.xlu1 %1804 }
 0x1fe   : > { %4546 = vmatprep.mubr.f32.mxu1 %v2568_v54  ;;  %v1803_v44 = vpop.permute.xlu0 %1802  ;;  %v2378_v20 = vsel %vm2374_vm6, %v5413_v55, %v1805_v47 }
 0x1ff   : > { %2224 = vrot.lane.b32.xlu1 %v5485_v9, %s4953_s1  ;;  %4547 = vmatmul.mubr.f32.vlgmr.msra.gmra.mrb[0].mxu1 %v2569_v46  ;;  %v2377_v40 = vsel %vm2374_vm6, %v5417_v56, %v1803_v44 }
 0x200   : > { %2222 = vrot.lane.b32.xlu0 %v5489_v10, %s4953_s1 }
 0x201   : > { %v1997_v45 = vpop.permute.xlu1 %1996 }
 0x202   : > { %v1995_v50 = vpop.permute.xlu0 %1994  ;;  %v2442_v41 = vsel %vm1092_vm1, %v2378_v20, %v1997_v45 }
 0x203   : > { %1844 = vrot.lane.b32.xlu1 %v5493_v11, %s4951_s13  ;;  %v2441_v51 = vsel %vm1092_vm1, %v2377_v40, %v1995_v50 }
 0x204   : > { %1842 = vrot.lane.b32.xlu0 %v5497_v12, %s4951_s13 }
 0x205   : > { %v2189_v42 = vpop.permute.xlu1 %2188 }
 0x206   : > { %v2507_v48 = vsel %vm2503_vm7, %v2442_v41, %v2189_v42  ;;  %v2187_v54 = vpop.permute.xlu0 %2186 }
 0x207   : > { %v2506_v46 = vsel %vm2503_vm7, %v2441_v51, %v2187_v54  ;;  %2036 = vrot.lane.b32.xlu1 %v5493_v11, %s4952_s24  ;;  %v2571_v56 = vmul.f32 %v2507_v48, %v1673_v52  ;;  %v1675_v52 = vld [vmem:[%s5060_s29 + $0x28] sm:$0xff] }
 0x208   : > { %v2570_v55 = vmul.f32 %v2506_v46, %v1672_v43  ;;  %2034 = vrot.lane.b32.xlu0 %v5497_v12, %s4952_s24  ;;  %v1674_v43 = vld [vmem:[%s5060_s29 + $0x20] sm:$0xff] }
 0x209   : > { %v1809_v47 = vpop.permute.xlu1 %1808 }
 0x20a   : > { %4549 = vmatprep.mubr.f32.mxu1 %v2570_v55  ;;  %v1807_v44 = vpop.permute.xlu0 %1806  ;;  %v2380_v20 = vsel %vm2374_vm6, %v5421_v57, %v1809_v47 }
 0x20b   : > { %2228 = vrot.lane.b32.xlu1 %v5493_v11, %s4953_s1  ;;  %4550 = vmatmul.mubr.f32.gmra.mrb[2].mxu1 %v2571_v56  ;;  %v2379_v40 = vsel %vm2374_vm6, %v5425_v58, %v1807_v44 }
 0x20c   : > { %2226 = vrot.lane.b32.xlu0 %v5497_v12, %s4953_s1 }
 0x20d   : > { %v2001_v45 = vpop.permute.xlu1 %2000 }
 0x20e   : > { %v1999_v50 = vpop.permute.xlu0 %1998  ;;  %v2444_v41 = vsel %vm1092_vm1, %v2380_v20, %v2001_v45 }
 0x20f   : > { %1848 = vrot.lane.b32.xlu1 %v5501_v13, %s4951_s13  ;;  %v2443_v51 = vsel %vm1092_vm1, %v2379_v40, %v1999_v50 }
 0x210   : > { %1846 = vrot.lane.b32.xlu0 %v5505_v14, %s4951_s13 }
 0x211   : > { %v2193_v42 = vpop.permute.xlu1 %2192 }
 0x212   : > { %v2509_v48 = vsel %vm2503_vm7, %v2444_v41, %v2193_v42  ;;  %v2191_v54 = vpop.permute.xlu0 %2190  ;;  %v1676_v41 = vld [vmem:[%s5060_s29 + $0x30] sm:$0xff] }
 0x213   : > { %v2508_v46 = vsel %vm2503_vm7, %v2443_v51, %v2191_v54  ;;  %2040 = vrot.lane.b32.xlu1 %v5501_v13, %s4952_s24  ;;  %v2573_v58 = vmul.f32 %v2509_v48, %v1675_v52 }
 0x214   : > { %v2572_v57 = vmul.f32 %v2508_v46, %v1674_v43  ;;  %2038 = vrot.lane.b32.xlu0 %v5505_v14, %s4952_s24  ;;  %v1677_v43 = vld [vmem:[%s5060_s29 + $0x38] sm:$0xff] }
 0x215   : > { %v1813_v55 = vpop.permute.xlu1 %1812 }
 0x216   : > { %4552 = vmatprep.mubr.f32.mxu1 %v2572_v57  ;;  %v1811_v56 = vpop.permute.xlu0 %1810  ;;  %v2382_v45 = vsel %vm2374_vm6, %v5429_v59, %v1813_v55 }
 0x217   : > { %2232 = vrot.lane.b32.xlu1 %v5501_v13, %s4953_s1  ;;  %4553 = vmatmul.mubr.f32.gmra.mrb[4].mxu1 %v2573_v58  ;;  %v2381_v50 = vsel %vm2374_vm6, %v5433_v60, %v1811_v56 }
 0x218   : > { %2230 = vrot.lane.b32.xlu0 %v5505_v14, %s4953_s1 }
 0x219   : > { %v2005_v47 = vpop.permute.xlu1 %2004 }
 0x21a   : > { %v2003_v44 = vpop.permute.xlu0 %2002  ;;  %v2446_v20 = vsel %vm1092_vm1, %v2382_v45, %v2005_v47  ;;  %v1678_v45 = vld [vmem:[%s5060_s29 + $0x40] sm:$0xff] }
 0x21b   : > { %1852 = vrot.lane.b32.xlu1 %v5509_v15, %s4951_s13  ;;  %v2445_v42 = vsel %vm1092_vm1, %v2381_v50, %v2003_v44 }
 0x21c   : > { %1850 = vrot.lane.b32.xlu0 %v5513_v16, %s4951_s13 }
 0x21d   : > { %v2197_v40 = vpop.permute.xlu1 %2196 }
 0x21e   : > { %v2511_v51 = vsel %vm2503_vm7, %v2446_v20, %v2197_v40  ;;  %v2195_v52 = vpop.permute.xlu0 %2194  ;;  %v1679_v20 = vld [vmem:[%s5060_s29 + $0x48] sm:$0xff] }
 0x21f   : > { %v2510_v48 = vsel %vm2503_vm7, %v2445_v42, %v2195_v52  ;;  %2044 = vrot.lane.b32.xlu1 %v5509_v15, %s4952_s24  ;;  %v2575_v60 = vmul.f32 %v2511_v51, %v1677_v43 }
 0x220   : > { %v2574_v59 = vmul.f32 %v2510_v48, %v1676_v41  ;;  %2042 = vrot.lane.b32.xlu0 %v5513_v16, %s4952_s24 }
 0x221   : > { %v1817_v54 = vpop.permute.xlu1 %1816 }
 0x222   : > { %4555 = vmatprep.mubr.f32.mxu1 %v2574_v59  ;;  %v1815_v46 = vpop.permute.xlu0 %1814  ;;  %v2384_v55 = vsel %vm2374_vm6, %v5437_v61, %v1817_v54 }
 0x223   : > { %2236 = vrot.lane.b32.xlu1 %v5509_v15, %s4953_s1  ;;  %4556 = vmatmul.mubr.f32.gmra.mrb[6].mxu1 %v2575_v60  ;;  %v2383_v56 = vsel %vm2374_vm6, %v5441_v62, %v1815_v46 }
 0x224   : > { %2234 = vrot.lane.b32.xlu0 %v5513_v16, %s4953_s1 }
 0x225   : > { %v2009_v57 = vpop.permute.xlu1 %2008 }
 0x226   : > { %v2007_v58 = vpop.permute.xlu0 %2006  ;;  %v2448_v47 = vsel %vm1092_vm1, %v2384_v55, %v2009_v57  ;;  %v1680_v57 = vld [vmem:[%s5060_s29 + $0x50] sm:$0xff]  ;;  %v1681_v55 = vld [vmem:[%s5060_s29 + $0x58] sm:$0xff] }
 0x227   : > { %1856 = vrot.lane.b32.xlu1 %v5517_v17, %s4951_s13  ;;  %v2447_v50 = vsel %vm1092_vm1, %v2383_v56, %v2007_v58 }
 0x228   : > { %1854 = vrot.lane.b32.xlu0 %v5521_v18, %s4951_s13 }
 0x229   : > { %v2201_v44 = vpop.permute.xlu1 %2200 }
 0x22a   : > { %v2513_v40 = vsel %vm2503_vm7, %v2448_v47, %v2201_v44  ;;  %v2199_v41 = vpop.permute.xlu0 %2198 }
 0x22b   : > { %v2512_v42 = vsel %vm2503_vm7, %v2447_v50, %v2199_v41  ;;  %2048 = vrot.lane.b32.xlu1 %v5517_v17, %s4952_s24  ;;  %v2577_v62 = vmul.f32 %v2513_v40, %v1679_v20 }
 0x22c   : > { %v2576_v61 = vmul.f32 %v2512_v42, %v1678_v45  ;;  %2046 = vrot.lane.b32.xlu0 %v5521_v18, %s4952_s24 }
 0x22d   : > { %v1821_v43 = vpop.permute.xlu1 %1820 }
 0x22e   : > { %4558 = vmatprep.mubr.f32.mxu1 %v2576_v61  ;;  %v1819_v51 = vpop.permute.xlu0 %1818  ;;  %v2386_v59 = vsel %vm2374_vm6, %v5445_v63, %v1821_v43  ;;  %v1682_v43 = vld [vmem:[%s5060_s29 + $0x60] sm:$0xff] }
 0x22f   : > { %2240 = vrot.lane.b32.xlu1 %v5517_v17, %s4953_s1  ;;  %4559 = vmatmul.mubr.f32.gmra.mrb[8].mxu1 %v2577_v62  ;;  %v2385_v60 = vsel %vm2374_vm6, %v5449_v0, %v1819_v51 }
 0x230   : > { %2238 = vrot.lane.b32.xlu0 %v5521_v18, %s4953_s1 }
 0x231   : > { %v2013_v52 = vpop.permute.xlu1 %2012 }
 0x232   : > { %v2011_v48 = vpop.permute.xlu0 %2010  ;;  %v2450_v54 = vsel %vm1092_vm1, %v2386_v59, %v2013_v52  ;;  %v1683_v52 = vld [vmem:[%s5060_s29 + $0x68] sm:$0xff] }
 0x233   : > { %1860 = vrot.lane.b32.xlu1 %v5525_v19, %s4951_s13  ;;  %v2449_v58 = vsel %vm1092_vm1, %v2385_v60, %v2011_v48 }
 0x234   : > { %1858 = vrot.lane.b32.xlu0 %v5529_v21, %s4951_s13 }
 0x235   : > { %v2205_v46 = vpop.permute.xlu1 %2204 }
 0x236   : > { %v2515_v56 = vsel %vm2503_vm7, %v2450_v54, %v2205_v46  ;;  %v2203_v47 = vpop.permute.xlu0 %2202 }
 0x237   : > { %v2514_v44 = vsel %vm2503_vm7, %v2449_v58, %v2203_v47  ;;  %2052 = vrot.lane.b32.xlu1 %v5525_v19, %s4952_s24  ;;  %v2579_v0 = vmul.f32 %v2515_v56, %v1681_v55 }
 0x238   : > { %v2578_v63 = vmul.f32 %v2514_v44, %v1680_v57  ;;  %2050 = vrot.lane.b32.xlu0 %v5529_v21, %s4952_s24 }
 0x239   : > { %v1825_v45 = vpop.permute.xlu1 %1824 }
 0x23a   : > { %4561 = vmatprep.mubr.f32.mxu1 %v2578_v63  ;;  %v1823_v50 = vpop.permute.xlu0 %1822  ;;  %v2388_v41 = vsel %vm2374_vm6, %v5453_v1, %v1825_v45  ;;  %v1684_v63 = vld [vmem:[%s5060_s29 + $0x70] sm:$0xff]  ;;  %v1685_v45 = vld [vmem:[%s5060_s29 + $0x78] sm:$0xff] }
 0x23b   : > { %2244 = vrot.lane.b32.xlu1 %v5525_v19, %s4953_s1  ;;  %4562 = vmatmul.mubr.f32.gmra.mrb[10].mxu1 %v2579_v0  ;;  %v2387_v42 = vsel %vm2374_vm6, %v5457_v2, %v1823_v50 }
 0x23c   : > { %2242 = vrot.lane.b32.xlu0 %v5529_v21, %s4953_s1 }
 0x23d   : > { %v2017_v20 = vpop.permute.xlu1 %2016 }
 0x23e   : > { %v2015_v40 = vpop.permute.xlu0 %2014  ;;  %v2452_v61 = vsel %vm1092_vm1, %v2388_v41, %v2017_v20 }
 0x23f   : > { %1864 = vrot.lane.b32.xlu1 %v5533_v22, %s4951_s13  ;;  %v2451_v51 = vsel %vm1092_vm1, %v2387_v42, %v2015_v40 }
 0x240   : > { %1862 = vrot.lane.b32.xlu0 %v5537_v24, %s4951_s13 }
 0x241   : > { %v2209_v62 = vpop.permute.xlu1 %2208 }
 0x242   : > { %v2517_v48 = vsel %vm2503_vm7, %v2452_v61, %v2209_v62  ;;  %v2207_v59 = vpop.permute.xlu0 %2206 }
 0x243   : > { %v2516_v60 = vsel %vm2503_vm7, %v2451_v51, %v2207_v59  ;;  %2056 = vrot.lane.b32.xlu1 %v5533_v22, %s4952_s24  ;;  %v2581_v2 = vmul.f32 %v2517_v48, %v1683_v52  ;;  %v1686_v59 = vld [vmem:[%s5060_s29 + $0x80] sm:$0xff] }
 0x244   : > { %v2580_v1 = vmul.f32 %v2516_v60, %v1682_v43  ;;  %2054 = vrot.lane.b32.xlu0 %v5537_v24, %s4952_s24 }
 0x245   : > { %v1829_v54 = vpop.permute.xlu1 %1828 }
 0x246   : > { %4564 = vmatprep.mubr.f32.mxu1 %v2580_v1  ;;  %v1827_v46 = vpop.permute.xlu0 %1826  ;;  %v2390_v55 = vsel %vm2374_vm6, %v5461_v3, %v1829_v54  ;;  %v1687_v1 = vld [vmem:[%s5060_s29 + $0x88] sm:$0xff] }
 0x247   : > { %2248 = vrot.lane.b32.xlu1 %v5533_v22, %s4953_s1  ;;  %4565 = vmatmul.mubr.f32.gmra.mrb[12].mxu1 %v2581_v2  ;;  %v2389_v56 = vsel %vm2374_vm6, %v5465_v4, %v1827_v46 }
 0x248   : > { %2246 = vrot.lane.b32.xlu0 %v5537_v24, %s4953_s1 }
 0x249   : > { %v2021_v57 = vpop.permute.xlu1 %2020 }
 0x24a   : > { %v2019_v58 = vpop.permute.xlu0 %2018  ;;  %v2454_v47 = vsel %vm1092_vm1, %v2390_v55, %v2021_v57 }
 0x24b   : > { %1868 = vrot.lane.b32.xlu1 %v5541_v25, %s4951_s13  ;;  %v2453_v0 = vsel %vm1092_vm1, %v2389_v56, %v2019_v58 }
 0x24c   : > { %1866 = vrot.lane.b32.xlu0 %v5545_v27, %s4951_s13 }
 0x24d   : > { %v2213_v44 = vpop.permute.xlu1 %2212 }
 0x24e   : > { %v2519_v50 = vsel %vm2503_vm7, %v2454_v47, %v2213_v44  ;;  %v2211_v20 = vpop.permute.xlu0 %2210 }
 0x24f   : > { %v2518_v40 = vsel %vm2503_vm7, %v2453_v0, %v2211_v20  ;;  %2060 = vrot.lane.b32.xlu1 %v5541_v25, %s4952_s24  ;;  %v2583_v4 = vmul.f32 %v2519_v50, %v1685_v45  ;;  %v1688_v45 = vld [vmem:[%s5060_s29 + $0x90] sm:$0xff]  ;;  %v1689_v20 = vld [vmem:[%s5060_s29 + $0x98] sm:$0xff] }
 0x250   : > { %v2582_v3 = vmul.f32 %v2518_v40, %v1684_v63  ;;  %2058 = vrot.lane.b32.xlu0 %v5545_v27, %s4952_s24 }
 0x251   : > { %v1833_v41 = vpop.permute.xlu1 %1832 }
 0x252   : > { %4567 = vmatprep.mubr.f32.mxu1 %v2582_v3  ;;  %v1831_v42 = vpop.permute.xlu0 %1830  ;;  %v2392_v43 = vsel %vm2374_vm6, %v5469_v5, %v1833_v41 }
 0x253   : > { %2252 = vrot.lane.b32.xlu1 %v5541_v25, %s4953_s1  ;;  %4568 = vmatmul.mubr.f32.gmra.mrb[14].mxu1 %v2583_v4  ;;  %v2391_v51 = vsel %vm2374_vm6, %v5473_v6, %v1831_v42 }
 0x254   : > { %2250 = vrot.lane.b32.xlu0 %v5545_v27, %s4953_s1 }
 0x255   : > { %v2025_v61 = vpop.permute.xlu1 %2024 }
 0x256   : > { %v2023_v62 = vpop.permute.xlu0 %2022  ;;  %v2456_v52 = vsel %vm1092_vm1, %v2392_v43, %v2025_v61 }
 0x257   : > { %1872 = vrot.lane.b32.xlu1 %v5549_v28, %s4951_s13  ;;  %v2455_v60 = vsel %vm1092_vm1, %v2391_v51, %v2023_v62 }
 0x258   : > { %1870 = vrot.lane.b32.xlu0 %v5553_v29, %s4951_s13 }
 0x259   : > { %v2217_v48 = vpop.permute.xlu1 %2216 }
 0x25a   : > { %v2521_v2 = vsel %vm2503_vm7, %v2456_v52, %v2217_v48  ;;  %v2215_v54 = vpop.permute.xlu0 %2214 }
 0x25b   : > { %v2520_v46 = vsel %vm2503_vm7, %v2455_v60, %v2215_v54  ;;  %2064 = vrot.lane.b32.xlu1 %v5549_v28, %s4952_s24  ;;  %v2585_v6 = vmul.f32 %v2521_v2, %v1687_v1  ;;  %v1691_v1 = vld [vmem:[%s5060_s29 + $0xa8] sm:$0xff] }
 0x25c   : > { %v2584_v5 = vmul.f32 %v2520_v46, %v1686_v59  ;;  %2062 = vrot.lane.b32.xlu0 %v5553_v29, %s4952_s24  ;;  %v1690_v59 = vld [vmem:[%s5060_s29 + $0xa0] sm:$0xff] }
 0x25d   : > { %v1837_v57 = vpop.permute.xlu1 %1836 }
 0x25e   : > { %4570 = vmatprep.mubr.f32.mxu1 %v2584_v5  ;;  %v1835_v58 = vpop.permute.xlu0 %1834  ;;  %v2394_v47 = vsel %vm2374_vm6, %v5477_v7, %v1837_v57 }
 0x25f   : > { %2256 = vrot.lane.b32.xlu1 %v5549_v28, %s4953_s1  ;;  %4571 = vmatmul.mubr.f32.gmra.mrb[16].mxu1 %v2585_v6  ;;  %v2393_v44 = vsel %vm2374_vm6, %v5481_v8, %v1835_v58 }
 0x260   : > { %2254 = vrot.lane.b32.xlu0 %v5553_v29, %s4953_s1 }
 0x261   : > { %v2029_v55 = vpop.permute.xlu1 %2028 }
 0x262   : > { %v2027_v56 = vpop.permute.xlu0 %2026  ;;  %v2458_v63 = vsel %vm1092_vm1, %v2394_v47, %v2029_v55 }
 0x263   : > { %1876 = vrot.lane.b32.xlu1 %v5557_v30, %s4951_s13  ;;  %v2457_v50 = vsel %vm1092_vm1, %v2393_v44, %v2027_v56 }
 0x264   : > { %1874 = vrot.lane.b32.xlu0 %v5561_v31, %s4951_s13 }
 0x265   : > { %v2221_v0 = vpop.permute.xlu1 %2220 }
 0x266   : > { %v2523_v40 = vsel %vm2503_vm7, %v2458_v63, %v2221_v0  ;;  %v2219_v3 = vpop.permute.xlu0 %2218  ;;  %v1692_v63 = vld [vmem:[%s5060_s29 + $0xb0] sm:$0xff] }
 0x267   : > { %v2522_v4 = vsel %vm2503_vm7, %v2457_v50, %v2219_v3  ;;  %2068 = vrot.lane.b32.xlu1 %v5557_v30, %s4952_s24  ;;  %v2587_v8 = vmul.f32 %v2523_v40, %v1689_v20 }
 0x268   : > { %v2586_v7 = vmul.f32 %v2522_v4, %v1688_v45  ;;  %2066 = vrot.lane.b32.xlu0 %v5561_v31, %s4952_s24  ;;  %v1693_v45 = vld [vmem:[%s5060_s29 + $0xb8] sm:$0xff] }
 0x269   : > { %v1841_v41 = vpop.permute.xlu1 %1840 }
 0x26a   : > { %4573 = vmatprep.mubr.f32.mxu1 %v2586_v7  ;;  %v1839_v42 = vpop.permute.xlu0 %1838  ;;  %v2396_v43 = vsel %vm2374_vm6, %v5485_v9, %v1841_v41 }
 0x26b   : > { %2260 = vrot.lane.b32.xlu1 %v5557_v30, %s4953_s1  ;;  %4574 = vmatmul.mubr.f32.gmra.mrb[18].mxu1 %v2587_v8  ;;  %v2395_v51 = vsel %vm2374_vm6, %v5489_v10, %v1839_v42 }
 0x26c   : > { %2258 = vrot.lane.b32.xlu0 %v5561_v31, %s4953_s1 }
 0x26d   : > { %v2033_v61 = vpop.permute.xlu1 %2032 }
 0x26e   : > { %v2031_v62 = vpop.permute.xlu0 %2030  ;;  %v2460_v52 = vsel %vm1092_vm1, %v2396_v43, %v2033_v61  ;;  %v1694_v43 = vld [vmem:[%s5060_s29 + $0xc0] sm:$0xff] }
 0x26f   : > { %1880 = vrot.lane.b32.xlu1 %v5565_v32, %s4951_s13  ;;  %v2459_v60 = vsel %vm1092_vm1, %v2395_v51, %v2031_v62 }
 0x270   : > { %1878 = vrot.lane.b32.xlu0 %v5569_v33, %s4951_s13 }
 0x271   : > { %v2225_v48 = vpop.permute.xlu1 %2224 }
 0x272   : > { %v2525_v2 = vsel %vm2503_vm7, %v2460_v52, %v2225_v48  ;;  %v2223_v54 = vpop.permute.xlu0 %2222  ;;  %v1695_v52 = vld [vmem:[%s5060_s29 + $0xc8] sm:$0xff] }
 0x273   : > { %v2524_v46 = vsel %vm2503_vm7, %v2459_v60, %v2223_v54  ;;  %2072 = vrot.lane.b32.xlu1 %v5565_v32, %s4952_s24  ;;  %v2589_v10 = vmul.f32 %v2525_v2, %v1691_v1 }
 0x274   : > { %v2588_v9 = vmul.f32 %v2524_v46, %v1690_v59  ;;  %2070 = vrot.lane.b32.xlu0 %v5569_v33, %s4952_s24 }
 0x275   : > { %v1845_v5 = vpop.permute.xlu1 %1844 }
 0x276   : > { %4576 = vmatprep.mubr.f32.mxu1 %v2588_v9  ;;  %v1843_v6 = vpop.permute.xlu0 %1842  ;;  %v2398_v55 = vsel %vm2374_vm6, %v5493_v11, %v1845_v5 }
 0x277   : > { %2264 = vrot.lane.b32.xlu1 %v5565_v32, %s4953_s1  ;;  %4577 = vmatmul.mubr.f32.gmra.mrb[20].mxu1 %v2589_v10  ;;  %v2397_v56 = vsel %vm2374_vm6, %v5497_v12, %v1843_v6 }
 0x278   : > { %2262 = vrot.lane.b32.xlu0 %v5569_v33, %s4953_s1 }
 0x279   : > { %v2037_v57 = vpop.permute.xlu1 %2036 }
 0x27a   : > { %v2035_v58 = vpop.permute.xlu0 %2034  ;;  %v2462_v47 = vsel %vm1092_vm1, %v2398_v55, %v2037_v57  ;;  %v1696_v57 = vld [vmem:[%s5060_s29 + $0xd0] sm:$0xff]  ;;  %v1697_v55 = vld [vmem:[%s5060_s29 + $0xd8] sm:$0xff] }
 0x27b   : > { %1884 = vrot.lane.b32.xlu1 %v5573_v34, %s4951_s13  ;;  %v2461_v0 = vsel %vm1092_vm1, %v2397_v56, %v2035_v58 }
 0x27c   : > { %1882 = vrot.lane.b32.xlu0 %v5577_v23, %s4951_s13 }
 0x27d   : > { %v2229_v44 = vpop.permute.xlu1 %2228 }
 0x27e   : > { %v2527_v50 = vsel %vm2503_vm7, %v2462_v47, %v2229_v44  ;;  %v2227_v20 = vpop.permute.xlu0 %2226 }
 0x27f   : > { %v2526_v40 = vsel %vm2503_vm7, %v2461_v0, %v2227_v20  ;;  %2076 = vrot.lane.b32.xlu1 %v5573_v34, %s4952_s24  ;;  %v2591_v12 = vmul.f32 %v2527_v50, %v1693_v45 }
 0x280   : > { %v2590_v11 = vmul.f32 %v2526_v40, %v1692_v63  ;;  %2074 = vrot.lane.b32.xlu0 %v5577_v23, %s4952_s24 }
 0x281   : > { %v1849_v3 = vpop.permute.xlu1 %1848 }
 0x282   : > { %4579 = vmatprep.mubr.f32.mxu1 %v2590_v11  ;;  %v1847_v4 = vpop.permute.xlu0 %1846  ;;  %v2400_v41 = vsel %vm2374_vm6, %v5501_v13, %v1849_v3  ;;  %v1698_v3 = vld [vmem:[%s5060_s29 + $0xe0] sm:$0xff] }
 0x283   : > { %2268 = vrot.lane.b32.xlu1 %v5573_v34, %s4953_s1  ;;  %4580 = vmatmul.mubr.f32.gmra.mrb[22].mxu1 %v2591_v12  ;;  %v2399_v42 = vsel %vm2374_vm6, %v5505_v14, %v1847_v4 }
 0x284   : > { %2266 = vrot.lane.b32.xlu0 %v5577_v23, %s4953_s1 }
 0x285   : > { %v2041_v7 = vpop.permute.xlu1 %2040 }
 0x286   : > { %v2039_v8 = vpop.permute.xlu0 %2038  ;;  %v2464_v61 = vsel %vm1092_vm1, %v2400_v41, %v2041_v7  ;;  %v1699_v7 = vld [vmem:[%s5060_s29 + $0xe8] sm:$0xff] }
 0x287   : > { %1888 = vrot.lane.b32.xlu1 %v5581_v35, %s4951_s13  ;;  %v2463_v51 = vsel %vm1092_vm1, %v2399_v42, %v2039_v8 }
 0x288   : > { %1886 = vrot.lane.b32.xlu0 %v5585_v36, %s4951_s13 }
 0x289   : > { %v2233_v62 = vpop.permute.xlu1 %2232 }
 0x28a   : > { %v2529_v48 = vsel %vm2503_vm7, %v2464_v61, %v2233_v62  ;;  %v2231_v59 = vpop.permute.xlu0 %2230 }
 0x28b   : > { %v2528_v60 = vsel %vm2503_vm7, %v2463_v51, %v2231_v59  ;;  %2080 = vrot.lane.b32.xlu1 %v5581_v35, %s4952_s24  ;;  %v2593_v14 = vmul.f32 %v2529_v48, %v1695_v52  ;;  %v6657_v52 = vld [vmem:[#allocation9_spill] sm:$0xff]  ;;  %v6658_v59 = vld [vmem:[#allocation10_spill] sm:$0xff] }
 0x28c   : > { %v2592_v13 = vmul.f32 %v2528_v60, %v1694_v43  ;;  %2078 = vrot.lane.b32.xlu0 %v5585_v36, %s4952_s24 }
 0x28d   : > { %v1853_v1 = vpop.permute.xlu1 %1852 }
 0x28e   : > { %4582 = vmatprep.mubr.f32.mxu1 %v2592_v13  ;;  %v1851_v2 = vpop.permute.xlu0 %1850  ;;  %v2402_v9 = vsel %vm2374_vm6, %v5509_v15, %v1853_v1  ;;  %v1700_v1 = vld [vmem:[%s5060_s29 + $0xf0] sm:$0xff] }
 0x28f   : > { %2272 = vrot.lane.b32.xlu1 %v5581_v35, %s4953_s1  ;;  %4583 = vmatmul.mubr.f32.gmra.mrb[24].mxu1 %v2593_v14  ;;  %v2401_v10 = vsel %vm2374_vm6, %v5513_v16, %v1851_v2 }
 0x290   : > { %2270 = vrot.lane.b32.xlu0 %v5585_v36, %s4953_s1 }
 0x291   : > { %v2045_v54 = vpop.permute.xlu1 %2044 }
 0x292   : > { %v2043_v46 = vpop.permute.xlu0 %2042  ;;  %v2466_v5 = vsel %vm1092_vm1, %v2402_v9, %v2045_v54  ;;  %v1701_v54 = vld [vmem:[%s5060_s29 + $0xf8] sm:$0xff] }
 0x293   : > { %1892 = vrot.lane.b32.xlu1 %v5589_v26, %s4951_s13  ;;  %v2465_v58 = vsel %vm1092_vm1, %v2401_v10, %v2043_v46 }
 0x294   : > { %1890 = vrot.lane.b32.xlu0 %v5593_v37, %s4951_s13 }
 0x295   : > { %v2237_v6 = vpop.permute.xlu1 %2236 }
 0x296   : > { %v2531_v56 = vsel %vm2503_vm7, %v2466_v5, %v2237_v6  ;;  %v2235_v47 = vpop.permute.xlu0 %2234 }
 0x297   : > { %v2530_v44 = vsel %vm2503_vm7, %v2465_v58, %v2235_v47  ;;  %2084 = vrot.lane.b32.xlu1 %v5589_v26, %s4952_s24  ;;  %v2595_v16 = vmul.f32 %v2531_v56, %v1697_v55  ;;  %v6659_v55 = vld [vmem:[#allocation11_spill] sm:$0xff]  ;;  %v6660_v47 = vld [vmem:[#allocation12_spill] sm:$0xff] }
 0x298   : > { %v2594_v15 = vmul.f32 %v2530_v44, %v1696_v57  ;;  %2082 = vrot.lane.b32.xlu0 %v5593_v37, %s4952_s24 }
 0x299   : > { %v1857_v63 = vpop.permute.xlu1 %1856 }
 0x29a   : > { %4585 = vmatprep.mubr.f32.mxu1 %v2594_v15  ;;  %v1855_v0 = vpop.permute.xlu0 %1854  ;;  %v2404_v20 = vsel %vm2374_vm6, %v5517_v17, %v1857_v63  ;;  %v1702_v63 = vld [vmem:[%s5060_s29 + $0x100] sm:$0xff] }
 0x29b   : > { %2276 = vrot.lane.b32.xlu1 %v5589_v26, %s4953_s1  ;;  %4586 = vmatmul.mubr.f32.gmra.mrb[26].mxu1 %v2595_v16  ;;  %v2403_v40 = vsel %vm2374_vm6, %v5521_v18, %v1855_v0 }
 0x29c   : > { %2274 = vrot.lane.b32.xlu0 %v5593_v37, %s4953_s1 }
 0x29d   : > { %v2049_v45 = vpop.permute.xlu1 %2048 }
 0x29e   : > { %v2047_v50 = vpop.permute.xlu0 %2046  ;;  %v2468_v11 = vsel %vm1092_vm1, %v2404_v20, %v2049_v45  ;;  %v1703_v45 = vld [vmem:[%s5060_s29 + $0x108] sm:$0xff] }
 0x29f   : > { %1896 = vrot.lane.b32.xlu1 %v5597_v38, %s4951_s13  ;;  %v2467_v4 = vsel %vm1092_vm1, %v2403_v40, %v2047_v50 }
 0x2a0   : > { %1894 = vrot.lane.b32.xlu0 %v5601_v39, %s4951_s13 }
 0x2a1   : > { %v2241_v12 = vpop.permute.xlu1 %2240 }
 0x2a2   : > { %v2533_v8 = vsel %vm2503_vm7, %v2468_v11, %v2241_v12  ;;  %v2239_v41 = vpop.permute.xlu0 %2238 }
 0x2a3   : > { %v2532_v42 = vsel %vm2503_vm7, %v2467_v4, %v2239_v41  ;;  %2088 = vrot.lane.b32.xlu1 %v5597_v38, %s4952_s24  ;;  %v2597_v18 = vmul.f32 %v2533_v8, %v1699_v7  ;;  %v6661_v7 = vld [vmem:[#allocation13_spill] sm:$0xff]  ;;  %v6662_v41 = vld [vmem:[#allocation14_spill] sm:$0xff] }
 0x2a4   : > { %v2596_v17 = vmul.f32 %v2532_v42, %v1698_v3  ;;  %2086 = vrot.lane.b32.xlu0 %v5601_v39, %s4952_s24 }
 0x2a5   : > { %v1861_v61 = vpop.permute.xlu1 %1860 }
 0x2a6   : > { %4588 = vmatprep.mubr.f32.mxu1 %v2596_v17  ;;  %v1859_v62 = vpop.permute.xlu0 %1858  ;;  %v2406_v48 = vsel %vm2374_vm6, %v5525_v19, %v1861_v61  ;;  %v1704_v61 = vld [vmem:[%s5060_s29 + $0x110] sm:$0xff] }
 0x2a7   : > { %2280 = vrot.lane.b32.xlu1 %v5597_v38, %s4953_s1  ;;  %4589 = vmatmul.mubr.f32.gmra.mrb[28].mxu1 %v2597_v18  ;;  %v2405_v60 = vsel %vm2374_vm6, %v5529_v21, %v1859_v62 }
 0x2a8   : > { %2278 = vrot.lane.b32.xlu0 %v5601_v39, %s4953_s1 }
 0x2a9   : > { %v2053_v43 = vpop.permute.xlu1 %2052 }
 0x2aa   : > { %v2051_v51 = vpop.permute.xlu0 %2050  ;;  %v2470_v13 = vsel %vm1092_vm1, %v2406_v48, %v2053_v43  ;;  %v1705_v43 = vld [vmem:[%s5060_s29 + $0x118] sm:$0xff] }
 0x2ab   : > { %1900 = vrot.lane.b32.xlu1 %v6657_v52, %s4951_s13  ;;  %v2469_v2 = vsel %vm1092_vm1, %v2405_v60, %v2051_v51 }
 0x2ac   : > { %1898 = vrot.lane.b32.xlu0 %v6658_v59, %s4951_s13 }
 0x2ad   : > { %v2245_v14 = vpop.permute.xlu1 %2244 }
 0x2ae   : > { %v2535_v46 = vsel %vm2503_vm7, %v2470_v13, %v2245_v14  ;;  %v2243_v9 = vpop.permute.xlu0 %2242 }
 0x2af   : > { %v2534_v10 = vsel %vm2503_vm7, %v2469_v2, %v2243_v9  ;;  %2092 = vrot.lane.b32.xlu1 %v6657_v52, %s4952_s24  ;;  %v2599_v21 = vmul.f32 %v2535_v46, %v1701_v54  ;;  %v6663_v54 = vld [vmem:[#allocation15_spill] sm:$0xff]  ;;  %v6664_v9 = vld [vmem:[#allocation16_spill] sm:$0xff] }
 0x2b0   : > { %v2598_v19 = vmul.f32 %v2534_v10, %v1700_v1  ;;  %2090 = vrot.lane.b32.xlu0 %v6658_v59, %s4952_s24 }
 0x2b1   : > { %v1865_v5 = vpop.permute.xlu1 %1864 }
 0x2b2   : > { %4591 = vmatprep.mubr.f32.mxu1 %v2598_v19  ;;  %v1863_v6 = vpop.permute.xlu0 %1862  ;;  %v2408_v56 = vsel %vm2374_vm6, %v5533_v22, %v1865_v5  ;;  %v1706_v5 = vld [vmem:[%s5060_s29 + $0x120] sm:$0xff] }
 0x2b3   : > { %2284 = vrot.lane.b32.xlu1 %v6657_v52, %s4953_s1  ;;  %4592 = vmatmul.mubr.f32.gmra.mrb[30].mxu1 %v2599_v21  ;;  %v2407_v44 = vsel %vm2374_vm6, %v5537_v24, %v1863_v6 }
 0x2b4   : > { %2282 = vrot.lane.b32.xlu0 %v6658_v59, %s4953_s1 }
 0x2b5   : > { %v2057_v57 = vpop.permute.xlu1 %2056 }
 0x2b6   : > { %v2055_v58 = vpop.permute.xlu0 %2054  ;;  %v2472_v15 = vsel %vm1092_vm1, %v2408_v56, %v2057_v57  ;;  %v1707_v57 = vld [vmem:[%s5060_s29 + $0x128] sm:$0xff] }
 0x2b7   : > { %1904 = vrot.lane.b32.xlu1 %v6659_v55, %s4951_s13  ;;  %v2471_v0 = vsel %vm1092_vm1, %v2407_v44, %v2055_v58 }
 0x2b8   : > { %1902 = vrot.lane.b32.xlu0 %v6660_v47, %s4951_s13 }
 0x2b9   : > { %v2249_v16 = vpop.permute.xlu1 %2248 }
 0x2ba   : > { %v2537_v50 = vsel %vm2503_vm7, %v2472_v15, %v2249_v16  ;;  %v2247_v20 = vpop.permute.xlu0 %2246 }
 0x2bb   : > { %v2536_v40 = vsel %vm2503_vm7, %v2471_v0, %v2247_v20  ;;  %2096 = vrot.lane.b32.xlu1 %v6659_v55, %s4952_s24  ;;  %v2601_v24 = vmul.f32 %v2537_v50, %v1703_v45 }
 0x2bc   : > { %v2600_v22 = vmul.f32 %v2536_v40, %v1702_v63  ;;  %2094 = vrot.lane.b32.xlu0 %v6660_v47, %s4952_s24  ;;  %v6665_v40 = vld [vmem:[#allocation17_spill] sm:$0xff] }
 0x2bd   : > { %v1869_v11 = vpop.permute.xlu1 %1868 }
 0x2be   : > { %4594 = vmatprep.mubr.f32.mxu1 %v2600_v22  ;;  %v1867_v12 = vpop.permute.xlu0 %1866  ;;  %v2410_v8 = vsel %vm2374_vm6, %v5541_v25, %v1869_v11 }
 0x2bf   : > { %2288 = vrot.lane.b32.xlu1 %v6659_v55, %s4953_s1  ;;  %4595 = vmatmul.mubr.f32.gmra.mrb[32].mxu1 %v2601_v24  ;;  %v2409_v42 = vsel %vm2374_vm6, %v5545_v27, %v1867_v12  ;;  %v6666_v24 = vld [vmem:[#allocation18_spill] sm:$0xff] }
 0x2c0   : > { %2286 = vrot.lane.b32.xlu0 %v6660_v47, %s4953_s1 }
 0x2c1   : > { %v2061_v3 = vpop.permute.xlu1 %2060 }
 0x2c2   : > { %v2059_v4 = vpop.permute.xlu0 %2058  ;;  %v2474_v17 = vsel %vm1092_vm1, %v2410_v8, %v2061_v3 }
 0x2c3   : > { %1908 = vrot.lane.b32.xlu1 %v6661_v7, %s4951_s13  ;;  %v2473_v62 = vsel %vm1092_vm1, %v2409_v42, %v2059_v4  ;;  %v1708_v4 = vld [vmem:[%s5060_s29 + $0x130] sm:$0xff]  ;;  %v1709_v42 = vld [vmem:[%s5060_s29 + $0x138] sm:$0xff] }
 0x2c4   : > { %1906 = vrot.lane.b32.xlu0 %v6662_v41, %s4951_s13 }
 0x2c5   : > { %v2253_v18 = vpop.permute.xlu1 %2252 }
 0x2c6   : > { %v2539_v51 = vsel %vm2503_vm7, %v2474_v17, %v2253_v18  ;;  %v2251_v48 = vpop.permute.xlu0 %2250 }
 0x2c7   : > { %v2538_v60 = vsel %vm2503_vm7, %v2473_v62, %v2251_v48  ;;  %2100 = vrot.lane.b32.xlu1 %v6661_v7, %s4952_s24  ;;  %v2603_v27 = vmul.f32 %v2539_v51, %v1705_v43 }
 0x2c8   : > { %v2602_v25 = vmul.f32 %v2538_v60, %v1704_v61  ;;  %2098 = vrot.lane.b32.xlu0 %v6662_v41, %s4952_s24 }
 0x2c9   : > { %v1873_v13 = vpop.permute.xlu1 %1872 }
 0x2ca   : > { %4597 = vmatprep.mubr.f32.mxu1 %v2602_v25  ;;  %v1871_v14 = vpop.permute.xlu0 %1870  ;;  %v2412_v46 = vsel %vm2374_vm6, %v5549_v28, %v1873_v13  ;;  %v6667_v13 = vld [vmem:[#allocation19_spill] sm:$0xff] }
 0x2cb   : > { %2292 = vrot.lane.b32.xlu1 %v6661_v7, %s4953_s1  ;;  %4598 = vmatmul.mubr.f32.gmra.mrb[34].mxu1 %v2603_v27  ;;  %v2411_v10 = vsel %vm2374_vm6, %v5553_v29, %v1871_v14 }
 0x2cc   : > { %2290 = vrot.lane.b32.xlu0 %v6662_v41, %s4953_s1 }
 0x2cd   : > { %v2065_v1 = vpop.permute.xlu1 %2064 }
 0x2ce   : > { %v2063_v2 = vpop.permute.xlu0 %2062  ;;  %v2476_v19 = vsel %vm1092_vm1, %v2412_v46, %v2065_v1  ;;  %v6668_v1 = vld [vmem:[#allocation20_spill] sm:$0xff] }
 0x2cf   : > { %1912 = vrot.lane.b32.xlu1 %v6663_v54, %s4951_s13  ;;  %v2475_v6 = vsel %vm1092_vm1, %v2411_v10, %v2063_v2 }
 0x2d0   : > { %1910 = vrot.lane.b32.xlu0 %v6664_v9, %s4951_s13 }
 0x2d1   : > { %v2257_v21 = vpop.permute.xlu1 %2256 }
 0x2d2   : > { %v2541_v58 = vsel %vm2503_vm7, %v2476_v19, %v2257_v21  ;;  %v6062_v56 = vpop.f32.mrb[0].mxu1  ;;  %v2255_v44 = vpop.permute.xlu0 %2254  ;;  %v1710_v19 = vld [vmem:[%s5060_s29 + $0x140] sm:$0xff] }
 0x2d3   : > { %v2540_v28 = vsel %vm2503_vm7, %v2475_v6, %v2255_v44  ;;  %2104 = vrot.lane.b32.xlu1 %v6663_v54, %s4952_s24  ;;  %v6067_v15 = vpop.f32.mrb[1].mxu1  ;;  %v2605_v63 = vmul.f32 %v2541_v58, %v1707_v57 }
 0x2d4   : > { %v2604_v29 = vmul.f32 %v2540_v28, %v1706_v5  ;;  %v4752_v16 = vpack.c.bf16 %v6062_v56, %v6067_v15  ;;  %2102 = vrot.lane.b32.xlu0 %v6664_v9, %s4952_s24  ;;  %v1711_v5 = vld [vmem:[%s5060_s29 + $0x148] sm:$0xff] }
 0x2d5   : > { %v1877_v0 = vpop.permute.xlu1 %1876 }
 0x2d6   : > { %4600 = vmatprep.mubr.f32.mxu1 %v2604_v29  ;;  %v1875_v45 = vpop.permute.xlu0 %1874  ;;  %v2414_v22 = vsel %vm2374_vm6, %v5557_v30, %v1877_v0 }
 0x2d7   : > { %2296 = vrot.lane.b32.xlu1 %v6663_v54, %s4953_s1  ;;  %4601 = vmatmul.mubr.f32.gmra.mrb[36].mxu1 %v2605_v63  ;;  %v2413_v11 = vsel %vm2374_vm6, %v5561_v31, %v1875_v45 }
 0x2d8   : > { %2294 = vrot.lane.b32.xlu0 %v6664_v9, %s4953_s1 }
 0x2d9   : > { %v2069_v50 = vpop.permute.xlu1 %2068 }
 0x2da   : > { %v2067_v20 = vpop.permute.xlu0 %2066  ;;  %v2478_v12 = vsel %vm1092_vm1, %v2414_v22, %v2069_v50 }
 0x2db   : > { %1916 = vrot.lane.b32.xlu1 %v6665_v40, %s4951_s13  ;;  %v2477_v8 = vsel %vm1092_vm1, %v2413_v11, %v2067_v20 }
 0x2dc   : > { %1914 = vrot.lane.b32.xlu0 %v6666_v24, %s4951_s13 }
 0x2dd   : > { %v2261_v3 = vpop.permute.xlu1 %2260 }
 0x2de   : > { %v2543_v17 = vsel %vm2503_vm7, %v2478_v12, %v2261_v3  ;;  %v6090_v18 = vpop.f32.mrb[2].mxu1  ;;  %v2259_v61 = vpop.permute.xlu0 %2258  ;;  %v1712_v3 = vld [vmem:[%s5060_s29 + $0x150] sm:$0xff] }
 0x2df   : > { %v2542_v30 = vsel %vm2503_vm7, %v2477_v8, %v2259_v61  ;;  %2108 = vrot.lane.b32.xlu1 %v6665_v40, %s4952_s24  ;;  %v6095_v62 = vpop.f32.mrb[3].mxu1  ;;  %v2607_v51 = vmul.f32 %v2543_v17, %v1709_v42  ;;  %v1713_v8 = vld [vmem:[%s5060_s29 + $0x158] sm:$0xff] }
 0x2e0   : > { %v2606_v31 = vmul.f32 %v2542_v30, %v1708_v4  ;;  %v4756_v43 = vpack.c.bf16 %v6090_v18, %v6095_v62  ;;  %2106 = vrot.lane.b32.xlu0 %v6666_v24, %s4952_s24 }
 0x2e1   : > { %v1881_v48 = vpop.permute.xlu1 %1880 }
 0x2e2   : > { %4603 = vmatprep.mubr.f32.mxu1 %v2606_v31  ;;  %v1879_v60 = vpop.permute.xlu0 %1878  ;;  %v2416_v14 = vsel %vm2374_vm6, %v5565_v32, %v1881_v48 }
 0x2e3   : > { %2300 = vrot.lane.b32.xlu1 %v6665_v40, %s4953_s1  ;;  %4604 = vmatmul.mubr.f32.gmra.mrb[38].mxu1 %v2607_v51  ;;  %v2415_v2 = vsel %vm2374_vm6, %v5569_v33, %v1879_v60 }
 0x2e4   : > { %2298 = vrot.lane.b32.xlu0 %v6666_v24, %s4953_s1 }
 0x2e5   : > { %v2073_v25 = vpop.permute.xlu1 %2072 }
 0x2e6   : > { %v2071_v27 = vpop.permute.xlu0 %2070  ;;  %v2480_v46 = vsel %vm1092_vm1, %v2416_v14, %v2073_v25 }
 0x2e7   : > { %1920 = vrot.lane.b32.xlu1 %v6667_v13, %s4951_s13  ;;  %v2479_v21 = vsel %vm1092_vm1, %v2415_v2, %v2071_v27 }
 0x2e8   : > { %1918 = vrot.lane.b32.xlu0 %v6668_v1, %s4951_s13 }
 0x2e9   : > { %v2265_v10 = vpop.permute.xlu1 %2264 }
 0x2ea   : > { %v2545_v6 = vsel %vm2503_vm7, %v2480_v46, %v2265_v10  ;;  %v6118_v57 = vpop.f32.mrb[4].mxu1  ;;  %v2263_v58 = vpop.permute.xlu0 %2262 }
 0x2eb   : > { %v2544_v32 = vsel %vm2503_vm7, %v2479_v21, %v2263_v58  ;;  %2112 = vrot.lane.b32.xlu1 %v6667_v13, %s4952_s24  ;;  %v6123_v44 = vpop.f32.mrb[5].mxu1  ;;  %v2609_v29 = vmul.f32 %v2545_v6, %v1711_v5  ;;  %v1715_v5 = vld [vmem:[%s5060_s29 + $0x168] sm:$0xff] }
 0x2ec   : > { %v2608_v33 = vmul.f32 %v2544_v32, %v1710_v19  ;;  %v4760_v28 = vpack.c.bf16 %v6118_v57, %v6123_v44  ;;  %2110 = vrot.lane.b32.xlu0 %v6668_v1, %s4952_s24  ;;  %v1714_v19 = vld [vmem:[%s5060_s29 + $0x160] sm:$0xff] }
 0x2ed   : > { %v1885_v63 = vpop.permute.xlu1 %1884 }
 0x2ee   : > { %4606 = vmatprep.mubr.f32.mxu1 %v2608_v33  ;;  %v1883_v0 = vpop.permute.xlu0 %1882  ;;  %v2418_v20 = vsel %vm2374_vm6, %v5573_v34, %v1885_v63 }
 0x2ef   : > { %2304 = vrot.lane.b32.xlu1 %v6667_v13, %s4953_s1  ;;  %4607 = vmatmul.mubr.f32.gmra.mrb[40].mxu1 %v2609_v29  ;;  %v2417_v22 = vsel %vm2374_vm6, %v5577_v23, %v1883_v0 }
 0x2f0   : > { %2302 = vrot.lane.b32.xlu0 %v6668_v1, %s4953_s1 }
 0x2f1   : > { %v2077_v45 = vpop.permute.xlu1 %2076 }
 0x2f2   : > { %v2075_v50 = vpop.permute.xlu0 %2074  ;;  %v2482_v11 = vsel %vm1092_vm1, %v2418_v20, %v2077_v45 }
 0x2f3   : > { %1924 = vrot.lane.b32.xlu1 %v5662_v49, %s4951_s13  ;;  %v2481_v4 = vsel %vm1092_vm1, %v2417_v22, %v2075_v50 }
 0x2f4   : > { %1922 = vrot.lane.b32.xlu0 %v5666_v53, %s4951_s13 }
 0x2f5   : > { %v2269_v12 = vpop.permute.xlu1 %2268 }
 0x2f6   : > { %v2547_v42 = vsel %vm2503_vm7, %v2482_v11, %v2269_v12  ;;  %v6146_v17 = vpop.f32.mrb[6].mxu1  ;;  %v2267_v61 = vpop.permute.xlu0 %2266 }
 0x2f7   : > { %v2546_v34 = vsel %vm2503_vm7, %v2481_v4, %v2267_v61  ;;  %2116 = vrot.lane.b32.xlu1 %v5662_v49, %s4952_s24  ;;  %v6151_v30 = vpop.f32.mrb[7].mxu1  ;;  %v2611_v51 = vmul.f32 %v2547_v42, %v1713_v8  ;;  %v1716_v4 = vld [vmem:[%s5060_s29 + $0x170] sm:$0xff]  ;;  %v1717_v42 = vld [vmem:[%s5060_s29 + $0x178] sm:$0xff] }
 0x2f8   : > { %v2610_v23 = vmul.f32 %v2546_v34, %v1712_v3  ;;  %v4764_v31 = vpack.c.bf16 %v6146_v17, %v6151_v30  ;;  %2114 = vrot.lane.b32.xlu0 %v5666_v53, %s4952_s24 }
 0x2f9   : > { %v1889_v48 = vpop.permute.xlu1 %1888 }
 0x2fa   : > { %4609 = vmatprep.mubr.f32.mxu1 %v2610_v23  ;;  %v1887_v60 = vpop.permute.xlu0 %1886  ;;  %v2420_v14 = vsel %vm2374_vm6, %v5581_v35, %v1889_v48 }
 0x2fb   : > { %2308 = vrot.lane.b32.xlu1 %v5662_v49, %s4953_s1  ;;  %4610 = vmatmul.mubr.f32.gmra.mrb[42].mxu1 %v2611_v51  ;;  %v2419_v2 = vsel %vm2374_vm6, %v5585_v36, %v1887_v60 }
 0x2fc   : > { %2306 = vrot.lane.b32.xlu0 %v5666_v53, %s4953_s1 }
 0x2fd   : > { %v2081_v25 = vpop.permute.xlu1 %2080 }
 0x2fe   : > { %v2079_v27 = vpop.permute.xlu0 %2078  ;;  %v2484_v46 = vsel %vm1092_vm1, %v2420_v14, %v2081_v25 }
 0x2ff   : > { %v2483_v21 = vsel %vm1092_vm1, %v2419_v2, %v2079_v27 }
 0x301   : > { %v2273_v10 = vpop.permute.xlu1 %2272 }
 0x302   : > { %v2549_v6 = vsel %vm2503_vm7, %v2484_v46, %v2273_v10  ;;  %v6170_v58 = vpop.f32.mrb[8].mxu1  ;;  %v2271_v32 = vpop.permute.xlu0 %2270 }
 0x303   : > { %v2548_v33 = vsel %vm2503_vm7, %v2483_v21, %v2271_v32  ;;  %v6173_v29 = vpop.f32.mrb[9].mxu1  ;;  %v2613_v63 = vmul.f32 %v2549_v6, %v1715_v5  ;;  %v1718_v5 = vld [vmem:[%s5060_s29 + $0x180] sm:$0xff]  ;;  %v1719_v32 = vld [vmem:[%s5060_s29 + $0x188] sm:$0xff] }
 0x304   : > { %v2612_v35 = vmul.f32 %v2548_v33, %v1714_v19  ;;  %v4768_v36 = vpack.c.bf16 %v6170_v58, %v6173_v29 }
 0x305   : > { %v1893_v0 = vpop.permute.xlu1 %1892 }
 0x306   : > { %4612 = vmatprep.mubr.f32.mxu1 %v2612_v35  ;;  %v1891_v45 = vpop.permute.xlu0 %1890  ;;  %v2422_v22 = vsel %vm2374_vm6, %v5589_v26, %v1893_v0 }
 0x307   : > { %4613 = vmatmul.mubr.f32.gmra.mrb[44].mxu1 %v2613_v63  ;;  %v2421_v11 = vsel %vm2374_vm6, %v5593_v37, %v1891_v45 }
 0x309   : > { %v2085_v50 = vpop.permute.xlu1 %2084 }
 0x30a   : > { %v2083_v20 = vpop.permute.xlu0 %2082  ;;  %v2486_v12 = vsel %vm1092_vm1, %v2422_v22, %v2085_v50 }
 0x30b   : > { %v2485_v8 = vsel %vm1092_vm1, %v2421_v11, %v2083_v20 }
 0x30d   : > { %v2277_v3 = vpop.permute.xlu1 %2276 }
 0x30e   : > { %v2551_v61 = vsel %vm2503_vm7, %v2486_v12, %v2277_v3  ;;  %v6186_v34 = vpop.f32.mrb[10].mxu1  ;;  %v2275_v23 = vpop.permute.xlu0 %2274 }
 0x30f   : > { %v2550_v51 = vsel %vm2503_vm7, %v2485_v8, %v2275_v23  ;;  %v6189_v48 = vpop.f32.mrb[11].mxu1  ;;  %v2615_v60 = vmul.f32 %v2551_v61, %v1717_v42  ;;  %v1720_v61 = vld [vmem:[%s5060_s29 + $0x190] sm:$0xff] }
 0x310   : > { %v2614_v26 = vmul.f32 %v2550_v51, %v1716_v4  ;;  %v4772_v37 = vpack.c.bf16 %v6186_v34, %v6189_v48  ;;  %v1721_v51 = vld [vmem:[%s5060_s29 + $0x198] sm:$0xff] }
 0x311   : > { %v1897_v25 = vpop.permute.xlu1 %1896 }
 0x312   : > { %4615 = vmatprep.mubr.f32.mxu1 %v2614_v26  ;;  %v1895_v27 = vpop.permute.xlu0 %1894  ;;  %v2424_v46 = vsel %vm2374_vm6, %v5597_v38, %v1897_v25 }
 0x313   : > { %4616 = vmatmul.mubr.f32.gmra.mrb[46].mxu1 %v2615_v60  ;;  %v2423_v10 = vsel %vm2374_vm6, %v5601_v39, %v1895_v27 }
 0x315   : > { %v2089_v14 = vpop.permute.xlu1 %2088 }
 0x316   : > { %v2087_v2 = vpop.permute.xlu0 %2086  ;;  %v2488_v19 = vsel %vm1092_vm1, %v2424_v46, %v2089_v14 }
 0x317   : > { %v2487_v6 = vsel %vm1092_vm1, %v2423_v10, %v2087_v2 }
 0x319   : > { %v2281_v21 = vpop.permute.xlu1 %2280 }
 0x31a   : > { %v2553_v33 = vsel %vm2503_vm7, %v2488_v19, %v2281_v21  ;;  %v6202_v35 = vpop.f32.mrb[12].mxu1  ;;  %v2279_v63 = vpop.permute.xlu0 %2278 }
 0x31b   : > { %v2552_v0 = vsel %vm2503_vm7, %v2487_v6, %v2279_v63  ;;  %v6205_v45 = vpop.f32.mrb[13].mxu1  ;;  %v2617_v50 = vmul.f32 %v2553_v33, %v1719_v32  ;;  %v1722_v63 = vld [vmem:[%s5060_s29 + $0x1a0] sm:$0xff] }
 0x31c   : > { %v2616_v38 = vmul.f32 %v2552_v0, %v1718_v5  ;;  %v4776_v39 = vpack.c.bf16 %v6202_v35, %v6205_v45 }
 0x31d   : > { %v1901_v20 = vpop.permute.xlu1 %1900 }
 0x31e   : > { %4618 = vmatprep.mubr.f32.mxu1 %v2616_v38  ;;  %v1899_v22 = vpop.permute.xlu0 %1898  ;;  %v2426_v3 = vsel %vm2374_vm6, %v6657_v52, %v1901_v20  ;;  %v1723_v38 = vld [vmem:[%s5060_s29 + $0x1a8] sm:$0xff] }
 0x31f   : > { %4619 = vmatmul.mubr.f32.gmra.mrb[48].mxu1 %v2617_v50  ;;  %v2425_v4 = vsel %vm2374_vm6, %v6658_v59, %v1899_v22 }
 0x321   : > { %v2093_v11 = vpop.permute.xlu1 %2092 }
 0x322   : > { %v2091_v12 = vpop.permute.xlu0 %2090  ;;  %v2490_v8 = vsel %vm1092_vm1, %v2426_v3, %v2093_v11 }
 0x323   : > { %v2489_v23 = vsel %vm1092_vm1, %v2425_v4, %v2091_v12 }
 0x325   : > { %v2285_v42 = vpop.permute.xlu1 %2284 }
 0x326   : > { %v2555_v26 = vsel %vm2503_vm7, %v2490_v8, %v2285_v42  ;;  %v6218_v60 = vpop.f32.mrb[14].mxu1  ;;  %v2283_v25 = vpop.permute.xlu0 %2282 }
 0x327   : > { %v2554_v27 = vsel %vm2503_vm7, %v2489_v23, %v2283_v25  ;;  %v6221_v14 = vpop.f32.mrb[15].mxu1  ;;  %v2619_v2 = vmul.f32 %v2555_v26, %v1721_v51 }
 0x328   : > { %v2618_v52 = vmul.f32 %v2554_v27, %v1720_v61  ;;  %v4780_v59 = vpack.c.bf16 %v6218_v60, %v6221_v14  ;;  %v1724_v27 = vld [vmem:[%s5060_s29 + $0x1b0] sm:$0xff] }
 0x329   : > { %v1905_v46 = vpop.permute.xlu1 %1904 }
 0x32a   : > { %4621 = vmatprep.mubr.f32.mxu1 %v2618_v52  ;;  %v1903_v10 = vpop.permute.xlu0 %1902  ;;  %v2428_v5 = vsel %vm2374_vm6, %v6659_v55, %v1905_v46 }
 0x32b   : > { %4622 = vmatmul.mubr.f32.gmra.mrb[50].mxu1 %v2619_v2  ;;  %v2427_v6 = vsel %vm2374_vm6, %v6660_v47, %v1903_v10  ;;  %v1725_v2 = vld [vmem:[%s5060_s29 + $0x1b8] sm:$0xff] }
 0x32d   : > { %v2097_v19 = vpop.permute.xlu1 %2096 }
 0x32e   : > { %v2095_v21 = vpop.permute.xlu0 %2094  ;;  %v2492_v32 = vsel %vm1092_vm1, %v2428_v5, %v2097_v19 }
 0x32f   : > { %v2491_v0 = vsel %vm1092_vm1, %v2427_v6, %v2095_v21 }
 0x331   : > { %v2289_v33 = vpop.permute.xlu1 %2288 }
 0x332   : > { %v2557_v50 = vsel %vm2503_vm7, %v2492_v32, %v2289_v33  ;;  %v4572_v20 = vpop.f32.mrb[16].mxu1  ;;  %v2287_v22 = vpop.permute.xlu0 %2286 }
 0x333   : > { %v2556_v11 = vsel %vm2503_vm7, %v2491_v0, %v2287_v22  ;;  %v2794_v12 = vpop.f32.mrb[17].mxu1  ;;  %v2621_v4 = vmul.f32 %v2557_v50, %v1723_v38  ;;  %v1726_v50 = vld [vmem:[%s5060_s29 + $0x1c0] sm:$0xff]  ;;  %v1727_v22 = vld [vmem:[%s5060_s29 + $0x1c8] sm:$0xff] }
 0x334   : > { %v2620_v3 = vmul.f32 %v2556_v11, %v1722_v63  ;;  %v4750_v55 = vpack.c.bf16 %v4572_v20, %v2794_v12 }
 0x335   : > { %v1909_v47 = vpop.permute.xlu1 %1908 }
 0x336   : > { %4624 = vmatprep.mubr.f32.mxu1 %v2620_v3  ;;  %4751 = vmatprep.subr.bf16.mxu0 %v4750_v55  ;;  %v1907_v8 = vpop.permute.xlu0 %1906  ;;  %v2430_v23 = vsel %vm2374_vm6, %v6661_v7, %v1909_v47 }
 0x337   : > { %4625 = vmatmul.mubr.f32.gmra.mrb[52].mxu1 %v2621_v4  ;;  %4753 = vmatpush3.bf16.msra.mxu0 %v4752_v16  ;;  %v2429_v51 = vsel %vm2374_vm6, %v6662_v41, %v1907_v8 }
 0x339   : > { %v2101_v42 = vpop.permute.xlu1 %2100 }
 0x33a   : > { %v2099_v61 = vpop.permute.xlu0 %2098  ;;  %v2494_v26 = vsel %vm1092_vm1, %v2430_v23, %v2101_v42 }
 0x33b   : > { %v2493_v52 = vsel %vm1092_vm1, %v2429_v51, %v2099_v61 }
 0x33d   : > { %v2293_v25 = vpop.permute.xlu1 %2292 }
 0x33e   : > { %v2559_v46 = vsel %vm2503_vm7, %v2494_v26, %v2293_v25  ;;  %v4575_v10 = vpop.f32.mrb[18].mxu1  ;;  %v2291_v56 = vpop.permute.xlu0 %2290  ;;  %v1728_v26 = vld [vmem:[%s5060_s29 + $0x1d0] sm:$0xff] }
 0x33f   : > { %v2558_v15 = vsel %vm2503_vm7, %v2493_v52, %v2291_v56  ;;  %v2804_v16 = vpop.f32.mrb[19].mxu1  ;;  %v2623_v21 = vmul.f32 %v2559_v46, %v1725_v2 }
 0x340   : > { %v2622_v19 = vmul.f32 %v2558_v15, %v1724_v27  ;;  %v4754_v7 = vpack.c.bf16 %v4575_v10, %v2804_v16  ;;  %v1729_v27 = vld [vmem:[%s5060_s29 + $0x1d8] sm:$0xff] }
 0x341   : > { %v1913_v41 = vpop.permute.xlu1 %1912 }
 0x342   : > { %4627 = vmatprep.mubr.f32.mxu1 %v2622_v19  ;;  %4755 = vmatprep.subr.bf16.mxu0 %v4754_v7  ;;  %v1911_v5 = vpop.permute.xlu0 %1910  ;;  %v2432_v33 = vsel %vm2374_vm6, %v6663_v54, %v1913_v41 }
 0x343   : > { %4628 = vmatmul.mubr.f32.gmra.mrb[54].mxu1 %v2623_v21  ;;  %4757 = vmatpush3.bf16.msra.mxu0 %v4756_v43  ;;  %v2431_v63 = vsel %vm2374_vm6, %v6664_v9, %v1911_v5  ;;  %v1730_v5 = vld [vmem:[%s5060_s29 + $0x1e0] sm:$0xff] }
 0x345   : > { %v2105_v6 = vpop.permute.xlu1 %2104 }
 0x346   : > { %v2103_v32 = vpop.permute.xlu0 %2102  ;;  %v2496_v0 = vsel %vm1092_vm1, %v2432_v33, %v2105_v6 }
 0x347   : > { %v2495_v20 = vsel %vm1092_vm1, %v2431_v63, %v2103_v32  ;;  %v1731_v32 = vld [vmem:[%s5060_s29 + $0x1e8] sm:$0xff] }
 0x349   : > { %v2297_v38 = vpop.permute.xlu1 %2296 }
 0x34a   : > { %v2561_v11 = vsel %vm2503_vm7, %v2496_v0, %v2297_v38  ;;  %v4578_v12 = vpop.f32.mrb[20].mxu1  ;;  %v2295_v18 = vpop.permute.xlu0 %2294 }
 0x34b   : > { %v2560_v62 = vsel %vm2503_vm7, %v2495_v20, %v2295_v18  ;;  %v2814_v43 = vpop.f32.mrb[21].mxu1  ;;  %v2625_v55 = vmul.f32 %v2561_v11, %v1727_v22 }
 0x34c   : > { %v2624_v3 = vmul.f32 %v2560_v62, %v1726_v50  ;;  %v4758_v54 = vpack.c.bf16 %v4578_v12, %v2814_v43  ;;  %v1732_v43 = vld [vmem:[%s5060_s29 + $0x1f0] sm:$0xff] }
 0x34d   : > { %v1917_v9 = vpop.permute.xlu1 %1916 }
 0x34e   : > { %4630 = vmatprep.mubr.f32.mxu1 %v2624_v3  ;;  %4759 = vmatprep.subr.bf16.mxu0 %v4758_v54  ;;  %v1915_v4 = vpop.permute.xlu0 %1914  ;;  %v2434_v42 = vsel %vm2374_vm6, %v6665_v40, %v1917_v9  ;;  %v1733_v54 = vld [vmem:[%s5060_s29 + $0x1f8] sm:$0xff]  ;;  %s6670_s29 = scalar_lea.vmem %s6611_s3, %s6685_s25 }
 0x34f   : > { %4631 = vmatmul.mubr.f32.gmra.mrb[56].mxu1 %v2625_v55  ;;  %4761 = vmatpush3.bf16.msra.mxu0 %v4760_v28  ;;  %v2433_v61 = vsel %vm2374_vm6, %v6666_v24, %v1915_v4  ;;  %v6669_v4 = vlaneseq }
 0x351   : > { %v2109_v47 = vpop.permute.xlu1 %2108 }
 0x352   : > { %v2107_v8 = vpop.permute.xlu0 %2106  ;;  %v2498_v23 = vsel %vm1092_vm1, %v2434_v42, %v2109_v47 }
 0x353   : > { %v2497_v25 = vsel %vm1092_vm1, %v2433_v61, %v2107_v8  ;;  %v6309_v61 = vld [vmem:[%s6670_s29] sm:$0xf] }
 0x355   : > { %v2301_v51 = vpop.permute.xlu1 %2300 }
 0x356   : > { %v2563_v52 = vsel %vm2503_vm7, %v2498_v23, %v2301_v51  ;;  %v4581_v2 = vpop.f32.mrb[22].mxu1  ;;  %v2299_v57 = vpop.permute.xlu0 %2298  ;;  %v4954_v51 = vmov 1.0  }
 0x357   : > { %v2562_v44 = vsel %vm2503_vm7, %v2497_v25, %v2299_v57  ;;  %v2824_v28 = vpop.f32.mrb[23].mxu1  ;;  %v2627_v10 = vmul.f32 %v2563_v52, %v1729_v27 }
 0x358   : > { %v2626_v46 = vmul.f32 %v2562_v44, %v1728_v26  ;;  %v4762_v40 = vpack.c.bf16 %v4581_v2, %v2824_v28 }
 0x359   : > { %v1921_v24 = vpop.permute.xlu1 %1920 }
 0x35a   : > { %4633 = vmatprep.mubr.f32.mxu1 %v2626_v46  ;;  %4763 = vmatprep.subr.bf16.mxu0 %v4762_v40  ;;  %v1919_v56 = vpop.permute.xlu0 %1918  ;;  %v2436_v19 = vsel %vm2374_vm6, %v6667_v13, %v1921_v24 }
 0x35b   : > { %4634 = vmatmul.mubr.f32.gmra.mrb[58].mxu1 %v2627_v10  ;;  %4765 = vmatpush3.bf16.msra.mxu0 %v4764_v31  ;;  %v2435_v7 = vsel %vm2374_vm6, %v6668_v1, %v1919_v56 }
 0x35d   : > { %v2113_v15 = vpop.permute.xlu1 %2112 }
 0x35e   : > { %v2111_v16 = vpop.permute.xlu0 %2110  ;;  %v2500_v21 = vsel %vm1092_vm1, %v2436_v19, %v2113_v15 }
 0x35f   : > { %v2499_v6 = vsel %vm1092_vm1, %v2435_v7, %v2111_v16 }
 0x361   : > { %v2305_v41 = vpop.permute.xlu1 %2304 }
 0x362   : > { %v2565_v33 = vsel %vm2503_vm7, %v2500_v21, %v2305_v41  ;;  %v4584_v63 = vpop.f32.mrb[24].mxu1  ;;  %v2303_v17 = vpop.permute.xlu0 %2302 }
 0x363   : > { %v2564_v30 = vsel %vm2503_vm7, %v2499_v6, %v2303_v17  ;;  %v2834_v31 = vpop.f32.mrb[25].mxu1  ;;  %v2629_v38 = vmul.f32 %v2565_v33, %v1731_v32 }
 0x364   : > { %v2628_v0 = vmul.f32 %v2564_v30, %v1730_v5  ;;  %v4766_v13 = vpack.c.bf16 %v4584_v63, %v2834_v31 }
 0x365   : > { %v1925_v1 = vpop.permute.xlu1 %1924 }
 0x366   : > { %4636 = vmatprep.mubr.f32.mxu1 %v2628_v0  ;;  %4767 = vmatprep.subr.bf16.mxu0 %v4766_v13  ;;  %v1923_v50 = vpop.permute.xlu0 %1922  ;;  %v2438_v11 = vsel %vm2374_vm6, %v5662_v49, %v1925_v1  ;;  %v6301_v49 = vshrl.u32 %v6669_v4, 7 }
 0x367   : > { %4637 = vmatmul.mubr.f32.gmra.mrb[60].mxu1 %v2629_v38  ;;  %4769 = vmatpush3.bf16.msra.mxu0 %v4768_v36  ;;  %v2437_v12 = vsel %vm2374_vm6, %v5666_v53, %v1923_v50 }
 0x368   : > { %v978_v42 = vsub.s32 1, %v6301_v49  ;;  %v974_v34 = vsub.s32 0, %v6301_v49  ;;  %v6337_v24 = vadd.s32 8, %v6301_v49  ;;  %v6345_v60 = vadd.s32 16, %v6301_v49 }
 0x369   : > { %v2117_v20 = vpop.permute.xlu1 %2116  ;;  %v6363_v16 = vadd.s32 32, %v6301_v49  ;;  %v6371_v19 = vadd.s32 40, %v6301_v49  ;;  %v6379_v21 = vadd.s32 48, %v6301_v49  ;;  %v6389_v6 = vadd.s32 56, %v6301_v49 }
 0x36a   : > { %v2115_v22 = vpop.permute.xlu0 %2114  ;;  %v2502_v18 = vsel %vm1092_vm1, %v2438_v11, %v2117_v20  ;;  %v6315_v23 = vrot.slane %v6309_v61, %v978_v42  ;;  %v975_v52 = vrot.slane %v6309_v61, %v974_v34  ;;  %v986_v32 = vsub.s32 3, %v6301_v49 }
 0x36b   : > { %v2501_v3 = vsel %vm1092_vm1, %v2437_v12, %v2115_v22 }
 0x36c   : > { %vm989_vm1 = vcmp.eq.s32.totalorder %v6315_v23, %v6301_v49  ;;  %vm988_vm8 = vcmp.eq.s32.totalorder %v975_v52, %v6301_v49  ;;  %vm993_vm9 = vcmp.eq.s32.totalorder %v6315_v23, %v6337_v24  ;;  %vm992_vm10 = vcmp.eq.s32.totalorder %v975_v52, %v6337_v24 }
 0x36d   : > { %v2309_v62 = vpop.permute.xlu1 %2308  ;;  %4036 = vmatprep.mubr.msk.f32.mxu0 %vm989_vm1, %v4954_v51  ;;  %vm997_vm11 = vcmp.eq.s32.totalorder %v6315_v23, %v6345_v60  ;;  %vm996_vm12 = vcmp.eq.s32.totalorder %v975_v52, %v6345_v60  ;;  %vm1005_vm15 = vcmp.eq.s32.totalorder %v6315_v23, %v6363_v16  ;;  %vm1004_vm0 = vcmp.eq.s32.totalorder %v975_v52, %v6363_v16 }
 0x36e   : > { %v2567_v55 = vsel %vm2503_vm7, %v2502_v18, %v2309_v62  ;;  %v4587_v58 = vpop.f32.mrb[26].mxu1  ;;  %v2307_v29 = vpop.permute.xlu0 %2306  ;;  %vm1009_vm2 = vcmp.eq.s32.totalorder %v6315_v23, %v6371_v19  ;;  %vm1008_vm3 = vcmp.eq.s32.totalorder %v975_v52, %v6371_v19  ;;  %vm1013_vm4 = vcmp.eq.s32.totalorder %v6315_v23, %v6379_v21 }
 0x36f   : > { %v2566_v36 = vsel %vm2503_vm7, %v2501_v3, %v2307_v29  ;;  %v2844_v9 = vpop.f32.mrb[27].mxu1  ;;  %v2631_v8 = vmul.f32 %v2567_v55, %v1733_v54  ;;  %vm1012_vm5 = vcmp.eq.s32.totalorder %v975_v52, %v6379_v21  ;;  %vm1017_vm7 = vcmp.eq.s32.totalorder %v6315_v23, %v6389_v6 }
 0x370   : > { %v2630_v47 = vmul.f32 %v2566_v36, %v1732_v43  ;;  %v4770_v53 = vpack.c.bf16 %v4587_v58, %v2844_v9  ;;  %vm1016_vm1 = vcmp.eq.s32.totalorder %v975_v52, %v6389_v6  ;;  %v6398_v33 = vrot.slane %v6309_v61, %v986_v32 }
 0x372   : > { %4639 = vmatprep.mubr.f32.mxu1 %v2630_v47  ;;  %4771 = vmatprep.subr.bf16.mxu0 %v4770_v53 }
 0x373   : > { %4640 = vmatmul.mubr.f32.gmra.mrb[62].mxu1 %v2631_v8  ;;  %4773 = vmatpush3.bf16.msra.mxu0 %v4772_v37 }
 0x37a   : > { %v4590_v26 = vpop.f32.mrb[28].mxu1 }
 0x37b   : > { %v2854_v25 = vpop.f32.mrb[29].mxu1 }
 0x37c   : > { %v4774_v27 = vpack.c.bf16 %v4590_v26, %v2854_v25  ;;  %v982_v25 = vsub.s32 2, %v6301_v49 }
 0x37e   : > { %4775 = vmatprep.subr.bf16.mxu0 %v4774_v27 }
 0x37f   : > { %4777 = vmatpush3.bf16.msra.mxu0 %v4776_v39 }
 0x386   : > { %v4593_v48 = vpop.f32.mrb[30].mxu1 }
 0x387   : > { %v2864_v37 = vpop.f32.mrb[31].mxu1 }
 0x388   : > { %v4778_v2 = vpack.c.bf16 %v4593_v48, %v2864_v37  ;;  %v983_v48 = vrot.slane %v6309_v61, %v982_v25 }
 0x38a   : > { %4779 = vmatprep.subr.bf16.mxu0 %v4778_v2 }
 0x38b   : > { %4781 = vmatpush3.bf16.msra.mxu0 %v4780_v59  ;;  %v6353_v59 = vadd.s32 24, %v6301_v49 }
 0x38d   : > { %vm1001_vm13 = vcmp.eq.s32.totalorder %v6315_v23, %v6353_v59  ;;  %vm1000_vm14 = vcmp.eq.s32.totalorder %v975_v52, %v6353_v59 }
 0x38e   : > { %4037 = vmatmul.mubr.msk.f32.vlgmr.msra.gmra.mrb[64].mxu0 %vm988_vm8, %v4954_v51  ;;  %vm991_vm8 = vcmp.eq.s32.totalorder %v6398_v33, %v6301_v49 }
 0x38f   : > { %4038 = vmatprep.mubr.msk.f32.mxu0 %vm993_vm9, %v4954_v51  ;;  %vm999_vm9 = vcmp.eq.s32.totalorder %v6398_v33, %v6345_v60 }
 0x390   : > { %4056 = vmatprep.mubr.msk.f32.mxu1 %vm999_vm9, %v4954_v51 }
 0x392   : > { %v4596_v57 = vpop.f32.mrb[32].mxu1  ;;  %4039 = vmatmul.mubr.msk.f32.gmra.mrb[66].mxu0 %vm992_vm10, %v4954_v51  ;;  %vm995_vm10 = vcmp.eq.s32.totalorder %v6398_v33, %v6337_v24 }
 0x393   : > { %v2874_v44 = vpop.f32.mrb[33].mxu1  ;;  %4040 = vmatprep.mubr.msk.f32.mxu0 %vm997_vm11, %v4954_v51  ;;  %vm1003_vm11 = vcmp.eq.s32.totalorder %v6398_v33, %v6353_v59 }
 0x394   : > { %v6330_v35 = vpack.c.bf16 %v4596_v57, %v2874_v44 }
 0x396   : > { %4041 = vmatmul.mubr.msk.f32.gmra.mrb[68].mxu0 %vm996_vm12, %v4954_v51  ;;  %vm1007_vm12 = vcmp.eq.s32.totalorder %v6398_v33, %v6363_v16 }
 0x397   : > { %4042 = vmatprep.mubr.msk.f32.mxu0 %vm1001_vm13, %v4954_v51  ;;  %vm1011_vm13 = vcmp.eq.s32.totalorder %v6398_v33, %v6371_v19 }
 0x39a   : > { %4043 = vmatmul.mubr.msk.f32.gmra.mrb[70].mxu0 %vm1000_vm14, %v4954_v51  ;;  %vm1015_vm14 = vcmp.eq.s32.totalorder %v6398_v33, %v6379_v21 }
 0x39b   : > { %4044 = vmatprep.mubr.msk.f32.mxu0 %vm1005_vm15, %v4954_v51  ;;  %vm1019_vm15 = vcmp.eq.s32.totalorder %v6398_v33, %v6389_v6 }
 0x39e   : > { %v4599_v45 = vpop.f32.mrb[34].mxu1  ;;  %4045 = vmatmul.mubr.msk.f32.gmra.mrb[72].mxu0 %vm1004_vm0, %v4954_v51  ;;  %vm990_vm0 = vcmp.eq.s32.totalorder %v983_v48, %v6301_v49 }
 0x39f   : > { %v2884_v39 = vpop.f32.mrb[35].mxu1  ;;  %4046 = vmatprep.mubr.msk.f32.mxu0 %vm1009_vm2, %v4954_v51  ;;  %vm998_vm2 = vcmp.eq.s32.totalorder %v983_v48, %v6345_v60 }
 0x3a0   : > { %v6332_v28 = vpack.c.bf16 %v4599_v45, %v2884_v39 }
 0x3a2   : > { %4047 = vmatmul.mubr.msk.f32.gmra.mrb[74].mxu0 %vm1008_vm3, %v4954_v51  ;;  %vm994_vm3 = vcmp.eq.s32.totalorder %v983_v48, %v6337_v24 }
 0x3a3   : > { %4048 = vmatprep.mubr.msk.f32.mxu0 %vm1013_vm4, %v4954_v51  ;;  %vm1002_vm4 = vcmp.eq.s32.totalorder %v983_v48, %v6353_v59 }
 0x3a6   : > { %4049 = vmatmul.mubr.msk.f32.gmra.mrb[76].mxu0 %vm1012_vm5, %v4954_v51  ;;  %vm1006_vm5 = vcmp.eq.s32.totalorder %v983_v48, %v6363_v16 }
 0x3a7   : > { %4050 = vmatprep.mubr.msk.f32.mxu0 %vm1017_vm7, %v4954_v51  ;;  %vm1010_vm7 = vcmp.eq.s32.totalorder %v983_v48, %v6371_v19 }
 0x3aa   : > { %v4602_v46 = vpop.f32.mrb[36].mxu1  ;;  %4051 = vmatmul.mubr.msk.f32.gmra.mrb[78].mxu0 %vm1016_vm1, %v4954_v51  ;;  %vm1014_vm1 = vcmp.eq.s32.totalorder %v983_v48, %v6379_v21 }
 0x3ab   : > { %v2894_v40 = vpop.f32.mrb[37].mxu1  ;;  %4052 = vmatprep.mubr.msk.f32.mxu0 %vm991_vm8, %v4954_v51  ;;  %vm1018_vm8 = vcmp.eq.s32.totalorder %v983_v48, %v6389_v6 }
 0x3ac   : > { %v6334_v10 = vpack.c.bf16 %v4602_v46, %v2894_v40 }
 0x3b6   : > { %v4605_v14 = vpop.f32.mrb[38].mxu1 }
 0x3b7   : > { %v2904_v56 = vpop.f32.mrb[39].mxu1 }
 0x3b8   : > { %v6355_v15 = vpack.c.bf16 %v4605_v14, %v2904_v56 }
 0x3c2   : > { %v4608_v7 = vpop.f32.mrb[40].mxu1 }
 0x3c3   : > { %v2914_v41 = vpop.f32.mrb[41].mxu1 }
 0x3c4   : > { %v6381_v5 = vpack.c.bf16 %v4608_v7, %v2914_v41 }
 0x3ce   : > { %v4611_v63 = vpop.f32.mrb[42].mxu1 }
 0x3cf   : > { %v2924_v17 = vpop.f32.mrb[43].mxu1 }
 0x3d0   : > { %v4804_v30 = vpack.c.bf16 %v4611_v63, %v2924_v17  ;;  %v3033_v17 = vld [vmem:[#allocation3] sm:$0xff] }
 0x3da   : > { %v4614_v31 = vpop.f32.mrb[44].mxu1 }
 0x3db   : > { %v2934_v0 = vpop.f32.mrb[45].mxu1 }
 0x3dc   : > { %v4808_v13 = vpack.c.bf16 %v4614_v31, %v2934_v0 }
 0x3e6   : > { %v4617_v38 = vpop.f32.mrb[46].mxu1 }
 0x3e7   : > { %v2944_v1 = vpop.f32.mrb[47].mxu1 }
 0x3e8   : > { %v4812_v50 = vpack.c.bf16 %v4617_v38, %v2944_v1 }
 0x3f2   : > { %v4620_v20 = vpop.f32.mrb[48].mxu1 }
 0x3f3   : > { %v2954_v22 = vpop.f32.mrb[49].mxu1 }
 0x3f4   : > { %v4782_v11 = vpack.c.bf16 %v4620_v20, %v2954_v22 }
 0x3f6   : > { %4783 = vmatprep.subr.bf16.mxu0 %v4782_v11  ;;  %4838 = vmatprep.subr.bf16.mxu1 %v4782_v11 }
 0x3f7   : > { %4785 = vmatpush3.bf16.msra.mxu0 %v6330_v35  ;;  %4846 = vmatpush3.bf16.msra.mxu1 %v6330_v35 }
 0x3fe   : > { %v4623_v12 = vpop.f32.mrb[50].mxu1 }
 0x3ff   : > { %v2964_v18 = vpop.f32.mrb[51].mxu1 }
 0x400   : > { %v4786_v62 = vpack.c.bf16 %v4623_v12, %v2964_v18  ;;  %v3034_v18 = vld [vmem:[#allocation3 + $0x8] sm:$0xff] }
 0x402   : > { %4787 = vmatprep.subr.bf16.mxu0 %v4786_v62  ;;  %4839 = vmatprep.subr.bf16.mxu1 %v4786_v62  ;;  %v3036_v62 = vld [vmem:[#allocation3 + $0x18] sm:$0xff] }
 0x403   : > { %4789 = vmatpush3.bf16.msra.mxu0 %v6332_v28  ;;  %4847 = vmatpush3.bf16.msra.mxu1 %v6332_v28 }
 0x40a   : > { %v4626_v43 = vpop.f32.mrb[52].mxu1 }
 0x40b   : > { %v2974_v3 = vpop.f32.mrb[53].mxu1 }
 0x40c   : > { %v4790_v54 = vpack.c.bf16 %v4626_v43, %v2974_v3 }
 0x40e   : > { %4791 = vmatprep.subr.bf16.mxu0 %v4790_v54  ;;  %4840 = vmatprep.subr.bf16.mxu1 %v4790_v54 }
 0x40f   : > { %4793 = vmatpush3.bf16.msra.mxu0 %v6334_v10  ;;  %4848 = vmatpush3.bf16.msra.mxu1 %v6334_v10 }
 0x416   : > { %v4629_v55 = vpop.f32.mrb[54].mxu1 }
 0x417   : > { %v2984_v58 = vpop.f32.mrb[55].mxu1 }
 0x418   : > { %v4794_v29 = vpack.c.bf16 %v4629_v55, %v2984_v58 }
 0x41a   : > { %4795 = vmatprep.subr.bf16.mxu0 %v4794_v29  ;;  %4841 = vmatprep.subr.bf16.mxu1 %v4794_v29 }
 0x41b   : > { %4797 = vmatpush3.bf16.msra.mxu0 %v6355_v15  ;;  %4849 = vmatpush3.bf16.msra.mxu1 %v6355_v15 }
 0x422   : > { %v4632_v36 = vpop.f32.mrb[56].mxu1 }
 0x423   : > { %v2994_v9 = vpop.f32.mrb[57].mxu1 }
 0x424   : > { %v4798_v4 = vpack.c.bf16 %v4632_v36, %v2994_v9  ;;  %v3037_v9 = vld [vmem:[#allocation3 + $0x20] sm:$0xff] }
 0x426   : > { %4799 = vmatprep.subr.bf16.mxu0 %v4798_v4  ;;  %4842 = vmatprep.subr.bf16.mxu1 %v4798_v4 }
 0x427   : > { %4801 = vmatpush3.bf16.msra.mxu0 %v6381_v5  ;;  %4850 = vmatpush3.bf16.msra.mxu1 %v6381_v5 }
 0x42e   : > { %v4635_v47 = vpop.f32.mrb[58].mxu1 }
 0x42f   : > { %v3004_v53 = vpop.f32.mrb[59].mxu1 }
 0x430   : > { %v4802_v8 = vpack.c.bf16 %v4635_v47, %v3004_v53 }
 0x432   : > { %4803 = vmatprep.subr.bf16.mxu0 %v4802_v8  ;;  %4843 = vmatprep.subr.bf16.mxu1 %v4802_v8 }
 0x433   : > { %4805 = vmatpush3.bf16.msra.mxu0 %v4804_v30  ;;  %4851 = vmatpush3.bf16.msra.mxu1 %v4804_v30  ;;  %v3035_v30 = vld [vmem:[#allocation3 + $0x10] sm:$0xff] }
 0x43a   : > { %v4638_v42 = vpop.f32.mrb[60].mxu1 }
 0x43b   : > { %v3014_v23 = vpop.f32.mrb[61].mxu1 }
 0x43c   : > { %v4806_v26 = vpack.c.bf16 %v4638_v42, %v3014_v23  ;;  %v3038_v23 = vld [vmem:[#allocation3 + $0x28] sm:$0xff] }
 0x43e   : > { %4807 = vmatprep.subr.bf16.mxu0 %v4806_v26  ;;  %4844 = vmatprep.subr.bf16.mxu1 %v4806_v26 }
 0x43f   : > { %4809 = vmatpush3.bf16.msra.mxu0 %v4808_v13  ;;  %4852 = vmatpush3.bf16.msra.mxu1 %v4808_v13 }
 0x446   : > { %v4641_v27 = vpop.f32.mrb[62].mxu1 }
 0x447   : > { %v3024_v34 = vpop.f32.mrb[63].mxu1 }
 0x448   : > { %v4810_v37 = vpack.c.bf16 %v4641_v27, %v3024_v34 }
 0x44a   : > { %4811 = vmatprep.subr.bf16.mxu0 %v4810_v37  ;;  %4845 = vmatprep.subr.bf16.mxu1 %v4810_v37  ;;  %v3039_v37 = vld [vmem:[#allocation3 + $0x30] sm:$0xff] }
 0x44b   : > { %4813 = vmatpush3.bf16.msra.mxu0 %v4812_v50  ;;  %4853 = vmatpush3.bf16.msra.mxu1 %v4812_v50 }
 0x44e   : > { %4053 = vmatmul.mubr.msk.f32.vlgmr.msra.gmra.mrb[80].mxu0 %vm990_vm0, %v4954_v51  ;;  %4057 = vmatmul.mubr.msk.f32.vlgmr.msra.gmra.mrb[64].mxu1 %vm998_vm2, %v4954_v51 }
 0x44f   : > { %4054 = vmatprep.mubr.msk.f32.mxu0 %vm995_vm10, %v4954_v51  ;;  %4058 = vmatprep.mubr.msk.f32.mxu1 %vm1003_vm11, %v4954_v51 }
 0x452   : > { %4055 = vmatmul.mubr.msk.f32.gmra.mrb[82].mxu0 %vm994_vm3, %v4954_v51  ;;  %4059 = vmatmul.mubr.msk.f32.gmra.mrb[66].mxu1 %vm1002_vm4, %v4954_v51 }
 0x453   : > { %4060 = vmatprep.mubr.msk.f32.mxu1 %vm1007_vm12, %v4954_v51 }
 0x456   : > { %4061 = vmatmul.mubr.msk.f32.gmra.mrb[68].mxu1 %vm1006_vm5, %v4954_v51 }
 0x457   : > { %4062 = vmatprep.mubr.msk.f32.mxu1 %vm1011_vm13, %v4954_v51 }
 0x45a   : > { %4063 = vmatmul.mubr.msk.f32.gmra.mrb[70].mxu1 %vm1010_vm7, %v4954_v51 }
 0x45b   : > { %4064 = vmatprep.mubr.msk.f32.mxu1 %vm1015_vm14, %v4954_v51 }
 0x45e   : > { %4065 = vmatmul.mubr.msk.f32.gmra.mrb[72].mxu1 %vm1014_vm1, %v4954_v51 }
 0x45f   : > { %4066 = vmatprep.mubr.msk.f32.mxu1 %vm1019_vm15, %v4954_v51 }
 0x461   : > { %v4286_v49 = vpop.f32.mrb[64].mxu0 }
 0x462   : > { %4067 = vmatmul.mubr.msk.f32.gmra.mrb[74].mxu1 %vm1018_vm8, %v4954_v51  ;;  %v4287_v61 = vpop.f32.mrb[65].mxu0 }
 0x463   : > { %v4288_v52 = vadd.f32 %v4287_v61, %v4286_v49 }
 0x465   : > { %v4289_v2 = vpop.f32.mrb[66].mxu0 }
 0x466   : > { %v4290_v57 = vpop.f32.mrb[67].mxu0 }
 0x467   : > { %v4291_v44 = vadd.f32 %v4290_v57, %v4289_v2 }
 0x469   : > { %v4292_v35 = vpop.f32.mrb[68].mxu0 }
 0x46a   : > { %v4293_v45 = vpop.f32.mrb[69].mxu0 }
 0x46b   : > { %v4294_v39 = vadd.f32 %v4293_v45, %v4292_v35 }
 0x46d   : > { %v4295_v28 = vpop.f32.mrb[70].mxu0 }
 0x46e   : > { %v4296_v46 = vpop.f32.mrb[71].mxu0 }
 0x46f   : > { %v4297_v40 = vadd.f32 %v4296_v46, %v4295_v28  ;;  %v3288_v28 = vld [vmem:[%s5084_s12 + $0x8] sm:$0xff] (!%p4068_p11)  ;;  %v3289_v46 = vld [vmem:[%s5084_s12 + $0x10] sm:$0xff] (!%p4068_p11) }
 0x471   : > { %v4298_v10 = vpop.f32.mrb[72].mxu0 }
 0x472   : > { %v4299_v24 = vpop.f32.mrb[73].mxu0 }
 0x473   : > { %v4300_v60 = vadd.f32 %v4299_v24, %v4298_v10  ;;  %v3290_v10 = vld [vmem:[%s5084_s12 + $0x18] sm:$0xff] (!%p4068_p11)  ;;  %v3279_v24 = vld [vmem:[#allocation2] sm:$0xff] (!%p4068_p11) }
 0x474   : > { %4650 = vmatprep.mubr.msk.f32.mxu0 (!%p4068_p11), %vm2374_vm6, %v3279_v24 }
 0x475   : > { %v4301_v14 = vpop.f32.mrb[74].mxu0 }
 0x476   : > { %v4302_v59 = vpop.f32.mrb[75].mxu0 }
 0x477   : > { %v4303_v56 = vadd.f32 %v4302_v59, %v4301_v14  ;;  %v4818_v14 = vpack.c.bf16 (!%p4068_p11), %v3290_v10, %v3289_v46  ;;  %v3280_v59 = vld [vmem:[#allocation2 + $0x8] sm:$0xff] (!%p4068_p11) }
 0x479   : > { %v4304_v15 = vpop.f32.mrb[76].mxu0 }
 0x47a   : > { %v4305_v16 = vpop.f32.mrb[77].mxu0 }
 0x47b   : > { %v4306_v51 = vadd.f32 %v4305_v16, %v4304_v15  ;;  %v3281_v15 = vld [vmem:[#allocation2 + $0x10] sm:$0xff] (!%p4068_p11) }
 0x47c   : > { %v3285_v16 = vld [vmem:[#allocation2 + $0x30] sm:$0xff] (!%p4068_p11) }
 0x47d   : > { %v4307_v19 = vpop.f32.mrb[78].mxu0 }
 0x47e   : > { %v4308_v7 = vpop.f32.mrb[79].mxu0 }
 0x47f   : > { %v4309_v21 = vadd.f32 %v4308_v7, %v4307_v19  ;;  %v3286_v19 = vld [vmem:[#allocation2 + $0x38] sm:$0xff] (!%p4068_p11) }
 0x521   : > { %v4342_v41 = vpop.f32.mrb[80].mxu0  ;;  %v4348_v5 = vpop.f32.mrb[64].mxu1 }
 0x522   : > { %v4343_v6 = vpop.f32.mrb[81].mxu0  ;;  %v4349_v32 = vpop.f32.mrb[65].mxu1 }
 0x523   : > { %v4344_v33 = vadd.f32 %v4343_v6, %v4342_v41  ;;  %v4350_v63 = vadd.f32 %v4349_v32, %v4348_v5  ;;  %v4077_v32 = vld [vmem:[%s480_s16] ss:$0 sm:$0xff] (!%p4068_p11) }
 0x525   : > { %v3213_v31 = vadd.f32 %v4344_v33, %v4288_v52  ;;  %v4345_v0 = vpop.f32.mrb[82].mxu0  ;;  %v3223_v13 = vadd.f32 %v4350_v63, %v4294_v39  ;;  %v4351_v38 = vpop.f32.mrb[66].mxu1  ;;  %v3287_v39 = vld [vmem:[%s5084_s12] sm:$0xff] (!%p4068_p11) }
 0x526   : > { %v4346_v1 = vpop.f32.mrb[83].mxu0  ;;  %v4352_v50 = vpop.f32.mrb[67].mxu1 }
 0x527   : > { %v3251_v20 = vadd.f32 %v3213_v31, %v3033_v17  ;;  %v4347_v22 = vadd.f32 %v4346_v1, %v4345_v0  ;;  %v3253_v11 = vadd.f32 %v3223_v13, %v3035_v30  ;;  %v4353_v12 = vadd.f32 %v4352_v50, %v4351_v38 }
 0x529   : > { %3259 = vst.msk [vmem:[#allocation3] sm:$0xff] %vm2374_vm6, %v3251_v20  ;;  %v3218_v43 = vadd.f32 %v4347_v22, %v4291_v44  ;;  %3261 = vst.msk [vmem:[#allocation3 + $0x10] sm:$0xff] %vm2374_vm6, %v3253_v11  ;;  %v3228_v3 = vadd.f32 %v4353_v12, %v4297_v40  ;;  %v4354_v54 = vpop.f32.mrb[68].mxu1  ;;  %v3040_v44 = vld [vmem:[#allocation3 + $0x38] sm:$0xff]  ;;  %v4814_v40 = vpack.c.bf16 (!%p4068_p11), %v3288_v28, %v3287_v39 }
 0x52a   : > { %v4355_v55 = vpop.f32.mrb[69].mxu1 }
 0x52b   : > { %v3252_v58 = vadd.f32 %v3218_v43, %v3034_v18  ;;  %v3254_v29 = vadd.f32 %v3228_v3, %v3036_v62  ;;  %v4356_v36 = vadd.f32 %v4355_v55, %v4354_v54  ;;  %4815 = vmatprep.subr.bf16.mxu0 (!%p4068_p11), %v4814_v40  ;;  %4854 = vmatprep.subr.bf16.mxu1 (!%p4068_p11), %v4814_v40 }
 0x52c   : > { %4817 = vmatpush3.bf16.msra.mxu0 (!%p4068_p11), %v4814_v40  ;;  %4856 = vmatpush3.bf16.msra.mxu1 (!%p4068_p11), %v4814_v40 }
 0x52d   : > { %3260 = vst.msk [vmem:[#allocation3 + $0x8] sm:$0xff] %vm2374_vm6, %v3252_v58  ;;  %3262 = vst.msk [vmem:[#allocation3 + $0x18] sm:$0xff] %vm2374_vm6, %v3254_v29  ;;  %v3233_v4 = vadd.f32 %v4356_v36, %v4300_v60  ;;  %v4357_v47 = vpop.f32.mrb[70].mxu1  ;;  %v3283_v60 = vld [vmem:[#allocation2 + $0x20] sm:$0xff] (!%p4068_p11)  ;;  %4819 = vmatprep.subr.bf16.mxu0 (!%p4068_p11), %v4818_v14  ;;  %4855 = vmatprep.subr.bf16.mxu1 (!%p4068_p11), %v4818_v14 }
 0x52e   : > { %v4358_v53 = vpop.f32.mrb[71].mxu1  ;;  %4656 = vmatprep.mubr.msk.f32.mxu1 (!%p4068_p11), %vm2374_vm6, %v3283_v60 }
 0x52f   : > { %v3255_v8 = vadd.f32 %v3233_v4, %v3037_v9  ;;  %v4359_v42 = vadd.f32 %v4358_v53, %v4357_v47 }
 0x530   : > { %4821 = vmatpush3.bf16.msra.mxu0 (!%p4068_p11), %v4818_v14  ;;  %4857 = vmatpush3.bf16.msra.mxu1 (!%p4068_p11), %v4818_v14  ;;  %v3271_v41 = vld [vmem:[#allocation3] sm:$0xff] (!%p4068_p11)  ;;  %v3273_v22 = vld [vmem:[#allocation3 + $0x10] sm:$0xff] (!%p4068_p11) }
 0x531   : > { %3263 = vst.msk [vmem:[#allocation3 + $0x20] sm:$0xff] %vm2374_vm6, %v3255_v8  ;;  %v3238_v26 = vadd.f32 %v4359_v42, %v4303_v56  ;;  %v4360_v25 = vpop.f32.mrb[72].mxu1  ;;  %v3284_v56 = vld [vmem:[#allocation2 + $0x28] sm:$0xff] (!%p4068_p11) }
 0x532   : > { %v4361_v27 = vpop.f32.mrb[73].mxu1 }
 0x533   : > { %v3256_v34 = vadd.f32 %v3238_v26, %v3038_v23  ;;  %v4362_v48 = vadd.f32 %v4361_v27, %v4360_v25  ;;  %4651 = vmatmul.mubr.msk.f32.vlgmr.msra.gmra.mrb[0].mxu0 (!%p4068_p11), %vm2374_vm6, %v3280_v59  ;;  %4657 = vmatmul.mubr.msk.f32.vlgmr.msra.gmra.mrb[0].mxu1 (!%p4068_p11), %vm2374_vm6, %v3284_v56 }
 0x534   : > { %4653 = vmatprep.mubr.msk.f32.mxu0 (!%p4068_p11), %vm2374_vm6, %v3281_v15  ;;  %4659 = vmatprep.mubr.msk.f32.mxu1 (!%p4068_p11), %vm2374_vm6, %v3285_v16  ;;  %v3272_v7 = vld [vmem:[#allocation3 + $0x8] sm:$0xff] (!%p4068_p11)  ;;  %v3274_v38 = vld [vmem:[#allocation3 + $0x18] sm:$0xff] (!%p4068_p11) }
 0x535   : > { %3264 = vst.msk [vmem:[#allocation3 + $0x28] sm:$0xff] %vm2374_vm6, %v3256_v34  ;;  %v3243_v49 = vadd.f32 %v4362_v48, %v4306_v51  ;;  %v4363_v61 = vpop.f32.mrb[74].mxu1  ;;  %v3282_v51 = vld [vmem:[#allocation2 + $0x18] sm:$0xff] (!%p4068_p11) }
 0x536   : > { %v4364_v52 = vpop.f32.mrb[75].mxu1 }
 0x537   : > { %v3257_v2 = vadd.f32 %v3243_v49, %v3039_v37  ;;  %v4365_v57 = vadd.f32 %v4364_v52, %v4363_v61  ;;  %3270 = sbr.rel (%p4068_p11) target bundleno = 2013 (0x7dd), region = 72  ;;  %4654 = vmatmul.mubr.msk.f32.gmra.mrb[2].mxu0 (!%p4068_p11), %vm2374_vm6, %v3282_v51  ;;  %4660 = vmatmul.mubr.msk.f32.gmra.mrb[2].mxu1 (!%p4068_p11), %vm2374_vm6, %v3286_v19 }
 0x538   : > { %v3275_v5 = vld [vmem:[#allocation3 + $0x20] sm:$0xff] (!%p4068_p11) }
 0x539   : > { %3265 = vst.msk [vmem:[#allocation3 + $0x30] sm:$0xff] %vm2374_vm6, %v3257_v2  ;;  %v3248_v35 = vadd.f32 %v4365_v57, %v4309_v21 }
 0x53b   : > { %v3258_v45 = vadd.f32 %v3248_v35, %v3040_v44 }
 0x53c   : > { %v3276_v21 = vld [vmem:[#allocation3 + $0x28] sm:$0xff] (!%p4068_p11) }
 0x53d   : > { %3266 = vst.msk [vmem:[#allocation3 + $0x38] sm:$0xff] %vm2374_vm6, %v3258_v45 }
 0x53e   : > { %v4955_v37 = vmov (!%p4078_p12), 0.0  }
 0x53f   : > { %3462 = vst.msk [vmem:[#allocation3] sm:$0xff] (!%p4078_p12), %vm2374_vm6, %v4955_v37  ;;  %3463 = vst.msk [vmem:[#allocation3 + $0x8] sm:$0xff] (!%p4078_p12), %vm2374_vm6, %v4955_v37 }
 0x540   : > { %v3277_v11 = vld [vmem:[#allocation3 + $0x30] sm:$0xff]  ;;  %3464 = vst.msk [vmem:[#allocation3 + $0x10] sm:$0xff] (!%p4078_p12), %vm2374_vm6, %v4955_v37  ;;  %3465 = vst.msk [vmem:[#allocation3 + $0x18] sm:$0xff] (!%p4078_p12), %vm2374_vm6, %v4955_v37 }
 0x541   : > { %3466 = vst.msk [vmem:[#allocation3 + $0x20] sm:$0xff] (!%p4078_p12), %vm2374_vm6, %v4955_v37  ;;  %3467 = vst.msk [vmem:[#allocation3 + $0x28] sm:$0xff] (!%p4078_p12), %vm2374_vm6, %v4955_v37 }
 0x542   : > { %3468 = vst.msk [vmem:[#allocation3 + $0x30] sm:$0xff] (!%p4078_p12), %vm2374_vm6, %v4955_v37 }
 0x544   : > { %v3278_v1 = vld [vmem:[#allocation3 + $0x38] sm:$0xff] }
 0x545   : > { %3469 = vst.msk [vmem:[#allocation3 + $0x38] sm:$0xff] (!%p4078_p12), %vm2374_vm6, %v4955_v37 }
 0x606   : > { %v4652_v6 = vpop.f32.mrb[0].mxu0  ;;  %v4658_v33 = vpop.f32.mrb[0].mxu1 }
 0x607   : > { %v3421_v63 = vadd.f32 %v4652_v6, %v3272_v7  ;;  %v3425_v17 = vadd.f32 %v4658_v33, %v3276_v21  ;;  %v3381_v30 = vpop.f32.mrb[1].mxu0  ;;  %v3401_v31 = vpop.f32.mrb[1].mxu1 }
 0x608   : > { %v3420_v0 = vadd.f32 %v3381_v30, %v3271_v41  ;;  %v3424_v13 = vadd.f32 %v3401_v31, %v3275_v5 }
 0x609   : > { %v6496_v50 = vadd.f32 %v4077_v32, %v3421_v63  ;;  %v6498_v20 = vadd.f32 %v4077_v32, %v3425_v17 }
 0x60a   : > { %v3435_v12 = vadd.f32 %v4077_v32, %v3420_v0  ;;  %v6500_v18 = vadd.f32 %v4077_v32, %v3424_v13  ;;  %v4655_v62 = vpop.f32.mrb[2].mxu0  ;;  %v4661_v43 = vpop.f32.mrb[2].mxu1  ;;  %3453 = sbr.rel (%p4078_p12) target bundleno = 1555 (0x613), region = 76 }
 0x60b   : > { %v3444_v3 = vmax.f32 %v6496_v50, 0.0  ;;  %v3448_v54 = vmax.f32 %v6498_v20, 0.0  ;;  %v3423_v55 = vadd.f32 %v4655_v62, %v3274_v38  ;;  %v3427_v58 = vadd.f32 %v4661_v43, %v3278_v1  ;;  %v3391_v29 = vpop.f32.mrb[3].mxu0  ;;  %v3411_v36 = vpop.f32.mrb[3].mxu1 }
 0x60c   : > { %v3443_v9 = vmax.f32 %v3435_v12, 0.0  ;;  %v3447_v4 = vmax.f32 %v6500_v18, 0.0  ;;  %v3422_v47 = vadd.f32 %v3391_v29, %v3273_v22  ;;  %v3426_v53 = vadd.f32 %v3411_v36, %v3277_v11 }
 0x60d   : > { %v3438_v8 = vadd.f32 %v4077_v32, %v3423_v55  ;;  %v3442_v42 = vadd.f32 %v4077_v32, %v3427_v58  ;;  %3455 = vst.msk [vmem:[#allocation2 + $0x8] sm:$0xff] (!%p4078_p12), %vm2374_vm6, %v3444_v3  ;;  %3459 = vst.msk [vmem:[#allocation2 + $0x28] sm:$0xff] (!%p4078_p12), %vm2374_vm6, %v3448_v54 }
 0x60e   : > { %v3437_v23 = vadd.f32 %v4077_v32, %v3422_v47  ;;  %v3441_v26 = vadd.f32 %v4077_v32, %v3426_v53  ;;  %3454 = vst.msk [vmem:[#allocation2] sm:$0xff] (!%p4078_p12), %vm2374_vm6, %v3443_v9  ;;  %3458 = vst.msk [vmem:[#allocation2 + $0x20] sm:$0xff] (!%p4078_p12), %vm2374_vm6, %v3447_v4 }
 0x60f   : > { %v3446_v25 = vmax.f32 %v3438_v8, 0.0  ;;  %v3450_v27 = vmax.f32 %v3442_v42, 0.0 }
 0x610   : > { %v3445_v34 = vmax.f32 %v3437_v23, 0.0  ;;  %v3449_v48 = vmax.f32 %v3441_v26, 0.0 }
 0x611   : > { %3457 = vst.msk [vmem:[#allocation2 + $0x18] sm:$0xff] %vm2374_vm6, %v3446_v25  ;;  %3461 = vst.msk [vmem:[#allocation2 + $0x38] sm:$0xff] %vm2374_vm6, %v3450_v27 }
 0x612   : > { %3456 = vst.msk [vmem:[#allocation2 + $0x10] sm:$0xff] %vm2374_vm6, %v3445_v34  ;;  %3460 = vst.msk [vmem:[#allocation2 + $0x30] sm:$0xff] %vm2374_vm6, %v3449_v48 }
 0x613 PF: > { %p4079_p13 = scmp.ne.s32.totalorder %s4934_s18, 1 }
 0x614   : > { %v3474_v49 = vld [vmem:[%s6615_s7] sm:$0xff] (!%p4079_p13)  ;;  %v3475_v61 = vld [vmem:[%s6615_s7 + $0x8] sm:$0xff] (!%p4079_p13)  ;;  %v3476_v52 = vld [vmem:[%s6615_s7 + $0x10] sm:$0xff] (!%p4079_p13)  ;;  %4670 = vmatprep.mubr.msk.f32.mxu0 (!%p4079_p13), %vm2374_vm6, %v3443_v9 }
 0x615   : > { %3473 = sbr.rel (%p4079_p13) target bundleno = 2013 (0x7dd), region = 80  ;;  %v4822_v2 = vpack.c.bf16 (!%p4079_p13), %v3475_v61, %v3474_v49  ;;  %v3477_v57 = vld [vmem:[%s6615_s7 + $0x18] sm:$0xff] (!%p4079_p13)  ;;  %v3622_v44 = vld [vmem:[%s6617_s9] sm:$0xff] (!%p4079_p13)  ;;  %v3623_v35 = vld [vmem:[%s6617_s9 + $0x8] sm:$0xff] (!%p4079_p13) }
 0x616   : > { %v4826_v45 = vpack.c.bf16 (!%p4079_p13), %v3477_v57, %v3476_v52  ;;  %v4830_v39 = vpack.c.bf16 (!%p4079_p13), %v3623_v35, %v3622_v44  ;;  %v3624_v28 = vld [vmem:[%s6617_s9 + $0x10] sm:$0xff] (!%p4079_p13)  ;;  %v3625_v46 = vld [vmem:[%s6617_s9 + $0x18] sm:$0xff] (!%p4079_p13)  ;;  %v4080_v10 = vld [vmem:[%s6616_s8] ss:$0 sm:$0xff] (!%p4079_p13) }
 0x617   : > { %4823 = vmatprep.subr.bf16.mxu0 (!%p4079_p13), %v4822_v2  ;;  %v4834_v40 = vpack.c.bf16 (!%p4079_p13), %v3625_v46, %v3624_v28  ;;  %v4089_v50 = vld [vmem:[%s6618_s10] ss:$0 sm:$0xff] (!%p4079_p13) }
 0x618   : > { %4825 = vmatpush3.bf16.msra.mxu0 (!%p4079_p13), %v4822_v2  ;;  %4831 = vmatprep.subr.bf16.mxu1 (!%p4079_p13), %v4830_v39 }
 0x619   : > { %4827 = vmatprep.subr.bf16.mxu0 (!%p4079_p13), %v4826_v45  ;;  %4833 = vmatpush3.bf16.msra.mxu1 (!%p4079_p13), %v4830_v39 }
 0x61a   : > { %4835 = vmatprep.subr.bf16.mxu1 (!%p4079_p13), %v4834_v40 }
 0x61c   : > { %4829 = vmatpush3.bf16.msra.mxu0 %v4826_v45 }
 0x61d   : > { %4837 = vmatpush3.bf16.msra.mxu1 %v4834_v40 }
 0x61f   : > { %4671 = vmatmul.mubr.msk.f32.vlgmr.msra.gmra.mrb[0].mxu0 %vm2374_vm6, %v3444_v3 }
 0x620   : > { %4673 = vmatprep.mubr.msk.f32.mxu0 %vm2374_vm6, %v3445_v34 }
 0x623   : > { %4674 = vmatmul.mubr.msk.f32.gmra.mrb[2].mxu0 %vm2374_vm6, %v3446_v25 }
 0x624   : > { %4676 = vmatprep.mubr.msk.f32.mxu0 %vm2374_vm6, %v3447_v4 }
 0x627   : > { %4677 = vmatmul.mubr.msk.f32.gmra.mrb[4].mxu0 %vm2374_vm6, %v3448_v54 }
 0x628   : > { %4679 = vmatprep.mubr.msk.f32.mxu0 %vm2374_vm6, %v3449_v48 }
 0x62b   : > { %4680 = vmatmul.mubr.msk.f32.gmra.mrb[6].mxu0 %vm2374_vm6, %v3450_v27 }
 0x6f2   : > { %v4672_v24 = vpop.f32.mrb[0].mxu0 }
 0x6f3   : > { %v3581_v60 = vadd.f32 %v4672_v24, %v4080_v10  ;;  %v3575_v14 = vpop.f32.mrb[1].mxu0 }
 0x6f4   : > { %v3576_v59 = vadd.f32 %v4080_v10, %v3575_v14 }
 0x6f5   : > { %v3615_v16 = vmax.f32 %v3581_v60, 0.0 }
 0x6f6   : > { %v4675_v56 = vpop.f32.mrb[2].mxu0  ;;  %v3614_v15 = vmax.f32 %v3576_v59, 0.0 }
 0x6f7   : > { %v3591_v51 = vadd.f32 %v4675_v56, %v4080_v10  ;;  %v3585_v19 = vpop.f32.mrb[3].mxu0 }
 0x6f8   : > { %v3586_v7 = vadd.f32 %v4080_v10, %v3585_v19  ;;  %4690 = vmatprep.mubr.msk.f32.mxu1 %vm2374_vm6, %v3614_v15 }
 0x6f9   : > { %4691 = vmatmul.mubr.msk.f32.vlgmr.msra.gmra.mrb[0].mxu1 %vm2374_vm6, %v3615_v16  ;;  %v3617_v5 = vmax.f32 %v3591_v51, 0.0 }
 0x6fa   : > { %v3616_v21 = vmax.f32 %v3586_v7, 0.0  ;;  %v4678_v41 = vpop.f32.mrb[4].mxu0 }
 0x6fb   : > { %v3601_v6 = vadd.f32 %v4678_v41, %v4080_v10  ;;  %v3595_v32 = vpop.f32.mrb[5].mxu0 }
 0x6fc   : > { %v3596_v33 = vadd.f32 %v4080_v10, %v3595_v32  ;;  %4693 = vmatprep.mubr.msk.f32.mxu1 %vm2374_vm6, %v3616_v21 }
 0x6fd   : > { %4694 = vmatmul.mubr.msk.f32.gmra.mrb[2].mxu1 %vm2374_vm6, %v3617_v5  ;;  %v3619_v30 = vmax.f32 %v3601_v6, 0.0 }
 0x6fe   : > { %v3618_v63 = vmax.f32 %v3596_v33, 0.0  ;;  %v4681_v17 = vpop.f32.mrb[6].mxu0 }
 0x6ff   : > { %v3611_v31 = vadd.f32 %v4681_v17, %v4080_v10  ;;  %v3605_v0 = vpop.f32.mrb[7].mxu0 }
 0x700   : > { %v3606_v13 = vadd.f32 %v4080_v10, %v3605_v0  ;;  %4696 = vmatprep.mubr.msk.f32.mxu1 %vm2374_vm6, %v3618_v63 }
 0x701   : > { %4697 = vmatmul.mubr.msk.f32.gmra.mrb[4].mxu1 %vm2374_vm6, %v3619_v30  ;;  %v3621_v1 = vmax.f32 %v3611_v31, 0.0 }
 0x702   : > { %v3620_v38 = vmax.f32 %v3606_v13, 0.0 }
 0x704   : > { %4699 = vmatprep.mubr.msk.f32.mxu1 %vm2374_vm6, %v3620_v38 }
 0x705   : > { %4700 = vmatmul.mubr.msk.f32.gmra.mrb[6].mxu1 %vm2374_vm6, %v3621_v1 }
 0x7cc   : > { %v4692_v20 = vpop.f32.mrb[0].mxu1 }
 0x7cd   : > { %v3729_v22 = vadd.f32 %v4692_v20, %v4089_v50  ;;  %v3723_v11 = vpop.f32.mrb[1].mxu1 }
 0x7ce   : > { %v3724_v12 = vadd.f32 %v4089_v50, %v3723_v11 }
 0x7cf   : > { %3763 = vst [vmem:[%s6619_s11 + $0x8] sm:$0xff] %v3729_v22 }
 0x7d0   : > { %3762 = vst [vmem:[%s6619_s11] sm:$0xff] %v3724_v12  ;;  %v4695_v18 = vpop.f32.mrb[2].mxu1 }
 0x7d1   : > { %v3739_v62 = vadd.f32 %v4695_v18, %v4089_v50  ;;  %v3733_v43 = vpop.f32.mrb[3].mxu1 }
 0x7d2   : > { %v3734_v3 = vadd.f32 %v4089_v50, %v3733_v43 }
 0x7d3   : > { %3765 = vst [vmem:[%s6619_s11 + $0x18] sm:$0xff] %v3739_v62 }
 0x7d4   : > { %3764 = vst [vmem:[%s6619_s11 + $0x10] sm:$0xff] %v3734_v3  ;;  %v4698_v54 = vpop.f32.mrb[4].mxu1 }
 0x7d5   : > { %v3749_v55 = vadd.f32 %v4698_v54, %v4089_v50  ;;  %v3743_v58 = vpop.f32.mrb[5].mxu1 }
 0x7d6   : > { %v3744_v29 = vadd.f32 %v4089_v50, %v3743_v58 }
 0x7d7   : > { %3767 = vst [vmem:[%s6619_s11 + $0x28] sm:$0xff] %v3749_v55 }
 0x7d8   : > { %3766 = vst [vmem:[%s6619_s11 + $0x20] sm:$0xff] %v3744_v29  ;;  %v4701_v36 = vpop.f32.mrb[6].mxu1 }
 0x7d9   : > { %v3759_v9 = vadd.f32 %v4701_v36, %v4089_v50  ;;  %v3753_v4 = vpop.f32.mrb[7].mxu1 }
 0x7da   : > { %v3754_v47 = vadd.f32 %v4089_v50, %v3753_v4 }
 0x7db   : > { %3769 = vst [vmem:[%s6619_s11 + $0x38] sm:$0xff] %v3759_v9 }
 0x7dc   : > { %3768 = vst [vmem:[%s6619_s11 + $0x30] sm:$0xff] %v3754_v47 }
 0x7dd PF: > { %s6671_s1 = sld [smem:[#allocation6_spill]]  ;;  %s6672_s17 = sld [smem:[#allocation4_spill]] }
 0x7de   : > { %s6673_s18 = sld [smem:[#allocation5_spill]]  ;;  %s6674_s19 = sld [smem:[#allocation7_spill]] }
 0x7df   : > { %s6675_s20 = sld [smem:[#allocation8_spill]] }
 0x7e3   : > { %s21_s21 = sadd.s32 1, %s6671_s1  }
 0x7e4   : > { %p18_p0 = scmp.ge.s32.totalorder %s21_s21, 6  }
 0x7e6   :  { %20 = sbr.rel (!%p18_p0) target bundleno = 4 (0x4), region = 121 }

</bundles_post_ra>
